<compile_context>
chip_gen: v7x
topology: tpu7x:2x2x1
jax: 0.10.0
libtpu: 0.0.40
codegen_flags: <defaults>
</compile_context>

<pallas_src>
import jax
import jax.numpy as jnp
from jax.experimental import pallas as pl
from jax.experimental.pallas import tpu as pltpu


# ----------------------------- Pallas kernel --------------------------------
def _decoder_kernel(x_ref, wih_ref, whh_ref, b_ref, h0_ref, c0_ref,
                    wfc_ref, bfc_ref,
                    logits_ref, hn_ref, cn_ref,
                    seq_buf, gx_buf, h_st, c_st):
    """One grid point = one LSTM layer; the full T-step recurrence runs in-kernel.

    seq_buf (VMEM scratch, (T, B, H)) holds the current layer's input sequence on
    entry and its output sequence on exit (processed in place).
    gx_buf  (VMEM scratch, (T, B, 4H)) holds the batched input-gate pre-activations.
    """
    l = pl.program_id(0)
    n_layers = pl.num_programs(0)
    T, B, H = seq_buf.shape

    # Layer 0: seed seq_buf with the embedded tokens (single copy; the emb input
    # block index is constant so it is DMA'd only once for the whole grid).
    @pl.when(l == 0)
    def _():
        seq_buf[...] = x_ref[...]

    # Batched input projection for all timesteps at once:
    #   (T*B, H) @ (H, 4H) + b  ->  (T, B, 4H)
    x_all = seq_buf[...].reshape(T * B, H)
    gx = jnp.dot(x_all, wih_ref[0], preferred_element_type=jnp.float32) + b_ref[0]
    gx_buf[...] = gx.reshape(T, B, 4 * H)

    # Running hidden / cell state for this layer.
    h_st[...] = h0_ref[0]
    c_st[...] = c0_ref[0]

    def step(t, carry):
        # Recurrent part only: small (B, H) @ (H, 4H) matmul per step.
        gates = gx_buf[t] + jnp.dot(h_st[...], whh_ref[0],
                                    preferred_element_type=jnp.float32)
        # PyTorch gate order: input, forget, cell (g), output. Slices are
        # 128-lane aligned when H is a multiple of 128.
        i_g = jax.nn.sigmoid(gates[:, 0 * H:1 * H])
        f_g = jax.nn.sigmoid(gates[:, 1 * H:2 * H])
        g_g = jnp.tanh(gates[:, 2 * H:3 * H])
        o_g = jax.nn.sigmoid(gates[:, 3 * H:4 * H])
        c_new = f_g * c_st[...] + i_g * g_g
        h_new = o_g * jnp.tanh(c_new)
        c_st[...] = c_new
        h_st[...] = h_new
        seq_buf[t] = h_new      # becomes the input for layer l+1
        return carry

    jax.lax.fori_loop(0, T, step, 0, unroll=True)

    # Final hidden / cell state of this layer.
    hn_ref[0] = h_st[...]
    cn_ref[0] = c_st[...]

    # Top layer only: one batched, lane-dense fc over the whole sequence.
    @pl.when(l == n_layers - 1)
    def _():
        y = seq_buf[...].reshape(T * B, H)
        logits = (jnp.dot(y, wfc_ref[...], preferred_element_type=jnp.float32)
                  + bfc_ref[...])
        logits_ref[...] = logits.reshape(T, B, logits_ref.shape[-1])


def decoder_forward(x_idx, params):
    """x_idx: (T, B) int32 token ids.

    Returns (logits (T, B, O), h_n (L, B, H), c_n (L, B, H))."""
    emb_table = params["embedding"]          # (V, H)
    w_ih = params["w_ih"]                    # (L, H, 4H)
    w_hh = params["w_hh"]                    # (L, H, 4H)
    b = params["b"]                          # (L, 1, 4H)  (= b_ih + b_hh)
    h0 = params["h0"]                        # (L, B, H)
    c0 = params["c0"]                        # (L, B, H)
    w_fc = params["w_fc"]                    # (H, O)
    b_fc = params["b_fc"]                    # (1, O)

    T, B = x_idx.shape
    L, H, H4 = w_ih.shape
    O = w_fc.shape[1]

    # Glue: embedding lookup (gather) stays in plain JAX.
    emb = jnp.take(emb_table, x_idx, axis=0).astype(jnp.float32)  # (T, B, H)

    grid_spec = pltpu.PrefetchScalarGridSpec(
        num_scalar_prefetch=0,
        grid=(L,),
        in_specs=[
            pl.BlockSpec((T, B, H), lambda l: (0, 0, 0)),    # embedded x (resident)
            pl.BlockSpec((1, H, H4), lambda l: (l, 0, 0)),   # W_ih (layer l)
            pl.BlockSpec((1, H, H4), lambda l: (l, 0, 0)),   # W_hh (layer l)
            pl.BlockSpec((1, 1, H4), lambda l: (l, 0, 0)),   # bias (layer l)
            pl.BlockSpec((1, B, H), lambda l: (l, 0, 0)),    # h0 (layer l)
            pl.BlockSpec((1, B, H), lambda l: (l, 0, 0)),    # c0 (layer l)
            pl.BlockSpec((H, O), lambda l: (0, 0)),          # W_fc (resident)
            pl.BlockSpec((1, O), lambda l: (0, 0)),          # b_fc (resident)
        ],
        out_specs=(
            pl.BlockSpec((T, B, O), lambda l: (0, 0, 0)),    # logits (written once)
            pl.BlockSpec((1, B, H), lambda l: (l, 0, 0)),    # h_n
            pl.BlockSpec((1, B, H), lambda l: (l, 0, 0)),    # c_n
        ),
        scratch_shapes=[
            pltpu.VMEM((T, B, H), jnp.float32),      # layer input/output sequence
            pltpu.VMEM((T, B, 4 * H), jnp.float32),  # batched gate pre-activations
            pltpu.VMEM((B, H), jnp.float32),         # running h
            pltpu.VMEM((B, H), jnp.float32),         # running c
        ],
    )

    out_shape = (
        jax.ShapeDtypeStruct((T, B, O), jnp.float32),
        jax.ShapeDtypeStruct((L, B, H), jnp.float32),
        jax.ShapeDtypeStruct((L, B, H), jnp.float32),
    )

    return pl.pallas_call(
        _decoder_kernel,
        out_shape=out_shape,
        grid_spec=grid_spec,
        compiler_params=pltpu.CompilerParams(
            dimension_semantics=("arbitrary",)),
    )(emb, w_ih, w_hh, b, h0, c0, w_fc, b_fc)


# --------------------------- pure-JAX reference ------------------------------
def decoder_reference(x_idx, params):
    emb = jnp.take(params["embedding"], x_idx, axis=0)
    L, H, _ = params["w_ih"].shape
    seq = emb
    h_fin, c_fin = [], []
    for l in range(L):
        h = params["h0"][l]
        c = params["c0"][l]
        outs = []
        for t in range(seq.shape[0]):
            gates = seq[t] @ params["w_ih"][l] + h @ params["w_hh"][l] + params["b"][l, 0]
            i_g = jax.nn.sigmoid(gates[:, 0 * H:1 * H])
            f_g = jax.nn.sigmoid(gates[:, 1 * H:2 * H])
            g_g = jnp.tanh(gates[:, 2 * H:3 * H])
            o_g = jax.nn.sigmoid(gates[:, 3 * H:4 * H])
            c = f_g * c + i_g * g_g
            h = o_g * jnp.tanh(c)
            outs.append(h)
        seq = jnp.stack(outs)
        h_fin.append(h)
        c_fin.append(c)
    logits = seq @ params["w_fc"] + params["b_fc"]
    return logits, jnp.stack(h_fin), jnp.stack(c_fin)


# --------------------------------- main --------------------------------------
if __name__ == "__main__":
    # Small but tile-aligned shapes (B = 8 sublanes, H = O = 128 lanes) so gate
    # slices fall on lane-128 boundaries and all stores are unmasked.
    T, B = 8, 8          # seq_len, batch
    H = 128              # embedding_size == hidden_size
    L = 3                # num_layers
    O = 128              # output_size (vocab)

    key = jax.random.PRNGKey(0)
    ks = jax.random.split(key, 10)
    s = 1.0 / jnp.sqrt(H)

    params = {
        "embedding": jax.random.uniform(ks[0], (O, H), jnp.float32, -s, s),
        "w_ih": jax.random.uniform(ks[1], (L, H, 4 * H), jnp.float32, -s, s),
        "w_hh": jax.random.uniform(ks[2], (L, H, 4 * H), jnp.float32, -s, s),
        "b": jax.random.uniform(ks[3], (L, 1, 4 * H), jnp.float32, -s, s),
        "h0": jax.random.normal(ks[4], (L, B, H), jnp.float32),
        "c0": jax.random.normal(ks[5], (L, B, H), jnp.float32),
        "w_fc": jax.random.uniform(ks[6], (H, O), jnp.float32, -s, s),
        "b_fc": jax.random.uniform(ks[7], (1, O), jnp.float32, -s, s),
    }

    x_idx = jax.random.randint(ks[8], (T, B), 0, O, dtype=jnp.int32)

    logits, h_n, c_n = decoder_forward(x_idx, params)
    jax.block_until_ready((logits, h_n, c_n))

    ref_logits, ref_h, ref_c = decoder_reference(x_idx, params)
    assert jnp.allclose(logits, ref_logits, atol=2e-3, rtol=2e-3)
    assert jnp.allclose(h_n, ref_h, atol=2e-3, rtol=2e-3)
    assert jnp.allclose(c_n, ref_c, atol=2e-3, rtol=2e-3)

    print("KERNEL_OK")
</pallas_src>

<mosaic_0001>
module attributes {stable_mosaic.version = 11 : i64} {
  func.func @_decoder_kernel(%arg0: i32, %arg1: memref<8x8x128xf32, #tpu.memory_space<vmem>>, %arg2: memref<1x128x512xf32, #tpu.memory_space<vmem>>, %arg3: memref<1x128x512xf32, #tpu.memory_space<vmem>>, %arg4: memref<1x1x512xf32, #tpu.memory_space<vmem>>, %arg5: memref<1x8x128xf32, #tpu.memory_space<vmem>>, %arg6: memref<1x8x128xf32, #tpu.memory_space<vmem>>, %arg7: memref<128x128xf32, #tpu.memory_space<vmem>>, %arg8: memref<1x128xf32, #tpu.memory_space<vmem>>, %arg9: memref<8x8x128xf32, #tpu.memory_space<vmem>>, %arg10: memref<1x8x128xf32, #tpu.memory_space<vmem>>, %arg11: memref<1x8x128xf32, #tpu.memory_space<vmem>>, %arg12: memref<8x8x128xf32, #tpu.memory_space<vmem>>, %arg13: memref<8x8x512xf32, #tpu.memory_space<vmem>>, %arg14: memref<8x128xf32, #tpu.memory_space<vmem>>, %arg15: memref<8x128xf32, #tpu.memory_space<vmem>>) attributes {dimension_semantics = [#tpu.dimension_semantics<arbitrary>], iteration_bounds = array<i64: 3>, scalar_prefetch = 0 : i64, scratch_operands = 4 : i64, tpu.core_type = #tpu.core_type<tc>, window_params = [{pipeline_mode = #tpu.pipeline_mode<synchronous>, transform_indices = @transform_0, window_bounds = array<i64: 8, 8, 128>}, {transform_indices = @transform_1, window_bounds = array<i64: 1, 128, 512>}, {transform_indices = @transform_2, window_bounds = array<i64: 1, 128, 512>}, {transform_indices = @transform_3, window_bounds = array<i64: 1, 1, 512>}, {transform_indices = @transform_4, window_bounds = array<i64: 1, 8, 128>}, {transform_indices = @transform_5, window_bounds = array<i64: 1, 8, 128>}, {pipeline_mode = #tpu.pipeline_mode<synchronous>, transform_indices = @transform_6, window_bounds = array<i64: 128, 128>}, {pipeline_mode = #tpu.pipeline_mode<synchronous>, transform_indices = @transform_7, window_bounds = array<i64: 1, 128>}, {pipeline_mode = #tpu.pipeline_mode<synchronous>, transform_indices = @transform_8, window_bounds = array<i64: 8, 8, 128>}, {transform_indices = @transform_9, window_bounds = array<i64: 1, 8, 128>}, {transform_indices = @transform_10, window_bounds = array<i64: 1, 8, 128>}]} {
    %c0_i32 = arith.constant 0 : i32
    %0 = arith.cmpi eq, %arg0, %c0_i32 : i32
    %1 = arith.extui %0 : i1 to i32
    %c0_i32_0 = arith.constant 0 : i32
    %2 = arith.cmpi ne, %1, %c0_i32_0 : i32
    scf.if %2 {
      %c0_187 = arith.constant 0 : index
      %c0_188 = arith.constant 0 : index
      %c0_189 = arith.constant 0 : index
      %351 = vector.load %arg1[%c0_187, %c0_188, %c0_189] : memref<8x8x128xf32, #tpu.memory_space<vmem>>, vector<8x8x128xf32>
      %c0_190 = arith.constant 0 : index
      %c0_191 = arith.constant 0 : index
      %c0_192 = arith.constant 0 : index
      %352 = vector.load %arg12[%c0_190, %c0_191, %c0_192] : memref<8x8x128xf32, #tpu.memory_space<vmem>>, vector<8x8x128xf32>
      tpu.vector_store %arg12[%c0_190, %c0_191, %c0_192], %351 {strides = array<i32>} : memref<8x8x128xf32, #tpu.memory_space<vmem>>, vector<8x8x128xf32>,
    } else {
    }
    %c0 = arith.constant 0 : index
    %c0_1 = arith.constant 0 : index
    %c0_2 = arith.constant 0 : index
    %3 = vector.load %arg12[%c0, %c0_1, %c0_2] : memref<8x8x128xf32, #tpu.memory_space<vmem>>, vector<8x8x128xf32>
    %4 = vector.shape_cast %3 : vector<8x8x128xf32> to vector<64x128xf32>
    %c0_3 = arith.constant 0 : index
    %c0_4 = arith.constant 0 : index
    %c0_5 = arith.constant 0 : index
    %5 = vector.load %arg2[%c0_3, %c0_4, %c0_5] : memref<1x128x512xf32, #tpu.memory_space<vmem>>, vector<1x128x512xf32>
    %6 = vector.shape_cast %5 : vector<1x128x512xf32> to vector<128x512xf32>
    %cst = arith.constant dense<0.000000e+00> : vector<64x512xf32>
    %7 = tpu.matmul %4, %6, %cst {dimension_numbers = #tpu.dot_dimension_numbers<[1], [0], [0], [1], [0, 0, 1, 1], [], []>} : vector<64x128xf32>, vector<128x512xf32>, vector<64x512xf32> -> vector<64x512xf32>
    %c0_6 = arith.constant 0 : index
    %c0_7 = arith.constant 0 : index
    %c0_8 = arith.constant 0 : index
    %8 = vector.load %arg4[%c0_6, %c0_7, %c0_8] : memref<1x1x512xf32, #tpu.memory_space<vmem>>, vector<1x1x512xf32>
    %9 = vector.shape_cast %8 : vector<1x1x512xf32> to vector<1x512xf32>
    %10 = vector.broadcast %9 : vector<1x512xf32> to vector<64x512xf32>
    %11 = arith.addf %7, %10 : vector<64x512xf32>
    %12 = vector.shape_cast %11 : vector<64x512xf32> to vector<8x8x512xf32>
    %c0_9 = arith.constant 0 : index
    %c0_10 = arith.constant 0 : index
    %c0_11 = arith.constant 0 : index
    %13 = vector.load %arg13[%c0_9, %c0_10, %c0_11] : memref<8x8x512xf32, #tpu.memory_space<vmem>>, vector<8x8x512xf32>
    tpu.vector_store %arg13[%c0_9, %c0_10, %c0_11], %12 {strides = array<i32>} : memref<8x8x512xf32, #tpu.memory_space<vmem>>, vector<8x8x512xf32>,
    %c0_12 = arith.constant 0 : index
    %c0_13 = arith.constant 0 : index
    %c0_14 = arith.constant 0 : index
    %14 = vector.load %arg5[%c0_12, %c0_13, %c0_14] : memref<1x8x128xf32, #tpu.memory_space<vmem>>, vector<1x8x128xf32>
    %15 = vector.shape_cast %14 : vector<1x8x128xf32> to vector<8x128xf32>
    %c0_15 = arith.constant 0 : index
    %c0_16 = arith.constant 0 : index
    %16 = vector.load %arg14[%c0_15, %c0_16] : memref<8x128xf32, #tpu.memory_space<vmem>>, vector<8x128xf32>
    tpu.vector_store %arg14[%c0_15, %c0_16], %15 {strides = array<i32>} : memref<8x128xf32, #tpu.memory_space<vmem>>, vector<8x128xf32>,
    %c0_17 = arith.constant 0 : index
    %c0_18 = arith.constant 0 : index
    %c0_19 = arith.constant 0 : index
    %17 = vector.load %arg6[%c0_17, %c0_18, %c0_19] : memref<1x8x128xf32, #tpu.memory_space<vmem>>, vector<1x8x128xf32>
    %18 = vector.shape_cast %17 : vector<1x8x128xf32> to vector<8x128xf32>
    %c0_20 = arith.constant 0 : index
    %c0_21 = arith.constant 0 : index
    %19 = vector.load %arg15[%c0_20, %c0_21] : memref<8x128xf32, #tpu.memory_space<vmem>>, vector<8x128xf32>
    tpu.vector_store %arg15[%c0_20, %c0_21], %18 {strides = array<i32>} : memref<8x128xf32, #tpu.memory_space<vmem>>, vector<8x128xf32>,
    %c0_i32_22 = arith.constant 0 : i32
    %20 = arith.index_cast %c0_i32_22 : i32 to index
    %c0_23 = arith.constant 0 : index
    %c0_24 = arith.constant 0 : index
    %21 = vector.load %arg13[%20, %c0_23, %c0_24] : memref<8x8x512xf32, #tpu.memory_space<vmem>>, vector<1x8x512xf32>
    %22 = vector.shape_cast %21 : vector<1x8x512xf32> to vector<8x512xf32>
    %c0_25 = arith.constant 0 : index
    %c0_26 = arith.constant 0 : index
    %23 = vector.load %arg14[%c0_25, %c0_26] : memref<8x128xf32, #tpu.memory_space<vmem>>, vector<8x128xf32>
    %c0_27 = arith.constant 0 : index
    %c0_28 = arith.constant 0 : index
    %c0_29 = arith.constant 0 : index
    %24 = vector.load %arg3[%c0_27, %c0_28, %c0_29] : memref<1x128x512xf32, #tpu.memory_space<vmem>>, vector<1x128x512xf32>
    %25 = vector.shape_cast %24 : vector<1x128x512xf32> to vector<128x512xf32>
    %cst_30 = arith.constant dense<0.000000e+00> : vector<8x512xf32>
    %26 = tpu.matmul %23, %25, %cst_30 {dimension_numbers = #tpu.dot_dimension_numbers<[1], [0], [0], [1], [0, 0, 1, 1], [], []>} : vector<8x128xf32>, vector<128x512xf32>, vector<8x512xf32> -> vector<8x512xf32>
    %27 = arith.addf %22, %26 : vector<8x512xf32>
    %28 = vector.extract_strided_slice %27 {offsets = [0, 0], sizes = [8, 128], strides = [1, 1]} : vector<8x512xf32> to vector<8x128xf32>
    %29 = arith.negf %28 : vector<8x128xf32>
    %30 = math.exp %29 : vector<8x128xf32>
    %cst_31 = arith.constant 1.000000e+00 : f32
    %31 = vector.broadcast %cst_31 : f32 to vector<8x128xf32>
    %32 = arith.addf %31, %30 : vector<8x128xf32>
    %33 = arith.divf %31, %32 : vector<8x128xf32>
    %34 = vector.extract_strided_slice %27 {offsets = [0, 128], sizes = [8, 128], strides = [1, 1]} : vector<8x512xf32> to vector<8x128xf32>
    %35 = arith.negf %34 : vector<8x128xf32>
    %36 = math.exp %35 : vector<8x128xf32>
    %cst_32 = arith.constant 1.000000e+00 : f32
    %37 = vector.broadcast %cst_32 : f32 to vector<8x128xf32>
    %38 = arith.addf %37, %36 : vector<8x128xf32>
    %39 = arith.divf %37, %38 : vector<8x128xf32>
    %40 = vector.extract_strided_slice %27 {offsets = [0, 256], sizes = [8, 128], strides = [1, 1]} : vector<8x512xf32> to vector<8x128xf32>
    %41 = math.tanh %40 : vector<8x128xf32>
    %42 = vector.extract_strided_slice %27 {offsets = [0, 384], sizes = [8, 128], strides = [1, 1]} : vector<8x512xf32> to vector<8x128xf32>
    %43 = arith.negf %42 : vector<8x128xf32>
    %44 = math.exp %43 : vector<8x128xf32>
    %cst_33 = arith.constant 1.000000e+00 : f32
    %45 = vector.broadcast %cst_33 : f32 to vector<8x128xf32>
    %46 = arith.addf %45, %44 : vector<8x128xf32>
    %47 = arith.divf %45, %46 : vector<8x128xf32>
    %c0_34 = arith.constant 0 : index
    %c0_35 = arith.constant 0 : index
    %48 = vector.load %arg15[%c0_34, %c0_35] : memref<8x128xf32, #tpu.memory_space<vmem>>, vector<8x128xf32>
    %49 = arith.mulf %39, %48 : vector<8x128xf32>
    %50 = arith.mulf %33, %41 : vector<8x128xf32>
    %51 = arith.addf %49, %50 : vector<8x128xf32>
    %52 = math.tanh %51 : vector<8x128xf32>
    %53 = arith.mulf %47, %52 : vector<8x128xf32>
    %c0_36 = arith.constant 0 : index
    %c0_37 = arith.constant 0 : index
    %54 = vector.load %arg15[%c0_36, %c0_37] : memref<8x128xf32, #tpu.memory_space<vmem>>, vector<8x128xf32>
    tpu.vector_store %arg15[%c0_36, %c0_37], %51 {strides = array<i32>} : memref<8x128xf32, #tpu.memory_space<vmem>>, vector<8x128xf32>,
    %c0_38 = arith.constant 0 : index
    %c0_39 = arith.constant 0 : index
    %55 = vector.load %arg14[%c0_38, %c0_39] : memref<8x128xf32, #tpu.memory_space<vmem>>, vector<8x128xf32>
    tpu.vector_store %arg14[%c0_38, %c0_39], %53 {strides = array<i32>} : memref<8x128xf32, #tpu.memory_space<vmem>>, vector<8x128xf32>,
    %56 = arith.index_cast %c0_i32_22 : i32 to index
    %c0_40 = arith.constant 0 : index
    %c0_41 = arith.constant 0 : index
    %57 = vector.load %arg12[%56, %c0_40, %c0_41] : memref<8x8x128xf32, #tpu.memory_space<vmem>>, vector<1x8x128xf32>
    %58 = vector.shape_cast %57 : vector<1x8x128xf32> to vector<8x128xf32>
    %59 = vector.shape_cast %53 : vector<8x128xf32> to vector<1x8x128xf32>
    tpu.vector_store %arg12[%56, %c0_40, %c0_41], %59 {strides = array<i32>} : memref<8x8x128xf32, #tpu.memory_space<vmem>>, vector<1x8x128xf32>,
    %c1_i32 = arith.constant 1 : i32
    %60 = arith.index_cast %c1_i32 : i32 to index
    %c0_42 = arith.constant 0 : index
    %c0_43 = arith.constant 0 : index
    %61 = vector.load %arg13[%60, %c0_42, %c0_43] : memref<8x8x512xf32, #tpu.memory_space<vmem>>, vector<1x8x512xf32>
    %62 = vector.shape_cast %61 : vector<1x8x512xf32> to vector<8x512xf32>
    %c0_44 = arith.constant 0 : index
    %c0_45 = arith.constant 0 : index
    %63 = vector.load %arg14[%c0_44, %c0_45] : memref<8x128xf32, #tpu.memory_space<vmem>>, vector<8x128xf32>
    %c0_46 = arith.constant 0 : index
    %c0_47 = arith.constant 0 : index
    %c0_48 = arith.constant 0 : index
    %64 = vector.load %arg3[%c0_46, %c0_47, %c0_48] : memref<1x128x512xf32, #tpu.memory_space<vmem>>, vector<1x128x512xf32>
    %65 = vector.shape_cast %64 : vector<1x128x512xf32> to vector<128x512xf32>
    %cst_49 = arith.constant dense<0.000000e+00> : vector<8x512xf32>
    %66 = tpu.matmul %63, %65, %cst_49 {dimension_numbers = #tpu.dot_dimension_numbers<[1], [0], [0], [1], [0, 0, 1, 1], [], []>} : vector<8x128xf32>, vector<128x512xf32>, vector<8x512xf32> -> vector<8x512xf32>
    %67 = arith.addf %62, %66 : vector<8x512xf32>
    %68 = vector.extract_strided_slice %67 {offsets = [0, 0], sizes = [8, 128], strides = [1, 1]} : vector<8x512xf32> to vector<8x128xf32>
    %69 = arith.negf %68 : vector<8x128xf32>
    %70 = math.exp %69 : vector<8x128xf32>
    %cst_50 = arith.constant 1.000000e+00 : f32
    %71 = vector.broadcast %cst_50 : f32 to vector<8x128xf32>
    %72 = arith.addf %71, %70 : vector<8x128xf32>
    %73 = arith.divf %71, %72 : vector<8x128xf32>
    %74 = vector.extract_strided_slice %67 {offsets = [0, 128], sizes = [8, 128], strides = [1, 1]} : vector<8x512xf32> to vector<8x128xf32>
    %75 = arith.negf %74 : vector<8x128xf32>
    %76 = math.exp %75 : vector<8x128xf32>
    %cst_51 = arith.constant 1.000000e+00 : f32
    %77 = vector.broadcast %cst_51 : f32 to vector<8x128xf32>
    %78 = arith.addf %77, %76 : vector<8x128xf32>
    %79 = arith.divf %77, %78 : vector<8x128xf32>
    %80 = vector.extract_strided_slice %67 {offsets = [0, 256], sizes = [8, 128], strides = [1, 1]} : vector<8x512xf32> to vector<8x128xf32>
    %81 = math.tanh %80 : vector<8x128xf32>
    %82 = vector.extract_strided_slice %67 {offsets = [0, 384], sizes = [8, 128], strides = [1, 1]} : vector<8x512xf32> to vector<8x128xf32>
    %83 = arith.negf %82 : vector<8x128xf32>
    %84 = math.exp %83 : vector<8x128xf32>
    %cst_52 = arith.constant 1.000000e+00 : f32
    %85 = vector.broadcast %cst_52 : f32 to vector<8x128xf32>
    %86 = arith.addf %85, %84 : vector<8x128xf32>
    %87 = arith.divf %85, %86 : vector<8x128xf32>
    %c0_53 = arith.constant 0 : index
    %c0_54 = arith.constant 0 : index
    %88 = vector.load %arg15[%c0_53, %c0_54] : memref<8x128xf32, #tpu.memory_space<vmem>>, vector<8x128xf32>
    %89 = arith.mulf %79, %88 : vector<8x128xf32>
    %90 = arith.mulf %73, %81 : vector<8x128xf32>
    %91 = arith.addf %89, %90 : vector<8x128xf32>
    %92 = math.tanh %91 : vector<8x128xf32>
    %93 = arith.mulf %87, %92 : vector<8x128xf32>
    %c0_55 = arith.constant 0 : index
    %c0_56 = arith.constant 0 : index
    %94 = vector.load %arg15[%c0_55, %c0_56] : memref<8x128xf32, #tpu.memory_space<vmem>>, vector<8x128xf32>
    tpu.vector_store %arg15[%c0_55, %c0_56], %91 {strides = array<i32>} : memref<8x128xf32, #tpu.memory_space<vmem>>, vector<8x128xf32>,
    %c0_57 = arith.constant 0 : index
    %c0_58 = arith.constant 0 : index
    %95 = vector.load %arg14[%c0_57, %c0_58] : memref<8x128xf32, #tpu.memory_space<vmem>>, vector<8x128xf32>
    tpu.vector_store %arg14[%c0_57, %c0_58], %93 {strides = array<i32>} : memref<8x128xf32, #tpu.memory_space<vmem>>, vector<8x128xf32>,
    %96 = arith.index_cast %c1_i32 : i32 to index
    %c0_59 = arith.constant 0 : index
    %c0_60 = arith.constant 0 : index
    %97 = vector.load %arg12[%96, %c0_59, %c0_60] : memref<8x8x128xf32, #tpu.memory_space<vmem>>, vector<1x8x128xf32>
    %98 = vector.shape_cast %97 : vector<1x8x128xf32> to vector<8x128xf32>
    %99 = vector.shape_cast %93 : vector<8x128xf32> to vector<1x8x128xf32>
    tpu.vector_store %arg12[%96, %c0_59, %c0_60], %99 {strides = array<i32>} : memref<8x8x128xf32, #tpu.memory_space<vmem>>, vector<1x8x128xf32>,
    %c2_i32 = arith.constant 2 : i32
    %100 = arith.index_cast %c2_i32 : i32 to index
    %c0_61 = arith.constant 0 : index
    %c0_62 = arith.constant 0 : index
    %101 = vector.load %arg13[%100, %c0_61, %c0_62] : memref<8x8x512xf32, #tpu.memory_space<vmem>>, vector<1x8x512xf32>
    %102 = vector.shape_cast %101 : vector<1x8x512xf32> to vector<8x512xf32>
    %c0_63 = arith.constant 0 : index
    %c0_64 = arith.constant 0 : index
    %103 = vector.load %arg14[%c0_63, %c0_64] : memref<8x128xf32, #tpu.memory_space<vmem>>, vector<8x128xf32>
    %c0_65 = arith.constant 0 : index
    %c0_66 = arith.constant 0 : index
    %c0_67 = arith.constant 0 : index
    %104 = vector.load %arg3[%c0_65, %c0_66, %c0_67] : memref<1x128x512xf32, #tpu.memory_space<vmem>>, vector<1x128x512xf32>
    %105 = vector.shape_cast %104 : vector<1x128x512xf32> to vector<128x512xf32>
    %cst_68 = arith.constant dense<0.000000e+00> : vector<8x512xf32>
    %106 = tpu.matmul %103, %105, %cst_68 {dimension_numbers = #tpu.dot_dimension_numbers<[1], [0], [0], [1], [0, 0, 1, 1], [], []>} : vector<8x128xf32>, vector<128x512xf32>, vector<8x512xf32> -> vector<8x512xf32>
    %107 = arith.addf %102, %106 : vector<8x512xf32>
    %108 = vector.extract_strided_slice %107 {offsets = [0, 0], sizes = [8, 128], strides = [1, 1]} : vector<8x512xf32> to vector<8x128xf32>
    %109 = arith.negf %108 : vector<8x128xf32>
    %110 = math.exp %109 : vector<8x128xf32>
    %cst_69 = arith.constant 1.000000e+00 : f32
    %111 = vector.broadcast %cst_69 : f32 to vector<8x128xf32>
    %112 = arith.addf %111, %110 : vector<8x128xf32>
    %113 = arith.divf %111, %112 : vector<8x128xf32>
    %114 = vector.extract_strided_slice %107 {offsets = [0, 128], sizes = [8, 128], strides = [1, 1]} : vector<8x512xf32> to vector<8x128xf32>
    %115 = arith.negf %114 : vector<8x128xf32>
    %116 = math.exp %115 : vector<8x128xf32>
    %cst_70 = arith.constant 1.000000e+00 : f32
    %117 = vector.broadcast %cst_70 : f32 to vector<8x128xf32>
    %118 = arith.addf %117, %116 : vector<8x128xf32>
    %119 = arith.divf %117, %118 : vector<8x128xf32>
    %120 = vector.extract_strided_slice %107 {offsets = [0, 256], sizes = [8, 128], strides = [1, 1]} : vector<8x512xf32> to vector<8x128xf32>
    %121 = math.tanh %120 : vector<8x128xf32>
    %122 = vector.extract_strided_slice %107 {offsets = [0, 384], sizes = [8, 128], strides = [1, 1]} : vector<8x512xf32> to vector<8x128xf32>
    %123 = arith.negf %122 : vector<8x128xf32>
    %124 = math.exp %123 : vector<8x128xf32>
    %cst_71 = arith.constant 1.000000e+00 : f32
    %125 = vector.broadcast %cst_71 : f32 to vector<8x128xf32>
    %126 = arith.addf %125, %124 : vector<8x128xf32>
    %127 = arith.divf %125, %126 : vector<8x128xf32>
    %c0_72 = arith.constant 0 : index
    %c0_73 = arith.constant 0 : index
    %128 = vector.load %arg15[%c0_72, %c0_73] : memref<8x128xf32, #tpu.memory_space<vmem>>, vector<8x128xf32>
    %129 = arith.mulf %119, %128 : vector<8x128xf32>
    %130 = arith.mulf %113, %121 : vector<8x128xf32>
    %131 = arith.addf %129, %130 : vector<8x128xf32>
    %132 = math.tanh %131 : vector<8x128xf32>
    %133 = arith.mulf %127, %132 : vector<8x128xf32>
    %c0_74 = arith.constant 0 : index
    %c0_75 = arith.constant 0 : index
    %134 = vector.load %arg15[%c0_74, %c0_75] : memref<8x128xf32, #tpu.memory_space<vmem>>, vector<8x128xf32>
    tpu.vector_store %arg15[%c0_74, %c0_75], %131 {strides = array<i32>} : memref<8x128xf32, #tpu.memory_space<vmem>>, vector<8x128xf32>,
    %c0_76 = arith.constant 0 : index
    %c0_77 = arith.constant 0 : index
    %135 = vector.load %arg14[%c0_76, %c0_77] : memref<8x128xf32, #tpu.memory_space<vmem>>, vector<8x128xf32>
    tpu.vector_store %arg14[%c0_76, %c0_77], %133 {strides = array<i32>} : memref<8x128xf32, #tpu.memory_space<vmem>>, vector<8x128xf32>,
    %136 = arith.index_cast %c2_i32 : i32 to index
    %c0_78 = arith.constant 0 : index
    %c0_79 = arith.constant 0 : index
    %137 = vector.load %arg12[%136, %c0_78, %c0_79] : memref<8x8x128xf32, #tpu.memory_space<vmem>>, vector<1x8x128xf32>
    %138 = vector.shape_cast %137 : vector<1x8x128xf32> to vector<8x128xf32>
    %139 = vector.shape_cast %133 : vector<8x128xf32> to vector<1x8x128xf32>
    tpu.vector_store %arg12[%136, %c0_78, %c0_79], %139 {strides = array<i32>} : memref<8x8x128xf32, #tpu.memory_space<vmem>>, vector<1x8x128xf32>,
    %c3_i32 = arith.constant 3 : i32
    %140 = arith.index_cast %c3_i32 : i32 to index
    %c0_80 = arith.constant 0 : index
    %c0_81 = arith.constant 0 : index
    %141 = vector.load %arg13[%140, %c0_80, %c0_81] : memref<8x8x512xf32, #tpu.memory_space<vmem>>, vector<1x8x512xf32>
    %142 = vector.shape_cast %141 : vector<1x8x512xf32> to vector<8x512xf32>
    %c0_82 = arith.constant 0 : index
    %c0_83 = arith.constant 0 : index
    %143 = vector.load %arg14[%c0_82, %c0_83] : memref<8x128xf32, #tpu.memory_space<vmem>>, vector<8x128xf32>
    %c0_84 = arith.constant 0 : index
    %c0_85 = arith.constant 0 : index
    %c0_86 = arith.constant 0 : index
    %144 = vector.load %arg3[%c0_84, %c0_85, %c0_86] : memref<1x128x512xf32, #tpu.memory_space<vmem>>, vector<1x128x512xf32>
    %145 = vector.shape_cast %144 : vector<1x128x512xf32> to vector<128x512xf32>
    %cst_87 = arith.constant dense<0.000000e+00> : vector<8x512xf32>
    %146 = tpu.matmul %143, %145, %cst_87 {dimension_numbers = #tpu.dot_dimension_numbers<[1], [0], [0], [1], [0, 0, 1, 1], [], []>} : vector<8x128xf32>, vector<128x512xf32>, vector<8x512xf32> -> vector<8x512xf32>
    %147 = arith.addf %142, %146 : vector<8x512xf32>
    %148 = vector.extract_strided_slice %147 {offsets = [0, 0], sizes = [8, 128], strides = [1, 1]} : vector<8x512xf32> to vector<8x128xf32>
    %149 = arith.negf %148 : vector<8x128xf32>
    %150 = math.exp %149 : vector<8x128xf32>
    %cst_88 = arith.constant 1.000000e+00 : f32
    %151 = vector.broadcast %cst_88 : f32 to vector<8x128xf32>
    %152 = arith.addf %151, %150 : vector<8x128xf32>
    %153 = arith.divf %151, %152 : vector<8x128xf32>
    %154 = vector.extract_strided_slice %147 {offsets = [0, 128], sizes = [8, 128], strides = [1, 1]} : vector<8x512xf32> to vector<8x128xf32>
    %155 = arith.negf %154 : vector<8x128xf32>
    %156 = math.exp %155 : vector<8x128xf32>
    %cst_89 = arith.constant 1.000000e+00 : f32
    %157 = vector.broadcast %cst_89 : f32 to vector<8x128xf32>
    %158 = arith.addf %157, %156 : vector<8x128xf32>
    %159 = arith.divf %157, %158 : vector<8x128xf32>
    %160 = vector.extract_strided_slice %147 {offsets = [0, 256], sizes = [8, 128], strides = [1, 1]} : vector<8x512xf32> to vector<8x128xf32>
    %161 = math.tanh %160 : vector<8x128xf32>
    %162 = vector.extract_strided_slice %147 {offsets = [0, 384], sizes = [8, 128], strides = [1, 1]} : vector<8x512xf32> to vector<8x128xf32>
    %163 = arith.negf %162 : vector<8x128xf32>
    %164 = math.exp %163 : vector<8x128xf32>
    %cst_90 = arith.constant 1.000000e+00 : f32
    %165 = vector.broadcast %cst_90 : f32 to vector<8x128xf32>
    %166 = arith.addf %165, %164 : vector<8x128xf32>
    %167 = arith.divf %165, %166 : vector<8x128xf32>
    %c0_91 = arith.constant 0 : index
    %c0_92 = arith.constant 0 : index
    %168 = vector.load %arg15[%c0_91, %c0_92] : memref<8x128xf32, #tpu.memory_space<vmem>>, vector<8x128xf32>
    %169 = arith.mulf %159, %168 : vector<8x128xf32>
    %170 = arith.mulf %153, %161 : vector<8x128xf32>
    %171 = arith.addf %169, %170 : vector<8x128xf32>
    %172 = math.tanh %171 : vector<8x128xf32>
    %173 = arith.mulf %167, %172 : vector<8x128xf32>
    %c0_93 = arith.constant 0 : index
    %c0_94 = arith.constant 0 : index
    %174 = vector.load %arg15[%c0_93, %c0_94] : memref<8x128xf32, #tpu.memory_space<vmem>>, vector<8x128xf32>
    tpu.vector_store %arg15[%c0_93, %c0_94], %171 {strides = array<i32>} : memref<8x128xf32, #tpu.memory_space<vmem>>, vector<8x128xf32>,
    %c0_95 = arith.constant 0 : index
    %c0_96 = arith.constant 0 : index
    %175 = vector.load %arg14[%c0_95, %c0_96] : memref<8x128xf32, #tpu.memory_space<vmem>>, vector<8x128xf32>
    tpu.vector_store %arg14[%c0_95, %c0_96], %173 {strides = array<i32>} : memref<8x128xf32, #tpu.memory_space<vmem>>, vector<8x128xf32>,
    %176 = arith.index_cast %c3_i32 : i32 to index
    %c0_97 = arith.constant 0 : index
    %c0_98 = arith.constant 0 : index
    %177 = vector.load %arg12[%176, %c0_97, %c0_98] : memref<8x8x128xf32, #tpu.memory_space<vmem>>, vector<1x8x128xf32>
    %178 = vector.shape_cast %177 : vector<1x8x128xf32> to vector<8x128xf32>
    %179 = vector.shape_cast %173 : vector<8x128xf32> to vector<1x8x128xf32>
    tpu.vector_store %arg12[%176, %c0_97, %c0_98], %179 {strides = array<i32>} : memref<8x8x128xf32, #tpu.memory_space<vmem>>, vector<1x8x128xf32>,
    %c4_i32 = arith.constant 4 : i32
    %180 = arith.index_cast %c4_i32 : i32 to index
    %c0_99 = arith.constant 0 : index
    %c0_100 = arith.constant 0 : index
    %181 = vector.load %arg13[%180, %c0_99, %c0_100] : memref<8x8x512xf32, #tpu.memory_space<vmem>>, vector<1x8x512xf32>
    %182 = vector.shape_cast %181 : vector<1x8x512xf32> to vector<8x512xf32>
    %c0_101 = arith.constant 0 : index
    %c0_102 = arith.constant 0 : index
    %183 = vector.load %arg14[%c0_101, %c0_102] : memref<8x128xf32, #tpu.memory_space<vmem>>, vector<8x128xf32>
    %c0_103 = arith.constant 0 : index
    %c0_104 = arith.constant 0 : index
    %c0_105 = arith.constant 0 : index
    %184 = vector.load %arg3[%c0_103, %c0_104, %c0_105] : memref<1x128x512xf32, #tpu.memory_space<vmem>>, vector<1x128x512xf32>
    %185 = vector.shape_cast %184 : vector<1x128x512xf32> to vector<128x512xf32>
    %cst_106 = arith.constant dense<0.000000e+00> : vector<8x512xf32>
    %186 = tpu.matmul %183, %185, %cst_106 {dimension_numbers = #tpu.dot_dimension_numbers<[1], [0], [0], [1], [0, 0, 1, 1], [], []>} : vector<8x128xf32>, vector<128x512xf32>, vector<8x512xf32> -> vector<8x512xf32>
    %187 = arith.addf %182, %186 : vector<8x512xf32>
    %188 = vector.extract_strided_slice %187 {offsets = [0, 0], sizes = [8, 128], strides = [1, 1]} : vector<8x512xf32> to vector<8x128xf32>
    %189 = arith.negf %188 : vector<8x128xf32>
    %190 = math.exp %189 : vector<8x128xf32>
    %cst_107 = arith.constant 1.000000e+00 : f32
    %191 = vector.broadcast %cst_107 : f32 to vector<8x128xf32>
    %192 = arith.addf %191, %190 : vector<8x128xf32>
    %193 = arith.divf %191, %192 : vector<8x128xf32>
    %194 = vector.extract_strided_slice %187 {offsets = [0, 128], sizes = [8, 128], strides = [1, 1]} : vector<8x512xf32> to vector<8x128xf32>
    %195 = arith.negf %194 : vector<8x128xf32>
    %196 = math.exp %195 : vector<8x128xf32>
    %cst_108 = arith.constant 1.000000e+00 : f32
    %197 = vector.broadcast %cst_108 : f32 to vector<8x128xf32>
    %198 = arith.addf %197, %196 : vector<8x128xf32>
    %199 = arith.divf %197, %198 : vector<8x128xf32>
    %200 = vector.extract_strided_slice %187 {offsets = [0, 256], sizes = [8, 128], strides = [1, 1]} : vector<8x512xf32> to vector<8x128xf32>
    %201 = math.tanh %200 : vector<8x128xf32>
    %202 = vector.extract_strided_slice %187 {offsets = [0, 384], sizes = [8, 128], strides = [1, 1]} : vector<8x512xf32> to vector<8x128xf32>
    %203 = arith.negf %202 : vector<8x128xf32>
    %204 = math.exp %203 : vector<8x128xf32>
    %cst_109 = arith.constant 1.000000e+00 : f32
    %205 = vector.broadcast %cst_109 : f32 to vector<8x128xf32>
    %206 = arith.addf %205, %204 : vector<8x128xf32>
    %207 = arith.divf %205, %206 : vector<8x128xf32>
    %c0_110 = arith.constant 0 : index
    %c0_111 = arith.constant 0 : index
    %208 = vector.load %arg15[%c0_110, %c0_111] : memref<8x128xf32, #tpu.memory_space<vmem>>, vector<8x128xf32>
    %209 = arith.mulf %199, %208 : vector<8x128xf32>
    %210 = arith.mulf %193, %201 : vector<8x128xf32>
    %211 = arith.addf %209, %210 : vector<8x128xf32>
    %212 = math.tanh %211 : vector<8x128xf32>
    %213 = arith.mulf %207, %212 : vector<8x128xf32>
    %c0_112 = arith.constant 0 : index
    %c0_113 = arith.constant 0 : index
    %214 = vector.load %arg15[%c0_112, %c0_113] : memref<8x128xf32, #tpu.memory_space<vmem>>, vector<8x128xf32>
    tpu.vector_store %arg15[%c0_112, %c0_113], %211 {strides = array<i32>} : memref<8x128xf32, #tpu.memory_space<vmem>>, vector<8x128xf32>,
    %c0_114 = arith.constant 0 : index
    %c0_115 = arith.constant 0 : index
    %215 = vector.load %arg14[%c0_114, %c0_115] : memref<8x128xf32, #tpu.memory_space<vmem>>, vector<8x128xf32>
    tpu.vector_store %arg14[%c0_114, %c0_115], %213 {strides = array<i32>} : memref<8x128xf32, #tpu.memory_space<vmem>>, vector<8x128xf32>,
    %216 = arith.index_cast %c4_i32 : i32 to index
    %c0_116 = arith.constant 0 : index
    %c0_117 = arith.constant 0 : index
    %217 = vector.load %arg12[%216, %c0_116, %c0_117] : memref<8x8x128xf32, #tpu.memory_space<vmem>>, vector<1x8x128xf32>
    %218 = vector.shape_cast %217 : vector<1x8x128xf32> to vector<8x128xf32>
    %219 = vector.shape_cast %213 : vector<8x128xf32> to vector<1x8x128xf32>
    tpu.vector_store %arg12[%216, %c0_116, %c0_117], %219 {strides = array<i32>} : memref<8x8x128xf32, #tpu.memory_space<vmem>>, vector<1x8x128xf32>,
    %c5_i32 = arith.constant 5 : i32
    %220 = arith.index_cast %c5_i32 : i32 to index
    %c0_118 = arith.constant 0 : index
    %c0_119 = arith.constant 0 : index
    %221 = vector.load %arg13[%220, %c0_118, %c0_119] : memref<8x8x512xf32, #tpu.memory_space<vmem>>, vector<1x8x512xf32>
    %222 = vector.shape_cast %221 : vector<1x8x512xf32> to vector<8x512xf32>
    %c0_120 = arith.constant 0 : index
    %c0_121 = arith.constant 0 : index
    %223 = vector.load %arg14[%c0_120, %c0_121] : memref<8x128xf32, #tpu.memory_space<vmem>>, vector<8x128xf32>
    %c0_122 = arith.constant 0 : index
    %c0_123 = arith.constant 0 : index
    %c0_124 = arith.constant 0 : index
    %224 = vector.load %arg3[%c0_122, %c0_123, %c0_124] : memref<1x128x512xf32, #tpu.memory_space<vmem>>, vector<1x128x512xf32>
    %225 = vector.shape_cast %224 : vector<1x128x512xf32> to vector<128x512xf32>
    %cst_125 = arith.constant dense<0.000000e+00> : vector<8x512xf32>
    %226 = tpu.matmul %223, %225, %cst_125 {dimension_numbers = #tpu.dot_dimension_numbers<[1], [0], [0], [1], [0, 0, 1, 1], [], []>} : vector<8x128xf32>, vector<128x512xf32>, vector<8x512xf32> -> vector<8x512xf32>
    %227 = arith.addf %222, %226 : vector<8x512xf32>
    %228 = vector.extract_strided_slice %227 {offsets = [0, 0], sizes = [8, 128], strides = [1, 1]} : vector<8x512xf32> to vector<8x128xf32>
    %229 = arith.negf %228 : vector<8x128xf32>
    %230 = math.exp %229 : vector<8x128xf32>
    %cst_126 = arith.constant 1.000000e+00 : f32
    %231 = vector.broadcast %cst_126 : f32 to vector<8x128xf32>
    %232 = arith.addf %231, %230 : vector<8x128xf32>
    %233 = arith.divf %231, %232 : vector<8x128xf32>
    %234 = vector.extract_strided_slice %227 {offsets = [0, 128], sizes = [8, 128], strides = [1, 1]} : vector<8x512xf32> to vector<8x128xf32>
    %235 = arith.negf %234 : vector<8x128xf32>
    %236 = math.exp %235 : vector<8x128xf32>
    %cst_127 = arith.constant 1.000000e+00 : f32
    %237 = vector.broadcast %cst_127 : f32 to vector<8x128xf32>
    %238 = arith.addf %237, %236 : vector<8x128xf32>
    %239 = arith.divf %237, %238 : vector<8x128xf32>
    %240 = vector.extract_strided_slice %227 {offsets = [0, 256], sizes = [8, 128], strides = [1, 1]} : vector<8x512xf32> to vector<8x128xf32>
    %241 = math.tanh %240 : vector<8x128xf32>
    %242 = vector.extract_strided_slice %227 {offsets = [0, 384], sizes = [8, 128], strides = [1, 1]} : vector<8x512xf32> to vector<8x128xf32>
    %243 = arith.negf %242 : vector<8x128xf32>
    %244 = math.exp %243 : vector<8x128xf32>
    %cst_128 = arith.constant 1.000000e+00 : f32
    %245 = vector.broadcast %cst_128 : f32 to vector<8x128xf32>
    %246 = arith.addf %245, %244 : vector<8x128xf32>
    %247 = arith.divf %245, %246 : vector<8x128xf32>
    %c0_129 = arith.constant 0 : index
    %c0_130 = arith.constant 0 : index
    %248 = vector.load %arg15[%c0_129, %c0_130] : memref<8x128xf32, #tpu.memory_space<vmem>>, vector<8x128xf32>
    %249 = arith.mulf %239, %248 : vector<8x128xf32>
    %250 = arith.mulf %233, %241 : vector<8x128xf32>
    %251 = arith.addf %249, %250 : vector<8x128xf32>
    %252 = math.tanh %251 : vector<8x128xf32>
    %253 = arith.mulf %247, %252 : vector<8x128xf32>
    %c0_131 = arith.constant 0 : index
    %c0_132 = arith.constant 0 : index
    %254 = vector.load %arg15[%c0_131, %c0_132] : memref<8x128xf32, #tpu.memory_space<vmem>>, vector<8x128xf32>
    tpu.vector_store %arg15[%c0_131, %c0_132], %251 {strides = array<i32>} : memref<8x128xf32, #tpu.memory_space<vmem>>, vector<8x128xf32>,
    %c0_133 = arith.constant 0 : index
    %c0_134 = arith.constant 0 : index
    %255 = vector.load %arg14[%c0_133, %c0_134] : memref<8x128xf32, #tpu.memory_space<vmem>>, vector<8x128xf32>
    tpu.vector_store %arg14[%c0_133, %c0_134], %253 {strides = array<i32>} : memref<8x128xf32, #tpu.memory_space<vmem>>, vector<8x128xf32>,
    %256 = arith.index_cast %c5_i32 : i32 to index
    %c0_135 = arith.constant 0 : index
    %c0_136 = arith.constant 0 : index
    %257 = vector.load %arg12[%256, %c0_135, %c0_136] : memref<8x8x128xf32, #tpu.memory_space<vmem>>, vector<1x8x128xf32>
    %258 = vector.shape_cast %257 : vector<1x8x128xf32> to vector<8x128xf32>
    %259 = vector.shape_cast %253 : vector<8x128xf32> to vector<1x8x128xf32>
    tpu.vector_store %arg12[%256, %c0_135, %c0_136], %259 {strides = array<i32>} : memref<8x8x128xf32, #tpu.memory_space<vmem>>, vector<1x8x128xf32>,
    %c6_i32 = arith.constant 6 : i32
    %260 = arith.index_cast %c6_i32 : i32 to index
    %c0_137 = arith.constant 0 : index
    %c0_138 = arith.constant 0 : index
    %261 = vector.load %arg13[%260, %c0_137, %c0_138] : memref<8x8x512xf32, #tpu.memory_space<vmem>>, vector<1x8x512xf32>
    %262 = vector.shape_cast %261 : vector<1x8x512xf32> to vector<8x512xf32>
    %c0_139 = arith.constant 0 : index
    %c0_140 = arith.constant 0 : index
    %263 = vector.load %arg14[%c0_139, %c0_140] : memref<8x128xf32, #tpu.memory_space<vmem>>, vector<8x128xf32>
    %c0_141 = arith.constant 0 : index
    %c0_142 = arith.constant 0 : index
    %c0_143 = arith.constant 0 : index
    %264 = vector.load %arg3[%c0_141, %c0_142, %c0_143] : memref<1x128x512xf32, #tpu.memory_space<vmem>>, vector<1x128x512xf32>
    %265 = vector.shape_cast %264 : vector<1x128x512xf32> to vector<128x512xf32>
    %cst_144 = arith.constant dense<0.000000e+00> : vector<8x512xf32>
    %266 = tpu.matmul %263, %265, %cst_144 {dimension_numbers = #tpu.dot_dimension_numbers<[1], [0], [0], [1], [0, 0, 1, 1], [], []>} : vector<8x128xf32>, vector<128x512xf32>, vector<8x512xf32> -> vector<8x512xf32>
    %267 = arith.addf %262, %266 : vector<8x512xf32>
    %268 = vector.extract_strided_slice %267 {offsets = [0, 0], sizes = [8, 128], strides = [1, 1]} : vector<8x512xf32> to vector<8x128xf32>
    %269 = arith.negf %268 : vector<8x128xf32>
    %270 = math.exp %269 : vector<8x128xf32>
    %cst_145 = arith.constant 1.000000e+00 : f32
    %271 = vector.broadcast %cst_145 : f32 to vector<8x128xf32>
    %272 = arith.addf %271, %270 : vector<8x128xf32>
    %273 = arith.divf %271, %272 : vector<8x128xf32>
    %274 = vector.extract_strided_slice %267 {offsets = [0, 128], sizes = [8, 128], strides = [1, 1]} : vector<8x512xf32> to vector<8x128xf32>
    %275 = arith.negf %274 : vector<8x128xf32>
    %276 = math.exp %275 : vector<8x128xf32>
    %cst_146 = arith.constant 1.000000e+00 : f32
    %277 = vector.broadcast %cst_146 : f32 to vector<8x128xf32>
    %278 = arith.addf %277, %276 : vector<8x128xf32>
    %279 = arith.divf %277, %278 : vector<8x128xf32>
    %280 = vector.extract_strided_slice %267 {offsets = [0, 256], sizes = [8, 128], strides = [1, 1]} : vector<8x512xf32> to vector<8x128xf32>
    %281 = math.tanh %280 : vector<8x128xf32>
    %282 = vector.extract_strided_slice %267 {offsets = [0, 384], sizes = [8, 128], strides = [1, 1]} : vector<8x512xf32> to vector<8x128xf32>
    %283 = arith.negf %282 : vector<8x128xf32>
    %284 = math.exp %283 : vector<8x128xf32>
    %cst_147 = arith.constant 1.000000e+00 : f32
    %285 = vector.broadcast %cst_147 : f32 to vector<8x128xf32>
    %286 = arith.addf %285, %284 : vector<8x128xf32>
    %287 = arith.divf %285, %286 : vector<8x128xf32>
    %c0_148 = arith.constant 0 : index
    %c0_149 = arith.constant 0 : index
    %288 = vector.load %arg15[%c0_148, %c0_149] : memref<8x128xf32, #tpu.memory_space<vmem>>, vector<8x128xf32>
    %289 = arith.mulf %279, %288 : vector<8x128xf32>
    %290 = arith.mulf %273, %281 : vector<8x128xf32>
    %291 = arith.addf %289, %290 : vector<8x128xf32>
    %292 = math.tanh %291 : vector<8x128xf32>
    %293 = arith.mulf %287, %292 : vector<8x128xf32>
    %c0_150 = arith.constant 0 : index
    %c0_151 = arith.constant 0 : index
    %294 = vector.load %arg15[%c0_150, %c0_151] : memref<8x128xf32, #tpu.memory_space<vmem>>, vector<8x128xf32>
    tpu.vector_store %arg15[%c0_150, %c0_151], %291 {strides = array<i32>} : memref<8x128xf32, #tpu.memory_space<vmem>>, vector<8x128xf32>,
    %c0_152 = arith.constant 0 : index
    %c0_153 = arith.constant 0 : index
    %295 = vector.load %arg14[%c0_152, %c0_153] : memref<8x128xf32, #tpu.memory_space<vmem>>, vector<8x128xf32>
    tpu.vector_store %arg14[%c0_152, %c0_153], %293 {strides = array<i32>} : memref<8x128xf32, #tpu.memory_space<vmem>>, vector<8x128xf32>,
    %296 = arith.index_cast %c6_i32 : i32 to index
    %c0_154 = arith.constant 0 : index
    %c0_155 = arith.constant 0 : index
    %297 = vector.load %arg12[%296, %c0_154, %c0_155] : memref<8x8x128xf32, #tpu.memory_space<vmem>>, vector<1x8x128xf32>
    %298 = vector.shape_cast %297 : vector<1x8x128xf32> to vector<8x128xf32>
    %299 = vector.shape_cast %293 : vector<8x128xf32> to vector<1x8x128xf32>
    tpu.vector_store %arg12[%296, %c0_154, %c0_155], %299 {strides = array<i32>} : memref<8x8x128xf32, #tpu.memory_space<vmem>>, vector<1x8x128xf32>,
    %c7_i32 = arith.constant 7 : i32
    %300 = arith.index_cast %c7_i32 : i32 to index
    %c0_156 = arith.constant 0 : index
    %c0_157 = arith.constant 0 : index
    %301 = vector.load %arg13[%300, %c0_156, %c0_157] : memref<8x8x512xf32, #tpu.memory_space<vmem>>, vector<1x8x512xf32>
    %302 = vector.shape_cast %301 : vector<1x8x512xf32> to vector<8x512xf32>
    %c0_158 = arith.constant 0 : index
    %c0_159 = arith.constant 0 : index
    %303 = vector.load %arg14[%c0_158, %c0_159] : memref<8x128xf32, #tpu.memory_space<vmem>>, vector<8x128xf32>
    %c0_160 = arith.constant 0 : index
    %c0_161 = arith.constant 0 : index
    %c0_162 = arith.constant 0 : index
    %304 = vector.load %arg3[%c0_160, %c0_161, %c0_162] : memref<1x128x512xf32, #tpu.memory_space<vmem>>, vector<1x128x512xf32>
    %305 = vector.shape_cast %304 : vector<1x128x512xf32> to vector<128x512xf32>
    %cst_163 = arith.constant dense<0.000000e+00> : vector<8x512xf32>
    %306 = tpu.matmul %303, %305, %cst_163 {dimension_numbers = #tpu.dot_dimension_numbers<[1], [0], [0], [1], [0, 0, 1, 1], [], []>} : vector<8x128xf32>, vector<128x512xf32>, vector<8x512xf32> -> vector<8x512xf32>
    %307 = arith.addf %302, %306 : vector<8x512xf32>
    %308 = vector.extract_strided_slice %307 {offsets = [0, 0], sizes = [8, 128], strides = [1, 1]} : vector<8x512xf32> to vector<8x128xf32>
    %309 = arith.negf %308 : vector<8x128xf32>
    %310 = math.exp %309 : vector<8x128xf32>
    %cst_164 = arith.constant 1.000000e+00 : f32
    %311 = vector.broadcast %cst_164 : f32 to vector<8x128xf32>
    %312 = arith.addf %311, %310 : vector<8x128xf32>
    %313 = arith.divf %311, %312 : vector<8x128xf32>
    %314 = vector.extract_strided_slice %307 {offsets = [0, 128], sizes = [8, 128], strides = [1, 1]} : vector<8x512xf32> to vector<8x128xf32>
    %315 = arith.negf %314 : vector<8x128xf32>
    %316 = math.exp %315 : vector<8x128xf32>
    %cst_165 = arith.constant 1.000000e+00 : f32
    %317 = vector.broadcast %cst_165 : f32 to vector<8x128xf32>
    %318 = arith.addf %317, %316 : vector<8x128xf32>
    %319 = arith.divf %317, %318 : vector<8x128xf32>
    %320 = vector.extract_strided_slice %307 {offsets = [0, 256], sizes = [8, 128], strides = [1, 1]} : vector<8x512xf32> to vector<8x128xf32>
    %321 = math.tanh %320 : vector<8x128xf32>
    %322 = vector.extract_strided_slice %307 {offsets = [0, 384], sizes = [8, 128], strides = [1, 1]} : vector<8x512xf32> to vector<8x128xf32>
    %323 = arith.negf %322 : vector<8x128xf32>
    %324 = math.exp %323 : vector<8x128xf32>
    %cst_166 = arith.constant 1.000000e+00 : f32
    %325 = vector.broadcast %cst_166 : f32 to vector<8x128xf32>
    %326 = arith.addf %325, %324 : vector<8x128xf32>
    %327 = arith.divf %325, %326 : vector<8x128xf32>
    %c0_167 = arith.constant 0 : index
    %c0_168 = arith.constant 0 : index
    %328 = vector.load %arg15[%c0_167, %c0_168] : memref<8x128xf32, #tpu.memory_space<vmem>>, vector<8x128xf32>
    %329 = arith.mulf %319, %328 : vector<8x128xf32>
    %330 = arith.mulf %313, %321 : vector<8x128xf32>
    %331 = arith.addf %329, %330 : vector<8x128xf32>
    %332 = math.tanh %331 : vector<8x128xf32>
    %333 = arith.mulf %327, %332 : vector<8x128xf32>
    %c0_169 = arith.constant 0 : index
    %c0_170 = arith.constant 0 : index
    %334 = vector.load %arg15[%c0_169, %c0_170] : memref<8x128xf32, #tpu.memory_space<vmem>>, vector<8x128xf32>
    tpu.vector_store %arg15[%c0_169, %c0_170], %331 {strides = array<i32>} : memref<8x128xf32, #tpu.memory_space<vmem>>, vector<8x128xf32>,
    %c0_171 = arith.constant 0 : index
    %c0_172 = arith.constant 0 : index
    %335 = vector.load %arg14[%c0_171, %c0_172] : memref<8x128xf32, #tpu.memory_space<vmem>>, vector<8x128xf32>
    tpu.vector_store %arg14[%c0_171, %c0_172], %333 {strides = array<i32>} : memref<8x128xf32, #tpu.memory_space<vmem>>, vector<8x128xf32>,
    %336 = arith.index_cast %c7_i32 : i32 to index
    %c0_173 = arith.constant 0 : index
    %c0_174 = arith.constant 0 : index
    %337 = vector.load %arg12[%336, %c0_173, %c0_174] : memref<8x8x128xf32, #tpu.memory_space<vmem>>, vector<1x8x128xf32>
    %338 = vector.shape_cast %337 : vector<1x8x128xf32> to vector<8x128xf32>
    %339 = vector.shape_cast %333 : vector<8x128xf32> to vector<1x8x128xf32>
    tpu.vector_store %arg12[%336, %c0_173, %c0_174], %339 {strides = array<i32>} : memref<8x8x128xf32, #tpu.memory_space<vmem>>, vector<1x8x128xf32>,
    %c8_i32 = arith.constant 8 : i32
    %c0_175 = arith.constant 0 : index
    %c0_176 = arith.constant 0 : index
    %340 = vector.load %arg14[%c0_175, %c0_176] : memref<8x128xf32, #tpu.memory_space<vmem>>, vector<8x128xf32>
    %c0_177 = arith.constant 0 : index
    %c0_178 = arith.constant 0 : index
    %c0_179 = arith.constant 0 : index
    %341 = vector.load %arg10[%c0_177, %c0_178, %c0_179] : memref<1x8x128xf32, #tpu.memory_space<vmem>>, vector<1x8x128xf32>
    %342 = vector.shape_cast %341 : vector<1x8x128xf32> to vector<8x128xf32>
    %343 = vector.shape_cast %340 : vector<8x128xf32> to vector<1x8x128xf32>
    tpu.vector_store %arg10[%c0_177, %c0_178, %c0_179], %343 {strides = array<i32>} : memref<1x8x128xf32, #tpu.memory_space<vmem>>, vector<1x8x128xf32>,
    %c0_180 = arith.constant 0 : index
    %c0_181 = arith.constant 0 : index
    %344 = vector.load %arg15[%c0_180, %c0_181] : memref<8x128xf32, #tpu.memory_space<vmem>>, vector<8x128xf32>
    %c0_182 = arith.constant 0 : index
    %c0_183 = arith.constant 0 : index
    %c0_184 = arith.constant 0 : index
    %345 = vector.load %arg11[%c0_182, %c0_183, %c0_184] : memref<1x8x128xf32, #tpu.memory_space<vmem>>, vector<1x8x128xf32>
    %346 = vector.shape_cast %345 : vector<1x8x128xf32> to vector<8x128xf32>
    %347 = vector.shape_cast %344 : vector<8x128xf32> to vector<1x8x128xf32>
    tpu.vector_store %arg11[%c0_182, %c0_183, %c0_184], %347 {strides = array<i32>} : memref<1x8x128xf32, #tpu.memory_space<vmem>>, vector<1x8x128xf32>,
    %c2_i32_185 = arith.constant 2 : i32
    %348 = arith.cmpi eq, %arg0, %c2_i32_185 : i32
    %349 = arith.extui %348 : i1 to i32
    %c0_i32_186 = arith.constant 0 : i32
    %350 = arith.cmpi ne, %349, %c0_i32_186 : i32
    scf.if %350 {
      %c0_187 = arith.constant 0 : index
      %c0_188 = arith.constant 0 : index
      %c0_189 = arith.constant 0 : index
      %351 = vector.load %arg12[%c0_187, %c0_188, %c0_189] : memref<8x8x128xf32, #tpu.memory_space<vmem>>, vector<8x8x128xf32>
      %352 = vector.shape_cast %351 : vector<8x8x128xf32> to vector<64x128xf32>
      %c0_190 = arith.constant 0 : index
      %c0_191 = arith.constant 0 : index
      %353 = vector.load %arg7[%c0_190, %c0_191] : memref<128x128xf32, #tpu.memory_space<vmem>>, vector<128x128xf32>
      %cst_192 = arith.constant dense<0.000000e+00> : vector<64x128xf32>
      %354 = tpu.matmul %352, %353, %cst_192 {dimension_numbers = #tpu.dot_dimension_numbers<[1], [0], [0], [1], [0, 0, 1, 1], [], []>} : vector<64x128xf32>, vector<128x128xf32>, vector<64x128xf32> -> vector<64x128xf32>
      %c0_193 = arith.constant 0 : index
      %c0_194 = arith.constant 0 : index
      %355 = vector.load %arg8[%c0_193, %c0_194] : memref<1x128xf32, #tpu.memory_space<vmem>>, vector<1x128xf32>
      %356 = vector.broadcast %355 : vector<1x128xf32> to vector<64x128xf32>
      %357 = arith.addf %354, %356 : vector<64x128xf32>
      %358 = vector.shape_cast %357 : vector<64x128xf32> to vector<8x8x128xf32>
      %c0_195 = arith.constant 0 : index
      %c0_196 = arith.constant 0 : index
      %c0_197 = arith.constant 0 : index
      %359 = vector.load %arg9[%c0_195, %c0_196, %c0_197] : memref<8x8x128xf32, #tpu.memory_space<vmem>>, vector<8x8x128xf32>
      tpu.vector_store %arg9[%c0_195, %c0_196, %c0_197], %358 {strides = array<i32>} : memref<8x8x128xf32, #tpu.memory_space<vmem>>, vector<8x8x128xf32>,
    } else {
    }
    return
  }
  func.func @transform_0(%arg0: i32) -> (i32, i32, i32) {
    %c0_i32 = arith.constant 0 : i32
    %c0_i32_0 = arith.constant 0 : i32
    %c0_i32_1 = arith.constant 0 : i32
    %c0_i32_2 = arith.constant 0 : i32
    return %c0_i32, %c0_i32_0, %c0_i32_1 : i32, i32, i32
  }
  func.func @transform_1(%arg0: i32) -> (i32, i32, i32) {
    %c0_i32 = arith.constant 0 : i32
    %c0_i32_0 = arith.constant 0 : i32
    %c0_i32_1 = arith.constant 0 : i32
    return %arg0, %c0_i32, %c0_i32_0 : i32, i32, i32
  }
  func.func @transform_2(%arg0: i32) -> (i32, i32, i32) {
    %c0_i32 = arith.constant 0 : i32
    %c0_i32_0 = arith.constant 0 : i32
    %c0_i32_1 = arith.constant 0 : i32
    return %arg0, %c0_i32, %c0_i32_0 : i32, i32, i32
  }
  func.func @transform_3(%arg0: i32) -> (i32, i32, i32) {
    %c0_i32 = arith.constant 0 : i32
    %c0_i32_0 = arith.constant 0 : i32
    %c0_i32_1 = arith.constant 0 : i32
    return %arg0, %c0_i32, %c0_i32_0 : i32, i32, i32
  }
  func.func @transform_4(%arg0: i32) -> (i32, i32, i32) {
    %c0_i32 = arith.constant 0 : i32
    %c0_i32_0 = arith.constant 0 : i32
    %c0_i32_1 = arith.constant 0 : i32
    return %arg0, %c0_i32, %c0_i32_0 : i32, i32, i32
  }
  func.func @transform_5(%arg0: i32) -> (i32, i32, i32) {
    %c0_i32 = arith.constant 0 : i32
    %c0_i32_0 = arith.constant 0 : i32
    %c0_i32_1 = arith.constant 0 : i32
    return %arg0, %c0_i32, %c0_i32_0 : i32, i32, i32
  }
  func.func @transform_6(%arg0: i32) -> (i32, i32) {
    %c0_i32 = arith.constant 0 : i32
    %c0_i32_0 = arith.constant 0 : i32
    %c0_i32_1 = arith.constant 0 : i32
    return %c0_i32, %c0_i32_0 : i32, i32
  }
  func.func @transform_7(%arg0: i32) -> (i32, i32) {
    %c0_i32 = arith.constant 0 : i32
    %c0_i32_0 = arith.constant 0 : i32
    %c0_i32_1 = arith.constant 0 : i32
    return %c0_i32, %c0_i32_0 : i32, i32
  }
  func.func @transform_8(%arg0: i32) -> (i32, i32, i32) {
    %c0_i32 = arith.constant 0 : i32
    %c0_i32_0 = arith.constant 0 : i32
    %c0_i32_1 = arith.constant 0 : i32
    %c0_i32_2 = arith.constant 0 : i32
    return %c0_i32, %c0_i32_0, %c0_i32_1 : i32, i32, i32
  }
  func.func @transform_9(%arg0: i32) -> (i32, i32, i32) {
    %c0_i32 = arith.constant 0 : i32
    %c0_i32_0 = arith.constant 0 : i32
    %c0_i32_1 = arith.constant 0 : i32
    return %arg0, %c0_i32, %c0_i32_0 : i32, i32, i32
  }
  func.func @transform_10(%arg0: i32) -> (i32, i32, i32) {
    %c0_i32 = arith.constant 0 : i32
    %c0_i32_0 = arith.constant 0 : i32
    %c0_i32_1 = arith.constant 0 : i32
    return %arg0, %c0_i32, %c0_i32_0 : i32, i32, i32
  }
}

</mosaic_0001>

<bundles_post_ra>
// kernel: tpu_custom_call.1
= control target key start
LH: loop header
LB: loop body
LE: loop exit
PB: predicated region body
PF: predicated region fallthrough
CT: control target
= control target key end

     0   :  { %s5932_s0 = inlined_call_operand.hbm [shape: f32[8,8,128], index: 0, kind: input, shape index: {}]   ;;  %s5933_s1 = inlined_call_operand.hbm [shape: f32[3,128,512], index: 1, kind: input, shape index: {}]   ;;  %s5934_s2 = inlined_call_operand.hbm [shape: f32[3,128,512], index: 2, kind: input, shape index: {}]   ;;  %s5935_s3 = inlined_call_operand.hbm [shape: f32[3,1,512], index: 3, kind: input, shape index: {}]   ;;  %s5936_s4 = inlined_call_operand.hbm [shape: f32[3,8,128], index: 4, kind: input, shape index: {}]   ;;  %s5937_s5 = inlined_call_operand.hbm [shape: f32[3,8,128], index: 5, kind: input, shape index: {}]   ;;  %s5938_s6 = inlined_call_operand.hbm [shape: f32[128,128], index: 6, kind: input, shape index: {}]   ;;  %s5939_s7 = inlined_call_operand.vmem [shape: f32[1,128], index: 7, kind: input, shape index: {}]   ;;  %s5940_s8 = inlined_call_operand.hbm [shape: f32[8,8,128], index: 8, kind: output, shape index: {0}]   ;;  %s5941_s9 = inlined_call_operand.hbm [shape: f32[3,8,128], index: 9, kind: output, shape index: {1}]   ;;  %s5942_s10 = inlined_call_operand.hbm [shape: f32[3,8,128], index: 10, kind: output, shape index: {2}]  }
   0x1   :  { %5971 = sst [smem:[#allocation35_spill]] %s5933_s1 }
   0x2   :  { %5972 = sst [smem:[#allocation36_spill]] %s5938_s6 }
   0x3   :  { %5973 = sst [smem:[#allocation37_spill]] %s5939_s7 }
   0x4   :  { %5974 = sst [smem:[#allocation38_spill]] %s5940_s8 }
   0x5   :  { %5975 = sst [smem:[#allocation39_spill]] %s5941_s9 }
   0x6   :  { %5976 = sst [smem:[#allocation40_spill]] %s5942_s10 }
   0x7   :  { %16 = vsyncpa [#allocation7], 0 }
   0x8   :  { %17 = vsyncpa [#allocation10], 0 }
   0x9   :  { %19 = vsyncpa [#allocation10 + $0x1], 0 }
   0xa   :  { %20 = vsyncpa [#allocation13], 0 }
   0xb   :  { %22 = vsyncpa [#allocation13 + $0x1], 0 }
   0xc   :  { %23 = vsyncpa [#allocation16], 0 }
   0xd   :  { %25 = vsyncpa [#allocation16 + $0x1], 0 }
   0xe   :  { %26 = vsyncpa [#allocation8], 0 }
   0xf   :  { %27 = vsyncpa [#allocation20], 0 }
  0x10   :  { %29 = vsyncpa [#allocation20 + $0x1], 0  ;;  %s4785_s13 = smov 0   ;;  %s4787_s14 = smov 0  }
  0x11   :  { %s4789_s15 = smov 0   ;;  %s4791_s16 = smov 0  }
  0x12 LB: > { %5977 = sst [smem:[#allocation29_spill]] %s4707_s15  ;;  %s4804_s17 = sadd.s32 4294967295, %s4711_s16   ;;  %s4711_s16 = sphi %s4791_s16, %s6029_s16   ;;  %s4707_s15 = sphi %s4789_s15, %s6031_s15   ;;  %s4703_s14 = sphi %s4787_s14, %s6033_s14   ;;  %s4699_s13 = sphi %s4785_s13, %s6032_s13  }
  0x13   : > { %s5944_s18 = sadd.s32 4294967294, %s4711_s16   ;;  %s4808_s19 = sadd.s32 1, %s4711_s16  }
  0x14   : > { %5978 = sst [smem:[#allocation30_spill]] %s4808_s19  ;;  %s63_s20 = sadd.s32 1, %s4707_s15 }
  0x15   : > { %s60_s21 = ssub.s32 %s4711_s16, %s4808_s19  ;;  %p70_p0 = scmp.ne.s32.totalorder %s4707_s15, %s4703_s14 }
  0x16   : > { %p61_p1 = scmp.eq.s32.totalorder %s60_s21, 0  ;;  %p71_p2 = scmp.eq.s32.totalorder %s4711_s16, 0 }
  0x17   : > { %p76_p3 = scmp.ne.s32.totalorder %s4703_s14, %s4699_s13  ;;  %p5948_p4 = scmp.eq.s32.totalorder %s4804_s17, 0 }
  0x18   : > { %s4819_s22 = scalar_select %p61_p1, %s4707_s15, %s63_s20  }
  0x19   : > { %p4821_p5 = por %p71_p2, %p70_p0  ;;  %p4827_p6 = por %p5948_p4, %p76_p3 }
  0x1a   : > { %5979 = sst [smem:[#allocation31_spill]] %s4819_s22  ;;  %p5945_p7 = scmp.eq.s32.totalorder %s4804_s17, 2 }
  0x1b   : > { %s5980_s23 = scalar_select %p4821_p5, 1, 0 }
  0x1c   : > { %s5981_s24 = scalar_select %p4827_p6, 1, 0 }
  0x1d   : > { %p273_p8 = scmp.eq.s32.totalorder %s5944_s18, 2  ;;  %p3310_p9 = scmp.ge.s32.totalorder %s4711_s16, 1 }
  0x1e   : > { %5982 = sst [smem:[#allocation32_spill]] %s5981_s24  ;;  %p306_p10 = scmp.lt.s32.totalorder %s4711_s16, 4 }
  0x1f   : > { %p4838_p11 = por %p5945_p7, %p70_p0  ;;  %p4842_p12 = por %p273_p8, %p76_p3 }
  0x20   : > { %p4846_p13 = pnand %p3310_p9, %p306_p10  ;;  %s4713_s28 = smov [#allocation17]  }
  0x21   : > { %s5983_s25 = scalar_select %p4838_p11, 1, 0 }
  0x22   : > { %s5985_s26 = scalar_select %p4842_p12, 1, 0 }
  0x23   : > { %5984 = sst [smem:[#allocation33_spill]] %s5983_s25  ;;  %p4157_p2 = pneg %p4846_p13 }
  0x24   : > { %5986 = sst [smem:[#allocation34_spill]] %s5985_s26  ;;  %s331_s29 = sshll.u32 %s4713_s28, 4  ;;  %s332_s29 = int_to_ptr.vmem [resolvable:$true] %s331_s29 }
  0x25   : > { %s5987_s27 = scalar_select %p4846_p13, 1, 0 }
  0x26   : > { %p4855_p6 = pnand %p4157_p2, %p5948_p4  ;;  %s4861_s11 = sand.u32 1, %s4711_s16  }
  0x27   : > { %s5989_s6 = sld [smem:[#allocation36_spill]] }
  0x28   : > { %s5988_s30 = scalar_select %p4855_p6, 1, 0 }
  0x29   : > { %p5957_p8 = pneg %p4855_p6 }
  0x2d   : > { %s4365_s20 = scalar_lea.hbm %s5989_s6, 2048 }
  0x2e   : > { %p4366_p3 = scmp.ne.s32.totalorder %s5989_s6, %s4365_s20  ;;  %p4372_p2 = scmp.lt.u32.totalorder %s4365_s20, %s5989_s6 }
  0x30   : > { %p4368_p9 = pnand %p5957_p8, %p4366_p3 }
  0x32   : > { %p4369_p10 = pneg %p4368_p9 }
  0x34   : > { %p4374_p7 = pnand %p4372_p2, %p4369_p10 }
  0x36   : > { %4377 = shalt.err (!%p4374_p7)
}
  0x37   : > { %s4378_s19 = scalar_lea.vmem %s332_s29, 2048  ;;  %p4386_p12 = scmp.lt.s32.totalorder %s332_s29, %s332_s29 }
  0x38   : > { %p4379_p1 = scmp.ne.s32.totalorder %s332_s29, %s4378_s19  ;;  %p4387_p11 = scmp.lt.s32.totalorder %s4378_s19, %s4378_s19 }
  0x3a   : > { %p4381_p4 = pnand %p4379_p1, %p5957_p8  ;;  %p4388_p13 = por %p4387_p11, %p4386_p12 }
  0x3c   : > { %p4382_p0 = pneg %p4381_p4 }
  0x3e   : > { %p4389_p5 = pnand %p4388_p13, %p4382_p0 }
  0x40   : > { %4392 = shalt.err (!%p4389_p5)
}
  0x41   : > { %s5953_s18 = smov 128   ;;  %s5954_s22 = smov 8  }
  0x42   : > { %4163 = dma.hbm_to_vmem [thread:$0]  (!%p4855_p6), %s5989_s6, 2048, %s332_s29, [#allocation16], %s5953_s18, %s5953_s18, %s5954_s22  }
  0x43   : > { %s4889_s19 = sand.u32 1, %s4707_s15   ;;  %s5955_s20 = sshll.u32 %s4711_s16, 13 }
  0x44   : > { %s5956_s21 = sshll.u32 %s4889_s19, 9  ;;  %s5990_s1 = sld [smem:[#allocation35_spill]] }
  0x45   : > { %p5991_p4 = scmp.ne.s32.totalorder %s5980_s23, 0  ;;  %p5992_p5 = scmp.lt.s32.totalorder %s4711_s16, 3 }
  0x46   : > { %s352_s12 = scalar_lea.vmem [#allocation9], %s5956_s21 }
  0x47   : > { %p4904_p7 = pnand %p5992_p5, %p5991_p4  ;;  %s359_s13 = sshll.u32 %s352_s12, 4  ;;  %s4910_s13 = int_to_ptr.vmem [resolvable:$true] %s359_s13 }
  0x49   : > { %s5993_s29 = scalar_select %p4904_p7, 1, 0 }
  0x4a   : > { %s4898_s10 = scalar_lea.hbm %s5990_s1, %s5955_s20  ;;  %p4917_p12 = pneg %p4904_p7 }
  0x4b   : > { %s4393_s26 = scalar_lea.hbm %s4898_s10, 8192  ;;  %s4398_s20 = scalar_lea.hbm %s5990_s1, 24576 }
  0x4c   : > { %p4394_p11 = scmp.ne.s32.totalorder %s4898_s10, %s4393_s26  ;;  %p4399_p0 = scmp.lt.u32.totalorder %s4898_s10, %s5990_s1 }
  0x4d   : > { %s5994_s23 = scalar_select %p4917_p12, 1, 0 }
  0x4e   : > { %p4396_p13 = pnand %p4917_p12, %p4394_p11  ;;  %p4400_p3 = scmp.lt.u32.totalorder %s4398_s20, %s4393_s26 }
  0x4f   : > { %p4402_p10 = scmp.lt.u32.totalorder %s4393_s26, %s4898_s10 }
  0x50   : > { %p4397_p1 = pneg %p4396_p13  ;;  %p4401_p9 = por %p4400_p3, %p4399_p0 }
  0x52   : > { %p4403_p2 = por %p4402_p10, %p4401_p9 }
  0x54   : > { %p4404_p4 = pnand %p4403_p2, %p4397_p1 }
  0x56   : > { %4407 = shalt.err (!%p4404_p4)
}
  0x57   : > { %s4408_s18 = scalar_lea.vmem %s4910_s13, 8192  ;;  %s4716_s22 = smov [#allocation9]  }
  0x58   : > { %p4409_p5 = scmp.ne.s32.totalorder %s4910_s13, %s4408_s18  ;;  %s4413_s28 = sshll.u32 %s4716_s22, 4  ;;  %s4414_s28 = int_to_ptr.vmem [resolvable:$false] %s4413_s28 }
  0x59   : > { %s4415_s21 = scalar_lea.vmem %s4414_s28, 16384  ;;  %p4416_p8 = scmp.lt.s32.totalorder %s4910_s13, %s4414_s28 }
  0x5a   : > { %p4411_p11 = pnand %p4409_p5, %p4917_p12  ;;  %p4417_p6 = scmp.lt.s32.totalorder %s4415_s21, %s4408_s18 }
  0x5c   : > { %p4412_p13 = pneg %p4411_p11  ;;  %p4418_p0 = por %p4417_p6, %p4416_p8 }
  0x5e   : > { %p4419_p3 = pnand %p4418_p0, %p4412_p13 }
  0x60   : > { %4422 = shalt.err (!%p4419_p3)
}
  0x61   : > { %s4717_s20 = smov 512   ;;  %s4718_s26 = smov 32  }
  0x62   : > { %s5995_s12 = scalar_lea.sflag [#allocation10], %s4861_s11  ;;  %s5996_s18 = sshll.u32 %s4711_s16, 13 }
  0x63   : > { %4167 = dma.hbm_to_vmem [thread:$0]  (!%p4904_p7), %s4898_s10, 8192, %s4910_s13, %s5995_s12, %s4717_s20, %s4717_s20, %s4718_s26  }
  0x64   : > { %s4950_s21 = scalar_lea.hbm %s5934_s2, %s5996_s18  ;;  %s5997_s1 = sshll.u32 %s4889_s19, 9 }
  0x65   : > { %s373_s6 = scalar_lea.vmem [#allocation11], %s5997_s1  ;;  %s3320_s8 = sshll.u32 %s4889_s19, 2 }
  0x66   : > { %s380_s15 = sshll.u32 %s373_s6, 4  ;;  %s3374_s9 = sshll.u32 %s4711_s16, 6  ;;  %s4954_s15 = int_to_ptr.vmem [resolvable:$true] %s380_s15 }
  0x67   : > { %s4961_s24 = scalar_lea.hbm %s5935_s3, %s3374_s9  ;;  %s394_s10 = scalar_lea.vmem [#allocation12], %s3320_s8 }
  0x68   : > { %s402_s13 = sshll.u32 %s394_s10, 4  ;;  %s4719_s12 = smov [#allocation6]   ;;  %s4963_s13 = int_to_ptr.vmem [resolvable:$true] %s402_s13 }
  0x69   : > { %s4965_s1 = sshll.u32 %s4719_s12, 4  ;;  %s391_s6 = scalar_lea.sflag [#allocation13], %s4861_s11  ;;  %s319_s1 = int_to_ptr.vmem [resolvable:$true] %s4965_s1 }
  0x6a   : > { %s4423_s18 = scalar_lea.hbm %s4961_s24, 64  ;;  %s4428_s25 = scalar_lea.hbm %s5935_s3, 192 }
  0x6b   : > { %p4424_p6 = scmp.ne.s32.totalorder %s4961_s24, %s4423_s18  ;;  %p4429_p9 = scmp.lt.u32.totalorder %s4961_s24, %s5935_s3 }
  0x6c   : > { %p4430_p10 = scmp.lt.u32.totalorder %s4428_s25, %s4423_s18  ;;  %p4432_p4 = scmp.lt.u32.totalorder %s4423_s18, %s4961_s24 }
  0x6d   : > { %p4426_p8 = pnand %p4424_p6, %p4917_p12 }
  0x6e   : > { %p4431_p2 = por %p4430_p10, %p4429_p9 }
  0x6f   : > { %p4427_p1 = pneg %p4426_p8 }
  0x70   : > { %p4433_p5 = por %p4432_p4, %p4431_p2 }
  0x72   : > { %p4434_p11 = pnand %p4433_p5, %p4427_p1 }
  0x74   : > { %4437 = shalt.err (!%p4434_p11)
}
  0x75   : > { %s4438_s8 = scalar_lea.vmem %s4963_s13, 64  ;;  %s4720_s10 = smov [#allocation12]  }
  0x76   : > { %p4439_p13 = scmp.ne.s32.totalorder %s4963_s13, %s4438_s8  ;;  %s4443_s12 = sshll.u32 %s4720_s10, 4  ;;  %s4444_s12 = int_to_ptr.vmem [resolvable:$false] %s4443_s12 }
  0x77   : > { %s4445_s7 = scalar_lea.vmem %s4444_s12, 128  ;;  %p4446_p6 = scmp.lt.s32.totalorder %s4963_s13, %s4444_s12 }
  0x78   : > { %p4441_p0 = pnand %p4439_p13, %p4917_p12  ;;  %p4447_p8 = scmp.lt.s32.totalorder %s4445_s7, %s4438_s8 }
  0x7a   : > { %p4442_p3 = pneg %p4441_p0  ;;  %p4448_p9 = por %p4447_p8, %p4446_p6 }
  0x7c   : > { %p4449_p10 = pnand %p4448_p9, %p4442_p3 }
  0x7e   : > { %4452 = shalt.err (!%p4449_p10)
}
  0x7f   : > { %4173 = dma.hbm_to_vmem [thread:$0]  (!%p4904_p7), %s4961_s24, 64, %s4963_s13, %s391_s6  }
  0x80   : > { %s3323_s18 = sshll.u32 %s4889_s19, 3  ;;  %s4453_s22 = scalar_lea.hbm %s5932_s0, 1024 }
  0x81   : > { %p4454_p1 = scmp.ne.s32.totalorder %s5932_s0, %s4453_s22  ;;  %p5998_p2 = scmp.ne.s32.totalorder %s5988_s30, 0 }
  0x82   : > { %p4460_p13 = scmp.lt.u32.totalorder %s4453_s22, %s5932_s0 }
  0x83   : > { %p5999_p4 = pneg %p5998_p2 }
  0x85   : > { %p4456_p5 = pnand %p4454_p1, %p5999_p4 }
  0x87   : > { %p4457_p11 = pneg %p4456_p5 }
  0x89   : > { %p4462_p0 = pnand %p4460_p13, %p4457_p11 }
  0x8b   : > { %4465 = shalt.err (!%p4462_p0)
}
  0x8c   : > { %s4466_s24 = scalar_lea.vmem %s319_s1, 1024  ;;  %p6000_p6 = pmov %p5999_p4 }
  0x8d   : > { %p4467_p3 = scmp.ne.s32.totalorder %s319_s1, %s4466_s24  ;;  %p4474_p10 = scmp.lt.s32.totalorder %s319_s1, %s319_s1 }
  0x8e   : > { %p4475_p7 = scmp.lt.s32.totalorder %s4466_s24, %s4466_s24 }
  0x8f   : > { %p4469_p8 = pnand %p4467_p3, %p6000_p6 }
  0x90   : > { %p4476_p12 = por %p4475_p7, %p4474_p10 }
  0x91   : > { %p4470_p9 = pneg %p4469_p8 }
  0x93   : > { %p4477_p1 = pnand %p4476_p12, %p4470_p9 }
  0x95   : > { %4480 = shalt.err (!%p4477_p1)
}
  0x96   : > { %s6001_s13 = smov 8   ;;  %s6002_s7 = smov 128  }
  0x97   : > { %4160 = dma.hbm_to_vmem [thread:$0]  (!%p5998_p2), %s5932_s0, 1024, %s319_s1, [#allocation7], %s6002_s7, %s6002_s7, %s6001_s13  }
  0x98   : > { %s4481_s22 = scalar_lea.hbm %s4950_s21, 8192  ;;  %p6003_p5 = scmp.ne.s32.totalorder %s5994_s23, 0 }
  0x99   : > { %p4482_p4 = scmp.ne.s32.totalorder %s4950_s21, %s4481_s22  ;;  %s4486_s30 = scalar_lea.hbm %s5934_s2, 24576 }
  0x9a   : > { %p4487_p11 = scmp.lt.u32.totalorder %s4950_s21, %s5934_s2  ;;  %p4488_p13 = scmp.lt.u32.totalorder %s4486_s30, %s4481_s22 }
  0x9b   : > { %p4484_p7 = pnand %p4482_p4, %p6003_p5  ;;  %p4490_p3 = scmp.lt.u32.totalorder %s4481_s22, %s4950_s21 }
  0x9c   : > { %p4489_p0 = por %p4488_p13, %p4487_p11 }
  0x9d   : > { %p4485_p12 = pneg %p4484_p7 }
  0x9e   : > { %p4491_p6 = por %p4490_p3, %p4489_p0 }
  0xa0   : > { %p4492_p8 = pnand %p4491_p6, %p4485_p12 }
  0xa2   : > { %4495 = shalt.err (!%p4492_p8)
}
  0xa3   : > { %s4496_s1 = scalar_lea.vmem %s4954_s15, 8192  ;;  %s4721_s24 = smov [#allocation11]  }
  0xa4   : > { %p4497_p2 = scmp.ne.s32.totalorder %s4954_s15, %s4496_s1  ;;  %s4501_s13 = sshll.u32 %s4721_s24, 4  ;;  %s4502_s13 = int_to_ptr.vmem [resolvable:$false] %s4501_s13 }
  0xa5   : > { %s4503_s7 = scalar_lea.vmem %s4502_s13, 16384  ;;  %p4504_p1 = scmp.lt.s32.totalorder %s4954_s15, %s4502_s13 }
  0xa6   : > { %p4499_p9 = pnand %p4497_p2, %p6003_p5  ;;  %p4505_p4 = scmp.lt.s32.totalorder %s4503_s7, %s4496_s1 }
  0xa8   : > { %p4500_p10 = pneg %p4499_p9  ;;  %p4506_p7 = por %p4505_p4, %p4504_p1 }
  0xaa   : > { %p4507_p11 = pnand %p4506_p7, %p4500_p10 }
  0xac   : > { %4510 = shalt.err (!%p4507_p11)
}
  0xad   : > { %p6004_p12 = scmp.ne.s32.totalorder %s5993_s29, 0  ;;  %s6005_s9 = scalar_lea.sflag [#allocation10], %s4861_s11 }
  0xae   : > { %s3324_s25 = sshll.u32 %s4711_s16, 7  ;;  %s413_s30 = scalar_lea.vmem [#allocation14], %s3323_s18 }
  0xaf   : > { %4170 = dma.hbm_to_vmem [thread:$0]  (!%p6004_p12), %s4950_s21, 8192, %s4954_s15, %s6005_s9, %s4717_s20, %s4717_s20, %s4718_s26  }
  0xb0   : > { %s5048_s8 = scalar_lea.hbm %s5936_s4, %s3324_s25  ;;  %s420_s10 = sshll.u32 %s413_s30, 4  ;;  %s421_s10 = int_to_ptr.vmem [resolvable:$true] %s420_s10 }
  0xb1   : > { %s4511_s12 = scalar_lea.hbm %s5048_s8, 128  ;;  %s4516_s26 = scalar_lea.hbm %s5936_s4, 384 }
  0xb2   : > { %p4512_p13 = scmp.ne.s32.totalorder %s5048_s8, %s4511_s12  ;;  %p4517_p6 = scmp.lt.u32.totalorder %s5048_s8, %s5936_s4 }
  0xb3   : > { %p4518_p8 = scmp.lt.u32.totalorder %s4516_s26, %s4511_s12  ;;  %p4520_p9 = scmp.lt.u32.totalorder %s4511_s12, %s5048_s8 }
  0xb4   : > { %p4514_p0 = pnand %p4512_p13, %p6003_p5 }
  0xb5   : > { %p4519_p2 = por %p4518_p8, %p4517_p6 }
  0xb6   : > { %p4515_p3 = pneg %p4514_p0 }
  0xb7   : > { %p4521_p10 = por %p4520_p9, %p4519_p2 }
  0xb9   : > { %p4522_p1 = pnand %p4521_p10, %p4515_p3 }
  0xbb   : > { %4525 = shalt.err (!%p4522_p1)
}
  0xbc   : > { %s4526_s24 = scalar_lea.vmem %s421_s10, 128  ;;  %s4722_s13 = smov [#allocation14]  }
  0xbd   : > { %p4527_p4 = scmp.ne.s32.totalorder %s421_s10, %s4526_s24  ;;  %s4531_s7 = sshll.u32 %s4722_s13, 4  ;;  %s4532_s7 = int_to_ptr.vmem [resolvable:$false] %s4531_s7 }
  0xbe   : > { %s4533_s9 = scalar_lea.vmem %s4532_s7, 256  ;;  %p4534_p13 = scmp.lt.s32.totalorder %s421_s10, %s4532_s7 }
  0xbf   : > { %p4529_p7 = pnand %p4527_p4, %p6003_p5  ;;  %p4535_p0 = scmp.lt.s32.totalorder %s4533_s9, %s4526_s24 }
  0xc1   : > { %p4530_p11 = pneg %p4529_p7  ;;  %p4536_p12 = por %p4535_p0, %p4534_p13 }
  0xc3   : > { %p4537_p6 = pnand %p4536_p12, %p4530_p11 }
  0xc5   : > { %4540 = shalt.err (!%p4537_p6)
}
  0xc6   : > { %p6006_p8 = scmp.ne.s32.totalorder %s5993_s29, 0  ;;  %s5076_s30 = scalar_lea.hbm %s5937_s5, %s3324_s25 }
  0xc7   : > { %s431_s12 = scalar_lea.vmem [#allocation15], %s3323_s18  ;;  %s428_s20 = scalar_lea.sflag [#allocation16], %s4861_s11 }
  0xc8   : > { %4176 = dma.hbm_to_vmem [thread:$0]  (!%p6006_p8), %s5048_s8, 128, %s421_s10, %s391_s6  }
  0xc9   : > { %s438_s15 = sshll.u32 %s431_s12, 4  ;;  %s4541_s26 = scalar_lea.hbm %s5076_s30, 128  ;;  %s439_s15 = int_to_ptr.vmem [resolvable:$true] %s438_s15 }
  0xca   : > { %p4542_p12 = scmp.ne.s32.totalorder %s5076_s30, %s4541_s26  ;;  %s4546_s10 = scalar_lea.hbm %s5937_s5, 384 }
  0xcb   : > { %p4547_p9 = scmp.lt.u32.totalorder %s5076_s30, %s5937_s5  ;;  %p4548_p10 = scmp.lt.u32.totalorder %s4546_s10, %s4541_s26 }
  0xcc   : > { %p4544_p3 = pnand %p4542_p12, %p6003_p5  ;;  %p4550_p4 = scmp.lt.u32.totalorder %s4541_s26, %s5076_s30 }
  0xcd   : > { %p4549_p1 = por %p4548_p10, %p4547_p9 }
  0xce   : > { %p4545_p2 = pneg %p4544_p3 }
  0xcf   : > { %p4551_p7 = por %p4550_p4, %p4549_p1 }
  0xd1   : > { %p4552_p11 = pnand %p4551_p7, %p4545_p2 }
  0xd3   : > { %4555 = shalt.err (!%p4552_p11)
}
  0xd4   : > { %s4556_s11 = scalar_lea.vmem %s439_s15, 128  ;;  %s4723_s19 = smov [#allocation15]  }
  0xd5   : > { %p4557_p13 = scmp.ne.s32.totalorder %s439_s15, %s4556_s11  ;;  %s4561_s18 = sshll.u32 %s4723_s19, 4  ;;  %s4562_s18 = int_to_ptr.vmem [resolvable:$false] %s4561_s18 }
  0xd6   : > { %s4563_s1 = scalar_lea.vmem %s4562_s18, 256  ;;  %p4564_p12 = scmp.lt.s32.totalorder %s439_s15, %s4562_s18 }
  0xd7   : > { %p4559_p0 = pnand %p4557_p13, %p6003_p5  ;;  %p4565_p3 = scmp.lt.s32.totalorder %s4563_s1, %s4556_s11 }
  0xd9   : > { %p4560_p6 = pneg %p4559_p0  ;;  %p4566_p8 = por %p4565_p3, %p4564_p12 }
  0xdb   : > { %p4567_p9 = pnand %p4566_p8, %p4560_p6 }
  0xdd   : > { %4570 = shalt.err (!%p4567_p9)
}
  0xde   : > { %p6007_p10 = scmp.ne.s32.totalorder %s5993_s29, 0  ;;  %p6008_p2 = scmp.ne.s32.totalorder %s5987_s27, 0 }
  0xdf   : > { %p6009_p1 = scmp.eq.s32.totalorder (!%p6008_p2), %s4804_s17, 0 }
  0xe0   : > { %4179 = dma.hbm_to_vmem [thread:$0]  (!%p6007_p10), %s5076_s30, 128, %s439_s15, %s428_s20  }
  0xe1   : > { %447 = sbr.rel (%p6008_p2) target bundleno = 2703 (0xa8f), region = 52 }
  0xe8   : > { %4670 = dma.done.wait (%p6009_p1), [#allocation7], 1024   ;;  %p6010_p5 = pmov %p6009_p1 }
  0xe9   : > { %s6011_s23 = sld [smem:[#allocation32_spill]]  ;;  %s5105_s24 = sand.u32 1, %s4804_s17  }
  0xea   : > { %4672 = vsyncadd (%p6010_p5), [#allocation7], 4294966272  ;;  %s455_s13 = sand.u32 1, %s4703_s14   ;;  %s454_s29 = scalar_lea.sflag [#allocation10], %s5105_s24 }
  0xeb   : > { %s3329_s7 = sshll.u32 %s455_s13, 9 }
  0xec   : > { %s5109_s9 = scalar_lea.vmem [#allocation9], %s3329_s7 }
  0xef   : > { %p6012_p8 = scmp.ne.s32.totalorder %s6011_s23, 0 }
  0xf1   : > { %4674 = dma.done.wait (%p6012_p8), %s454_s29, 16384  }
  0xf2   : > { %4676 = vsyncadd (%p6012_p8), %s454_s29, 4294950912  ;;  %s3331_s27 = sshll.u32 %s455_s13, 2  ;;  %s5115_s22 = scalar_lea.vmem [#allocation11], %s3329_s7 }
  0xf3   : > { %s472_s28 = scalar_lea.sflag [#allocation13], %s5105_s24  ;;  %s5118_s30 = scalar_lea.vmem [#allocation12], %s3331_s27 }
  0xf4   : > { %4678 = dma.done.wait (%p6012_p8), %s472_s28, 192  }
  0xf5   : > { %4680 = vsyncadd (%p6012_p8), %s472_s28, 4294967104  ;;  %s5124_s12 = sshll.u32 %s455_s13, 3  ;;  %s490_s20 = scalar_lea.sflag [#allocation16], %s5105_s24 }
  0xf6   : > { %s484_s15 = scalar_lea.vmem [#allocation14], %s5124_s12  ;;  %s493_s26 = scalar_lea.vmem [#allocation15], %s5124_s12 }
  0xf7   : > { %4682 = dma.done.wait (%p6012_p8), %s490_s20, 128  }
  0xf8   : > { %4684 = vsyncadd (%p6012_p8), %s490_s20, 4294967168  ;;  %p6013_p4 = pmov %p6009_p1 }
  0xf9   : > { %p6014_p7 = pmov %p6009_p1 }
  0xfa   : > { %4686 = dma.done.wait (%p6013_p4), [#allocation16], 2048  }
  0xfb   : > { %4688 = vsyncadd (%p6014_p7), [#allocation16], 4294965248  ;;  %s551_s6 = scalar_lea.vmem [#allocation19], %s5124_s12  ;;  %s558_s8 = scalar_lea.vmem [#allocation21], %s5124_s12 }
  0xfc   : > { %p6015_p11 = scmp.ne.s32.totalorder %s4804_s17, 0 }
  0xfd   : > { %v563_v0 = vld [vmem:[#allocation6] sm:$0xff] (!%p6015_p11)  ;;  %v564_v1 = vld [vmem:[#allocation6 + $0x8] sm:$0xff] (!%p6015_p11)  ;;  %v565_v2 = vld [vmem:[#allocation6 + $0x10] sm:$0xff] (!%p6015_p11) }
  0xfe   : > { %562 = sbr.rel (%p6015_p11) target bundleno = 261 (0x105), region = 84  ;;  %571 = vst [vmem:[#allocation2] sm:$0xff] (!%p6015_p11), %v563_v0  ;;  %572 = vst [vmem:[#allocation2 + $0x8] sm:$0xff] (!%p6015_p11), %v564_v1  ;;  %v566_v3 = vld [vmem:[#allocation6 + $0x18] sm:$0xff] (!%p6015_p11)  ;;  %v567_v4 = vld [vmem:[#allocation6 + $0x20] sm:$0xff] (!%p6015_p11) }
  0xff   : > { %573 = vst [vmem:[#allocation2 + $0x10] sm:$0xff] (!%p6015_p11), %v565_v2  ;;  %v568_v5 = vld [vmem:[#allocation6 + $0x28] sm:$0xff] (!%p6015_p11)  ;;  %574 = vst [vmem:[#allocation2 + $0x18] sm:$0xff] (!%p6015_p11), %v566_v3  ;;  %v569_v6 = vld [vmem:[#allocation6 + $0x30] sm:$0xff] (!%p6015_p11) }
 0x100   : > { %575 = vst [vmem:[#allocation2 + $0x20] sm:$0xff] (!%p6015_p11), %v567_v4  ;;  %576 = vst [vmem:[#allocation2 + $0x28] sm:$0xff] (!%p6015_p11), %v568_v5  ;;  %v570_v7 = vld [vmem:[#allocation6 + $0x38] sm:$0xff] (!%p6015_p11) }
 0x101   : > { %577 = vst [vmem:[#allocation2 + $0x30] sm:$0xff] (!%p6015_p11), %v569_v6  ;;  %578 = vst [vmem:[#allocation2 + $0x38] sm:$0xff] (!%p6015_p11), %v570_v7 }
 0x105 PF: > { %v588_v8 = vld [vmem:[%s5109_s9 + $0x8] sm:$0xff]  ;;  %v590_v10 = vld [vmem:[%s5109_s9 + $0x18] sm:$0xff]  ;;  %v587_v13 = vld [vmem:[%s5109_s9] sm:$0xff]  ;;  %v4724_v15 = vmov 0.0   ;;  %p3362_p13 = scmp.ne.s32.totalorder %s4804_s17, 2 }
 0x106   : > { %v592_v9 = vld [vmem:[%s5109_s9 + $0x28] sm:$0xff]  ;;  %v594_v12 = vld [vmem:[%s5109_s9 + $0x38] sm:$0xff]  ;;  %v591_v14 = vld [vmem:[%s5109_s9 + $0x20] sm:$0xff]  ;;  %737 = vmatprep.mubr.f32.mxu0 %v4724_v15  ;;  %850 = vmatprep.mubr.f32.mxu1 %v4724_v15  ;;  %s6016_s21 = sld [smem:[#allocation37_spill]] (!%p3362_p13) }
 0x107   : > { %v3443_v11 = vpack.c.bf16 %v592_v9, %v588_v8  ;;  %v3475_v16 = vpack.c.bf16 %v594_v12, %v590_v10  ;;  %v3445_v17 = vpack.c.bf16 %v591_v14, %v587_v13  ;;  %v589_v18 = vld [vmem:[%s5109_s9 + $0x10] sm:$0xff]  ;;  %v596_v20 = vld [vmem:[%s5109_s9 + $0x48] sm:$0xff]  ;;  %v598_v23 = vld [vmem:[%s5109_s9 + $0x58] sm:$0xff] }
 0x108   : > { %v593_v19 = vld [vmem:[%s5109_s9 + $0x30] sm:$0xff]  ;;  %v600_v22 = vld [vmem:[%s5109_s9 + $0x68] sm:$0xff]  ;;  %v602_v24 = vld [vmem:[%s5109_s9 + $0x78] sm:$0xff] }
 0x109   : > { %3444 = vmatprep.subr.bf16.mxu0 %v3443_v11  ;;  %v3477_v21 = vpack.c.bf16 %v593_v19, %v589_v18  ;;  %3476 = vmatprep.subr.bf16.mxu1 %v3475_v16  ;;  %v3447_v25 = vpack.c.bf16 %v600_v22, %v596_v20  ;;  %v3479_v26 = vpack.c.bf16 %v602_v24, %v598_v23  ;;  %v595_v27 = vld [vmem:[%s5109_s9 + $0x40] sm:$0xff]  ;;  %v597_v29 = vld [vmem:[%s5109_s9 + $0x50] sm:$0xff]  ;;  %v604_v32 = vld [vmem:[%s5109_s9 + $0x88] sm:$0xff] }
 0x10a   : > { %3446 = vmatpush1.bf16.msra.mxu0 %v3445_v17  ;;  %v599_v28 = vld [vmem:[%s5109_s9 + $0x60] sm:$0xff]  ;;  %v601_v31 = vld [vmem:[%s5109_s9 + $0x70] sm:$0xff]  ;;  %v608_v33 = vld [vmem:[%s5109_s9 + $0xa8] sm:$0xff] }
 0x10b   : > { %3478 = vmatpush1.bf16.msra.mxu1 %v3477_v21  ;;  %v3449_v30 = vpack.c.bf16 %v599_v28, %v595_v27  ;;  %3448 = vmatprep.subr.bf16.mxu0 %v3447_v25  ;;  %v3481_v34 = vpack.c.bf16 %v601_v31, %v597_v29  ;;  %v3451_v35 = vpack.c.bf16 %v608_v33, %v604_v32  ;;  %v606_v36 = vld [vmem:[%s5109_s9 + $0x98] sm:$0xff]  ;;  %v603_v38 = vld [vmem:[%s5109_s9 + $0x80] sm:$0xff]  ;;  %v605_v41 = vld [vmem:[%s5109_s9 + $0x90] sm:$0xff] }
 0x10c   : > { %3480 = vmatprep.subr.bf16.mxu1 %v3479_v26  ;;  %v610_v37 = vld [vmem:[%s5109_s9 + $0xb8] sm:$0xff]  ;;  %v607_v40 = vld [vmem:[%s5109_s9 + $0xa0] sm:$0xff]  ;;  %v609_v42 = vld [vmem:[%s5109_s9 + $0xb0] sm:$0xff] }
 0x10d   : > { %v3483_v39 = vpack.c.bf16 %v610_v37, %v606_v36  ;;  %v3453_v43 = vpack.c.bf16 %v607_v40, %v603_v38  ;;  %v612_v44 = vld [vmem:[%s5109_s9 + $0xc8] sm:$0xff]  ;;  %v614_v46 = vld [vmem:[%s5109_s9 + $0xd8] sm:$0xff]  ;;  %v3485_v47 = vpack.c.bf16 %v609_v42, %v605_v41  ;;  %v611_v50 = vld [vmem:[%s5109_s9 + $0xc0] sm:$0xff] }
 0x10e   : > { %3450 = vmatpush1.bf16.msra.mxu0 %v3449_v30  ;;  %v616_v45 = vld [vmem:[%s5109_s9 + $0xe8] sm:$0xff]  ;;  %v618_v49 = vld [vmem:[%s5109_s9 + $0xf8] sm:$0xff]  ;;  %v615_v51 = vld [vmem:[%s5109_s9 + $0xe0] sm:$0xff] }
 0x10f   : > { %3482 = vmatpush1.bf16.msra.mxu1 %v3481_v34  ;;  %3452 = vmatprep.subr.bf16.mxu0 %v3451_v35  ;;  %v3455_v48 = vpack.c.bf16 %v616_v45, %v612_v44  ;;  %v3487_v52 = vpack.c.bf16 %v618_v49, %v614_v46  ;;  %v613_v53 = vld [vmem:[%s5109_s9 + $0xd0] sm:$0xff]  ;;  %v620_v55 = vld [vmem:[%s5109_s9 + $0x108] sm:$0xff]  ;;  %v622_v57 = vld [vmem:[%s5109_s9 + $0x118] sm:$0xff]  ;;  %v3457_v59 = vpack.c.bf16 %v615_v51, %v611_v50 }
 0x110   : > { %3484 = vmatprep.subr.bf16.mxu1 %v3483_v39  ;;  %v617_v54 = vld [vmem:[%s5109_s9 + $0xf0] sm:$0xff]  ;;  %v624_v56 = vld [vmem:[%s5109_s9 + $0x128] sm:$0xff]  ;;  %v626_v58 = vld [vmem:[%s5109_s9 + $0x138] sm:$0xff] }
 0x111   : > { %v3489_v60 = vpack.c.bf16 %v617_v54, %v613_v53  ;;  %v3459_v61 = vpack.c.bf16 %v624_v56, %v620_v55  ;;  %v619_v62 = vld [vmem:[%s5109_s9 + $0x100] sm:$0xff]  ;;  %v621_v0 = vld [vmem:[%s5109_s9 + $0x110] sm:$0xff]  ;;  %v3491_v1 = vpack.c.bf16 %v626_v58, %v622_v57  ;;  %v628_v3 = vld [vmem:[%s5109_s9 + $0x148] sm:$0xff] }
 0x112   : > { %3454 = vmatpush1.bf16.msra.mxu0 %v3453_v43  ;;  %v623_v63 = vld [vmem:[%s5109_s9 + $0x120] sm:$0xff]  ;;  %v625_v2 = vld [vmem:[%s5109_s9 + $0x130] sm:$0xff]  ;;  %v632_v4 = vld [vmem:[%s5109_s9 + $0x168] sm:$0xff] }
 0x113   : > { %3486 = vmatpush1.bf16.msra.mxu1 %v3485_v47  ;;  %3456 = vmatprep.subr.bf16.mxu0 %v3455_v48  ;;  %v630_v5 = vld [vmem:[%s5109_s9 + $0x158] sm:$0xff]  ;;  %v3461_v7 = vpack.c.bf16 %v623_v63, %v619_v62  ;;  %v3493_v8 = vpack.c.bf16 %v625_v2, %v621_v0  ;;  %v3463_v9 = vpack.c.bf16 %v632_v4, %v628_v3  ;;  %v627_v10 = vld [vmem:[%s5109_s9 + $0x140] sm:$0xff]  ;;  %v629_v12 = vld [vmem:[%s5109_s9 + $0x150] sm:$0xff] }
 0x114   : > { %3488 = vmatprep.subr.bf16.mxu1 %v3487_v52  ;;  %v634_v6 = vld [vmem:[%s5109_s9 + $0x178] sm:$0xff]  ;;  %v631_v11 = vld [vmem:[%s5109_s9 + $0x160] sm:$0xff]  ;;  %v633_v14 = vld [vmem:[%s5109_s9 + $0x170] sm:$0xff] }
 0x115   : > { %v3495_v13 = vpack.c.bf16 %v634_v6, %v630_v5  ;;  %v636_v16 = vld [vmem:[%s5109_s9 + $0x188] sm:$0xff]  ;;  %v638_v18 = vld [vmem:[%s5109_s9 + $0x198] sm:$0xff]  ;;  %v3465_v20 = vpack.c.bf16 %v631_v11, %v627_v10  ;;  %v3497_v21 = vpack.c.bf16 %v633_v14, %v629_v12  ;;  %v635_v23 = vld [vmem:[%s5109_s9 + $0x180] sm:$0xff] }
 0x116   : > { %3458 = vmatpush1.bf16.msra.mxu0 %v3457_v59  ;;  %v640_v17 = vld [vmem:[%s5109_s9 + $0x1a8] sm:$0xff]  ;;  %v642_v19 = vld [vmem:[%s5109_s9 + $0x1b8] sm:$0xff]  ;;  %v639_v24 = vld [vmem:[%s5109_s9 + $0x1a0] sm:$0xff] }
 0x117   : > { %3490 = vmatpush1.bf16.msra.mxu1 %v3489_v60  ;;  %3460 = vmatprep.subr.bf16.mxu0 %v3459_v61  ;;  %v3467_v22 = vpack.c.bf16 %v640_v17, %v636_v16  ;;  %v637_v25 = vld [vmem:[%s5109_s9 + $0x190] sm:$0xff]  ;;  %v3499_v26 = vpack.c.bf16 %v642_v19, %v638_v18  ;;  %v644_v28 = vld [vmem:[%s5109_s9 + $0x1c8] sm:$0xff]  ;;  %v646_v30 = vld [vmem:[%s5109_s9 + $0x1d8] sm:$0xff]  ;;  %v3469_v32 = vpack.c.bf16 %v639_v24, %v635_v23 }
 0x118   : > { %3492 = vmatprep.subr.bf16.mxu1 %v3491_v1  ;;  %v641_v27 = vld [vmem:[%s5109_s9 + $0x1b0] sm:$0xff]  ;;  %v648_v29 = vld [vmem:[%s5109_s9 + $0x1e8] sm:$0xff]  ;;  %v650_v31 = vld [vmem:[%s5109_s9 + $0x1f8] sm:$0xff] }
 0x119   : > { %v3501_v33 = vpack.c.bf16 %v641_v27, %v637_v25  ;;  %v3471_v34 = vpack.c.bf16 %v648_v29, %v644_v28  ;;  %v643_v35 = vld [vmem:[%s5109_s9 + $0x1c0] sm:$0xff]  ;;  %v645_v37 = vld [vmem:[%s5109_s9 + $0x1d0] sm:$0xff]  ;;  %v3503_v38 = vpack.c.bf16 %v650_v31, %v646_v30  ;;  %v941_v40 = vld [vmem:[%s5115_s22 + $0x8] sm:$0xff] }
 0x11a   : > { %3462 = vmatpush1.bf16.msra.mxu0 %v3461_v7  ;;  %v647_v36 = vld [vmem:[%s5109_s9 + $0x1e0] sm:$0xff]  ;;  %v649_v39 = vld [vmem:[%s5109_s9 + $0x1f0] sm:$0xff]  ;;  %v945_v41 = vld [vmem:[%s5115_s22 + $0x28] sm:$0xff] }
 0x11b   : > { %3494 = vmatpush1.bf16.msra.mxu1 %v3493_v8  ;;  %3464 = vmatprep.subr.bf16.mxu0 %v3463_v9  ;;  %v943_v42 = vld [vmem:[%s5115_s22 + $0x18] sm:$0xff]  ;;  %v3473_v44 = vpack.c.bf16 %v647_v36, %v643_v35  ;;  %v3505_v45 = vpack.c.bf16 %v649_v39, %v645_v37  ;;  %v5211_v46 = vpack.c.bf16 %v945_v41, %v941_v40  ;;  %v940_v47 = vld [vmem:[%s5115_s22] sm:$0xff]  ;;  %v942_v50 = vld [vmem:[%s5115_s22 + $0x10] sm:$0xff] }
 0x11c   : > { %3496 = vmatprep.subr.bf16.mxu1 %v3495_v13  ;;  %v947_v43 = vld [vmem:[%s5115_s22 + $0x38] sm:$0xff]  ;;  %v944_v48 = vld [vmem:[%s5115_s22 + $0x20] sm:$0xff]  ;;  %v946_v51 = vld [vmem:[%s5115_s22 + $0x30] sm:$0xff] }
 0x11d   : > { %v5215_v49 = vpack.c.bf16 %v947_v43, %v943_v42  ;;  %v949_v52 = vld [vmem:[%s5115_s22 + $0x48] sm:$0xff]  ;;  %v579_v54 = vld [vmem:[#allocation2] sm:$0xff]  ;;  %v5221_v55 = vpack.c.bf16 %v944_v48, %v940_v47  ;;  %v951_v56 = vld [vmem:[%s5115_s22 + $0x58] sm:$0xff]  ;;  %v5226_v58 = vpack.c.bf16 %v946_v51, %v942_v50 }
 0x11e   : > { %3466 = vmatpush1.bf16.msra.mxu0 %v3465_v20  ;;  %v953_v53 = vld [vmem:[%s5115_s22 + $0x68] sm:$0xff]  ;;  %v955_v57 = vld [vmem:[%s5115_s22 + $0x78] sm:$0xff]  ;;  %v948_v59 = vld [vmem:[%s5115_s22 + $0x40] sm:$0xff] }
 0x11f   : > { %3498 = vmatpush1.bf16.msra.mxu1 %v3497_v21  ;;  %3468 = vmatprep.subr.bf16.mxu0 %v3467_v22  ;;  %v952_v60 = vld [vmem:[%s5115_s22 + $0x60] sm:$0xff]  ;;  %v5231_v61 = vpack.c.bf16 %v953_v53, %v949_v52  ;;  %v950_v62 = vld [vmem:[%s5115_s22 + $0x50] sm:$0xff]  ;;  %v5235_v0 = vpack.c.bf16 %v955_v57, %v951_v56  ;;  %v957_v1 = vld [vmem:[%s5115_s22 + $0x88] sm:$0xff] }
 0x120   : > { %3500 = vmatprep.subr.bf16.mxu1 %v3499_v26  ;;  %v954_v63 = vld [vmem:[%s5115_s22 + $0x70] sm:$0xff]  ;;  %v961_v2 = vld [vmem:[%s5115_s22 + $0xa8] sm:$0xff]  ;;  %v5240_v4 = vpack.c.bf16 %v952_v60, %v948_v59  ;;  %v959_v5 = vld [vmem:[%s5115_s22 + $0x98] sm:$0xff] }
 0x121   : > { %v580_v3 = vld [vmem:[#allocation2 + $0x8] sm:$0xff]  ;;  %v963_v6 = vld [vmem:[%s5115_s22 + $0xb8] sm:$0xff]  ;;  %v5246_v7 = vpack.c.bf16 %v954_v63, %v950_v62  ;;  %v956_v8 = vld [vmem:[%s5115_s22 + $0x80] sm:$0xff]  ;;  %v5252_v10 = vpack.c.bf16 %v961_v2, %v957_v1 }
 0x122   : > { %3470 = vmatpush1.bf16.msra.mxu0 %v3469_v32  ;;  %v960_v9 = vld [vmem:[%s5115_s22 + $0xa0] sm:$0xff]  ;;  %v958_v11 = vld [vmem:[%s5115_s22 + $0x90] sm:$0xff]  ;;  %v5257_v13 = vpack.c.bf16 %v963_v6, %v959_v5  ;;  %v965_v14 = vld [vmem:[%s5115_s22 + $0xc8] sm:$0xff] }
 0x123   : > { %3502 = vmatpush1.bf16.msra.mxu1 %v3501_v33  ;;  %3472 = vmatprep.subr.bf16.mxu0 %v3471_v34  ;;  %v962_v12 = vld [vmem:[%s5115_s22 + $0xb0] sm:$0xff]  ;;  %v969_v16 = vld [vmem:[%s5115_s22 + $0xe8] sm:$0xff]  ;;  %v5262_v18 = vpack.c.bf16 %v960_v9, %v956_v8  ;;  %v967_v19 = vld [vmem:[%s5115_s22 + $0xd8] sm:$0xff] }
 0x124   : > { %3504 = vmatprep.subr.bf16.mxu1 %v3503_v38  ;;  %v581_v17 = vld [vmem:[#allocation2 + $0x10] sm:$0xff]  ;;  %v971_v20 = vld [vmem:[%s5115_s22 + $0xf8] sm:$0xff]  ;;  %v5268_v21 = vpack.c.bf16 %v962_v12, %v958_v11  ;;  %v964_v22 = vld [vmem:[%s5115_s22 + $0xc0] sm:$0xff]  ;;  %v5274_v24 = vpack.c.bf16 %v969_v16, %v965_v14 }
 0x125   : > { %v968_v23 = vld [vmem:[%s5115_s22 + $0xe0] sm:$0xff]  ;;  %v966_v25 = vld [vmem:[%s5115_s22 + $0xd0] sm:$0xff]  ;;  %v5279_v27 = vpack.c.bf16 %v971_v20, %v967_v19  ;;  %v973_v28 = vld [vmem:[%s5115_s22 + $0x108] sm:$0xff] }
 0x126   : > { %3474 = vmatpush1.bf16.msra.mxu0 %v3473_v44  ;;  %v970_v26 = vld [vmem:[%s5115_s22 + $0xf0] sm:$0xff]  ;;  %v977_v29 = vld [vmem:[%s5115_s22 + $0x128] sm:$0xff]  ;;  %v582_v30 = vld [vmem:[#allocation2 + $0x18] sm:$0xff]  ;;  %v5284_v31 = vpack.c.bf16 %v968_v23, %v964_v22 }
 0x127   : > { %3506 = vmatpush1.bf16.msra.mxu1 %v3505_v45  ;;  %3508 = vmatprep.subr.bf16.mxu0 %v5211_v46  ;;  %v975_v32 = vld [vmem:[%s5115_s22 + $0x118] sm:$0xff]  ;;  %v5290_v34 = vpack.c.bf16 %v970_v26, %v966_v25  ;;  %v972_v35 = vld [vmem:[%s5115_s22 + $0x100] sm:$0xff]  ;;  %v5296_v37 = vpack.c.bf16 %v977_v29, %v973_v28  ;;  %v974_v38 = vld [vmem:[%s5115_s22 + $0x110] sm:$0xff] }
 0x128   : > { %3540 = vmatprep.subr.bf16.mxu1 %v5215_v49  ;;  %v979_v33 = vld [vmem:[%s5115_s22 + $0x138] sm:$0xff]  ;;  %v976_v36 = vld [vmem:[%s5115_s22 + $0x120] sm:$0xff]  ;;  %v978_v39 = vld [vmem:[%s5115_s22 + $0x130] sm:$0xff] }
 0x129   : > { %738 = vmatmul.mubr.f32.vlgmr.msra.gmra.mrb[0].mxu0 %v579_v54  ;;  %v5301_v40 = vpack.c.bf16 %v979_v33, %v975_v32  ;;  %v981_v41 = vld [vmem:[%s5115_s22 + $0x148] sm:$0xff]  ;;  %v583_v43 = vld [vmem:[#allocation2 + $0x20] sm:$0xff]  ;;  %v5306_v44 = vpack.c.bf16 %v976_v36, %v972_v35  ;;  %v983_v45 = vld [vmem:[%s5115_s22 + $0x158] sm:$0xff]  ;;  %v5312_v48 = vpack.c.bf16 %v978_v39, %v974_v38  ;;  %v653_v38 = vlaneseq }
 0x12a   : > { %851 = vmatmul.mubr.f32.vlgmr.msra.gmra.mrb[0].mxu1 %v579_v54  ;;  %3510 = vmatpush1.bf16.msra.mxu0 %v5221_v55  ;;  %v985_v42 = vld [vmem:[%s5115_s22 + $0x168] sm:$0xff]  ;;  %v987_v47 = vld [vmem:[%s5115_s22 + $0x178] sm:$0xff]  ;;  %v980_v50 = vld [vmem:[%s5115_s22 + $0x140] sm:$0xff] }
 0x12b   : > { %3542 = vmatpush1.bf16.msra.mxu1 %v5226_v58  ;;  %743 = vmatprep.mubr.f32.mxu0 %v4724_v15  ;;  %v984_v51 = vld [vmem:[%s5115_s22 + $0x160] sm:$0xff]  ;;  %v5318_v52 = vpack.c.bf16 %v985_v42, %v981_v41  ;;  %v982_v53 = vld [vmem:[%s5115_s22 + $0x150] sm:$0xff]  ;;  %v5323_v56 = vpack.c.bf16 %v987_v47, %v983_v45  ;;  %v989_v57 = vld [vmem:[%s5115_s22 + $0x188] sm:$0xff]  ;;  %v654_v39 = vshrl.u32 %v653_v38, 7 }
 0x12c   : > { %856 = vmatprep.mubr.f32.mxu1 %v4724_v15  ;;  %3512 = vmatprep.subr.bf16.mxu0 %v5231_v61  ;;  %v986_v54 = vld [vmem:[%s5115_s22 + $0x170] sm:$0xff]  ;;  %v993_v59 = vld [vmem:[%s5115_s22 + $0x1a8] sm:$0xff]  ;;  %v5328_v62 = vpack.c.bf16 %v984_v51, %v980_v50  ;;  %v991_v63 = vld [vmem:[%s5115_s22 + $0x198] sm:$0xff] }
 0x12d   : > { %744 = vmatmul.mubr.f32.gmra.mrb[2].mxu0 %v580_v3  ;;  %3544 = vmatprep.subr.bf16.mxu1 %v5235_v0  ;;  %v584_v60 = vld [vmem:[#allocation2 + $0x28] sm:$0xff]  ;;  %v995_v1 = vld [vmem:[%s5115_s22 + $0x1b8] sm:$0xff]  ;;  %v5334_v2 = vpack.c.bf16 %v986_v54, %v982_v53  ;;  %v992_v5 = vld [vmem:[%s5115_s22 + $0x1a0] sm:$0xff]  ;;  %v5340_v6 = vpack.c.bf16 %v993_v59, %v989_v57  ;;  %v655_v41 = vsub.s32 0, %v654_v39  ;;  %v667_v51 = vsub.s32 3, %v654_v39 }
 0x12e   : > { %857 = vmatmul.mubr.f32.gmra.mrb[2].mxu1 %v580_v3  ;;  %3514 = vmatpush1.bf16.msra.mxu0 %v5240_v4  ;;  %v988_v3 = vld [vmem:[%s5115_s22 + $0x180] sm:$0xff]  ;;  %v990_v8 = vld [vmem:[%s5115_s22 + $0x190] sm:$0xff]  ;;  %v5345_v11 = vpack.c.bf16 %v995_v1, %v991_v63  ;;  %v997_v12 = vld [vmem:[%s5115_s22 + $0x1c8] sm:$0xff]  ;;  %v663_v1 = vsub.s32 2, %v654_v39 }
 0x12f   : > { %3546 = vmatpush1.bf16.msra.mxu1 %v5246_v7  ;;  %749 = vmatprep.mubr.f32.mxu0 %v4724_v15  ;;  %v994_v9 = vld [vmem:[%s5115_s22 + $0x1b0] sm:$0xff]  ;;  %v1001_v14 = vld [vmem:[%s5115_s22 + $0x1e8] sm:$0xff]  ;;  %v999_v19 = vld [vmem:[%s5115_s22 + $0x1d8] sm:$0xff] }
 0x130   : > { %862 = vmatprep.mubr.f32.mxu1 %v4724_v15  ;;  %3516 = vmatprep.subr.bf16.mxu0 %v5252_v10  ;;  %v585_v16 = vld [vmem:[#allocation2 + $0x30] sm:$0xff]  ;;  %v1003_v20 = vld [vmem:[%s5115_s22 + $0x1f8] sm:$0xff]  ;;  %v5356_v22 = vpack.c.bf16 %v994_v9, %v990_v8  ;;  %v996_v23 = vld [vmem:[%s5115_s22 + $0x1c0] sm:$0xff]  ;;  %v5362_v26 = vpack.c.bf16 %v1001_v14, %v997_v12 }
 0x131   : > { %750 = vmatmul.mubr.f32.gmra.mrb[4].mxu0 %v581_v17  ;;  %3548 = vmatprep.subr.bf16.mxu1 %v5257_v13  ;;  %v1000_v25 = vld [vmem:[%s5115_s22 + $0x1e0] sm:$0xff]  ;;  %v998_v28 = vld [vmem:[%s5115_s22 + $0x1d0] sm:$0xff]  ;;  %v586_v32 = vld [vmem:[#allocation2 + $0x38] sm:$0xff] }
 0x132   : > { %863 = vmatmul.mubr.f32.gmra.mrb[4].mxu1 %v581_v17  ;;  %3518 = vmatpush1.bf16.msra.mxu0 %v5262_v18  ;;  %v5350_v17 = vpack.c.bf16 %v992_v5, %v988_v3  ;;  %v1002_v29 = vld [vmem:[%s5115_s22 + $0x1f0] sm:$0xff]  ;;  %v5370_v33 = vpack.c.bf16 %v1000_v25, %v996_v23  ;;  %v651_v42 = vld [vmem:[%s5118_s30] sm:$0xf] }
 0x133   : > { %3550 = vmatpush1.bf16.msra.mxu1 %v5268_v21  ;;  %755 = vmatprep.mubr.f32.mxu0 %v4724_v15  ;;  %v5374_v35 = vpack.c.bf16 %v1002_v29, %v998_v28  ;;  %v931_v36 = vld [vmem:[%s484_s15] sm:$0xff]  ;;  %v5422_v45 = vrot.slane %v651_v42, %v655_v41  ;;  %v5428_v63 = vrot.slane %v651_v42, %v667_v51  ;;  %v933_v25 = vld [vmem:[%s493_s26] sm:$0xff] }
 0x134   : > { %868 = vmatprep.mubr.f32.mxu1 %v4724_v15  ;;  %3520 = vmatprep.subr.bf16.mxu0 %v5274_v24  ;;  %v5431_v5 = vrot.slane %v651_v42, %v663_v1 }
 0x135   : > { %756 = vmatmul.mubr.f32.gmra.mrb[6].mxu0 %v582_v30  ;;  %3552 = vmatprep.subr.bf16.mxu1 %v5279_v27 }
 0x136   : > { %869 = vmatmul.mubr.f32.gmra.mrb[6].mxu1 %v582_v30  ;;  %3522 = vmatpush1.bf16.msra.mxu0 %v5284_v31  ;;  %v5367_v30 = vpack.c.bf16 %v1003_v20, %v999_v19 }
 0x137   : > { %3554 = vmatpush1.bf16.msra.mxu1 %v5290_v34  ;;  %761 = vmatprep.mubr.f32.mxu0 %v4724_v15 }
 0x138   : > { %874 = vmatprep.mubr.f32.mxu1 %v4724_v15  ;;  %3524 = vmatprep.subr.bf16.mxu0 %v5296_v37 }
 0x139   : > { %762 = vmatmul.mubr.f32.gmra.mrb[8].mxu0 %v583_v43  ;;  %3556 = vmatprep.subr.bf16.mxu1 %v5301_v40 }
 0x13a   : > { %875 = vmatmul.mubr.f32.gmra.mrb[8].mxu1 %v583_v43  ;;  %3526 = vmatpush1.bf16.msra.mxu0 %v5306_v44  ;;  %v659_v43 = vsub.s32 1, %v654_v39 }
 0x13b   : > { %3558 = vmatpush1.bf16.msra.mxu1 %v5312_v48  ;;  %767 = vmatprep.mubr.f32.mxu0 %v4724_v15 }
 0x13c   : > { %880 = vmatprep.mubr.f32.mxu1 %v4724_v15  ;;  %3528 = vmatprep.subr.bf16.mxu0 %v5318_v52  ;;  %v5424_v47 = vrot.slane %v651_v42, %v659_v43 }
 0x13d   : > { %768 = vmatmul.mubr.f32.gmra.mrb[10].mxu0 %v584_v60  ;;  %3560 = vmatprep.subr.bf16.mxu1 %v5323_v56 }
 0x13e   : > { %881 = vmatmul.mubr.f32.gmra.mrb[10].mxu1 %v584_v60  ;;  %3530 = vmatpush1.bf16.msra.mxu0 %v5328_v62 }
 0x13f   : > { %3562 = vmatpush1.bf16.msra.mxu1 %v5334_v2  ;;  %773 = vmatprep.mubr.f32.mxu0 %v4724_v15 }
 0x140   : > { %886 = vmatprep.mubr.f32.mxu1 %v4724_v15  ;;  %3532 = vmatprep.subr.bf16.mxu0 %v5340_v6 }
 0x141   : > { %774 = vmatmul.mubr.f32.gmra.mrb[12].mxu0 %v585_v16  ;;  %3564 = vmatprep.subr.bf16.mxu1 %v5345_v11 }
 0x142   : > { %887 = vmatmul.mubr.f32.gmra.mrb[12].mxu1 %v585_v16  ;;  %3534 = vmatpush1.bf16.msra.mxu0 %v5350_v17 }
 0x143   : > { %3566 = vmatpush1.bf16.msra.mxu1 %v5356_v22  ;;  %779 = vmatprep.mubr.f32.mxu0 %v4724_v15 }
 0x144   : > { %892 = vmatprep.mubr.f32.mxu1 %v4724_v15  ;;  %3536 = vmatprep.subr.bf16.mxu0 %v5362_v26 }
 0x145   : > { %780 = vmatmul.mubr.f32.gmra.mrb[14].mxu0 %v586_v32  ;;  %3568 = vmatprep.subr.bf16.mxu1 %v5367_v30 }
 0x146   : > { %893 = vmatmul.mubr.f32.gmra.mrb[14].mxu1 %v586_v32  ;;  %3538 = vmatpush1.bf16.msra.mxu0 %v5370_v33 }
 0x147   : > { %3570 = vmatpush1.bf16.msra.mxu1 %v5374_v35  ;;  %1068 = vmatprep.mubr.f32.mxu0 %v4724_v15 }
 0x148   : > { %1139 = vmatprep.mubr.f32.mxu1 %v4724_v15  ;;  %3572 = vmatprep.subr.bf16.mxu0 %v5211_v46 }
 0x149   : > { %1069 = vmatmul.mubr.f32.vlgmr.msra.gmra.mrb[0].mxu0 %v931_v36  ;;  %3604 = vmatprep.subr.bf16.mxu1 %v5215_v49 }
 0x14a   : > { %1140 = vmatmul.mubr.f32.vlgmr.msra.gmra.mrb[0].mxu1 %v931_v36  ;;  %3574 = vmatpush1.bf16.msra.mxu0 %v5221_v55 }
 0x14b   : > { %3606 = vmatpush1.bf16.msra.mxu1 %v5226_v58  ;;  %3576 = vmatprep.subr.bf16.mxu0 %v5231_v61 }
 0x14c   : > { %3608 = vmatprep.subr.bf16.mxu1 %v5235_v0  ;;  %1312 = vmatprep.mubr.f32.mxu0 %v4724_v15 }
 0x14d   : > { %1383 = vmatprep.mubr.f32.mxu1 %v4724_v15 }
 0x14e   : > { %3578 = vmatpush1.bf16.msra.mxu0 %v5240_v4 }
 0x14f   : > { %3610 = vmatpush1.bf16.msra.mxu1 %v5246_v7  ;;  %3580 = vmatprep.subr.bf16.mxu0 %v5252_v10 }
 0x150   : > { %3612 = vmatprep.subr.bf16.mxu1 %v5257_v13 }
 0x152   : > { %3582 = vmatpush1.bf16.msra.mxu0 %v5262_v18 }
 0x153   : > { %3614 = vmatpush1.bf16.msra.mxu1 %v5268_v21  ;;  %3584 = vmatprep.subr.bf16.mxu0 %v5274_v24 }
 0x154   : > { %3616 = vmatprep.subr.bf16.mxu1 %v5279_v27 }
 0x156   : > { %3586 = vmatpush1.bf16.msra.mxu0 %v5284_v31 }
 0x157   : > { %3618 = vmatpush1.bf16.msra.mxu1 %v5290_v34  ;;  %3588 = vmatprep.subr.bf16.mxu0 %v5296_v37 }
 0x158   : > { %3620 = vmatprep.subr.bf16.mxu1 %v5301_v40 }
 0x15a   : > { %3590 = vmatpush1.bf16.msra.mxu0 %v5306_v44 }
 0x15b   : > { %3622 = vmatpush1.bf16.msra.mxu1 %v5312_v48  ;;  %3592 = vmatprep.subr.bf16.mxu0 %v5318_v52 }
 0x15c   : > { %3624 = vmatprep.subr.bf16.mxu1 %v5323_v56 }
 0x15e   : > { %3594 = vmatpush1.bf16.msra.mxu0 %v5328_v62 }
 0x15f   : > { %3626 = vmatpush1.bf16.msra.mxu1 %v5334_v2  ;;  %3596 = vmatprep.subr.bf16.mxu0 %v5340_v6 }
 0x160   : > { %3628 = vmatprep.subr.bf16.mxu1 %v5345_v11 }
 0x162   : > { %3598 = vmatpush1.bf16.msra.mxu0 %v5350_v17 }
 0x163   : > { %3630 = vmatpush1.bf16.msra.mxu1 %v5356_v22  ;;  %3600 = vmatprep.subr.bf16.mxu0 %v5362_v26 }
 0x164   : > { %3632 = vmatprep.subr.bf16.mxu1 %v5367_v30 }
 0x166   : > { %3602 = vmatpush1.bf16.msra.mxu0 %v5370_v33 }
 0x167   : > { %3634 = vmatpush1.bf16.msra.mxu1 %v5374_v35  ;;  %3636 = vmatprep.subr.bf16.mxu0 %v5211_v46 }
 0x168   : > { %3668 = vmatprep.subr.bf16.mxu1 %v5215_v49 }
 0x21c   : > { %v1070_v50 = vpop.f32.mrb[0].mxu0 }
 0x21d   : > { %v4051_v53 = vadd.f32 %v1070_v50, %v5422_v45  ;;  %v1141_v54 = vpop.f32.mrb[0].mxu1  ;;  %v1072_v57 = vpop.f32.mrb[1].mxu0 }
 0x21e   : > { %v4052_v59 = vadd.f32 %v1072_v57, %v5424_v47  ;;  %v1143_v46 = vpop.f32.mrb[1].mxu1  ;;  %v4067_v9 = vadd.f32 %v1141_v54, %v5431_v5 }
 0x21f   : > { %v3338_v60 = vmul.f32 -1.442695, %v4051_v53  ;;  %v4068_v3 = vadd.f32 %v1143_v46, %v5428_v63 }
 0x220   : > { %v3339_v49 = vmul.f32 -1.442695, %v4052_v59 }
 0x221   : > { %4237 = vpow2.f32 %v3338_v60  ;;  %v3340_v8 = vmul.f32 -1.442695, %v4068_v3 }
 0x222   : > { %4239 = vpow2.f32 %v3339_v49 }
 0x223   : > { %4241 = vpow2.f32 %v3340_v8 }
 0x224   : > { %4243 = vtanh.f32 %v4067_v9 }
 0x22b   : > { %v4238_v12 = vpop.eup %4237 }
 0x22c   : > { %v4240_v14 = vpop.eup %4239  ;;  %v1153_v16 = vadd.f32 1.0, %v4238_v12 }
 0x22d   : > { %v1159_v19 = vadd.f32 1.0, %v4240_v14  ;;  %v4242_v20 = vpop.eup %4241 }
 0x22e   : > { %4245 = vrcp.f32 %v1153_v16  ;;  %v4244_v23 = vpop.eup %4243  ;;  %v1166_v36 = vadd.f32 1.0, %v4242_v20 }
 0x22f   : > { %4247 = vrcp.f32 %v1159_v19 }
 0x230   : > { %4249 = vrcp.f32 %v1166_v36 }
 0x238   : > { %v4246_v28 = vpop.eup %4245 }
 0x239   : > { %v4248_v29 = vpop.eup %4247  ;;  %v1171_v32 = vmul.f32 %v4246_v28, %v4244_v23  ;;  %v1675_v28 = vld [vmem:[%s5115_s22 + $0x8] sm:$0xff] }
 0x23a   : > { %v1170_v38 = vmul.f32 %v4248_v29, %v933_v25  ;;  %v4250_v41 = vpop.eup %4249  ;;  %v1679_v29 = vld [vmem:[%s5115_s22 + $0x28] sm:$0xff] }
 0x23b   : > { %v5484_v36 = vpack.c.bf16 %v1679_v29, %v1675_v28  ;;  %v1937_v28 = vld [vmem:[%s5115_s22 + $0x90] sm:$0xff] }
 0x23c   : > { %v5436_v39 = vadd.f32 %v1171_v32, %v1170_v38  ;;  %v1677_v32 = vld [vmem:[%s5115_s22 + $0x18] sm:$0xff]  ;;  %v1941_v29 = vld [vmem:[%s5115_s22 + $0xb0] sm:$0xff] }
 0x23d   : > { %v1681_v38 = vld [vmem:[%s5115_s22 + $0x38] sm:$0xff] }
 0x23e   : > { %4251 = vtanh.f32 %v5436_v39 }
 0x248   : > { %v4252_v42 = vpop.eup %4251 }
 0x249   : > { %v1174_v43 = vmul.f32 %v4252_v42, %v4250_v41  ;;  %v1678_v41 = vld [vmem:[%s5115_s22 + $0x20] sm:$0xff]  ;;  %v5489_v42 = vpack.c.bf16 %v1681_v38, %v1677_v32  ;;  %v5578_v32 = vpack.c.bf16 %v1941_v29, %v1937_v28  ;;  %v1944_v38 = vld [vmem:[%s5115_s22 + $0xc8] sm:$0xff]  ;;  %v1969_v28 = vld [vmem:[%s5115_s22 + $0x190] sm:$0xff] }
 0x24b   : > { %1177 = vst [vmem:[#allocation2] sm:$0xff] %v1174_v43  ;;  %1313 = vmatmul.mubr.f32.vlgmr.msra.gmra.mrb[2].mxu0 %v1174_v43  ;;  %1384 = vmatmul.mubr.f32.vlgmr.msra.gmra.mrb[2].mxu1 %v1174_v43 }
 0x24c   : > { %3638 = vmatpush1.bf16.msra.mxu0 %v5221_v55  ;;  %3670 = vmatpush1.bf16.msra.mxu1 %v5226_v58 }
 0x24d   : > { %3640 = vmatprep.subr.bf16.mxu0 %v5231_v61  ;;  %3672 = vmatprep.subr.bf16.mxu1 %v5235_v0 }
 0x24e   : > { %1557 = vmatprep.mubr.f32.mxu0 %v4724_v15  ;;  %1628 = vmatprep.mubr.f32.mxu1 %v4724_v15 }
 0x250   : > { %3642 = vmatpush1.bf16.msra.mxu0 %v5240_v4  ;;  %3674 = vmatpush1.bf16.msra.mxu1 %v5246_v7 }
 0x251   : > { %3644 = vmatprep.subr.bf16.mxu0 %v5252_v10  ;;  %3676 = vmatprep.subr.bf16.mxu1 %v5257_v13 }
 0x254   : > { %3646 = vmatpush1.bf16.msra.mxu0 %v5262_v18  ;;  %3678 = vmatpush1.bf16.msra.mxu1 %v5268_v21 }
 0x255   : > { %3648 = vmatprep.subr.bf16.mxu0 %v5274_v24  ;;  %3680 = vmatprep.subr.bf16.mxu1 %v5279_v27 }
 0x258   : > { %3650 = vmatpush1.bf16.msra.mxu0 %v5284_v31  ;;  %3682 = vmatpush1.bf16.msra.mxu1 %v5290_v34 }
 0x259   : > { %3652 = vmatprep.subr.bf16.mxu0 %v5296_v37  ;;  %3684 = vmatprep.subr.bf16.mxu1 %v5301_v40 }
 0x25c   : > { %3654 = vmatpush1.bf16.msra.mxu0 %v5306_v44  ;;  %3686 = vmatpush1.bf16.msra.mxu1 %v5312_v48 }
 0x25d   : > { %3656 = vmatprep.subr.bf16.mxu0 %v5318_v52  ;;  %3688 = vmatprep.subr.bf16.mxu1 %v5323_v56 }
 0x260   : > { %3658 = vmatpush1.bf16.msra.mxu0 %v5328_v62  ;;  %3690 = vmatpush1.bf16.msra.mxu1 %v5334_v2 }
 0x261   : > { %3660 = vmatprep.subr.bf16.mxu0 %v5340_v6  ;;  %3692 = vmatprep.subr.bf16.mxu1 %v5345_v11 }
 0x264   : > { %3662 = vmatpush1.bf16.msra.mxu0 %v5350_v17  ;;  %3694 = vmatpush1.bf16.msra.mxu1 %v5356_v22 }
 0x265   : > { %3664 = vmatprep.subr.bf16.mxu0 %v5362_v26  ;;  %3696 = vmatprep.subr.bf16.mxu1 %v5367_v30 }
 0x268   : > { %3666 = vmatpush1.bf16.msra.mxu0 %v5370_v33  ;;  %3698 = vmatpush1.bf16.msra.mxu1 %v5374_v35 }
 0x269   : > { %3700 = vmatprep.subr.bf16.mxu0 %v5484_v36  ;;  %3732 = vmatprep.subr.bf16.mxu1 %v5489_v42 }
 0x31e   : > { %v1314_v55 = vpop.f32.mrb[2].mxu0  ;;  %v1385_v58 = vpop.f32.mrb[2].mxu1 }
 0x31f   : > { %v4053_v61 = vadd.f32 %v1314_v55, %v5422_v45  ;;  %v1316_v0 = vpop.f32.mrb[3].mxu0  ;;  %v1387_v4 = vpop.f32.mrb[3].mxu1  ;;  %v4069_v57 = vadd.f32 %v1385_v58, %v5431_v5  ;;  %v1676_v55 = vld [vmem:[%s5115_s22 + $0x10] sm:$0xff] }
 0x320   : > { %v4054_v7 = vadd.f32 %v1316_v0, %v5424_v47  ;;  %v4070_v53 = vadd.f32 %v1387_v4, %v5428_v63  ;;  %v1680_v58 = vld [vmem:[%s5115_s22 + $0x30] sm:$0xff]  ;;  %v1683_v0 = vld [vmem:[%s5115_s22 + $0x48] sm:$0xff] }
 0x321   : > { %v3341_v50 = vmul.f32 -1.442695, %v4053_v61  ;;  %v5496_v61 = vpack.c.bf16 %v1680_v58, %v1676_v55  ;;  %v1687_v4 = vld [vmem:[%s5115_s22 + $0x68] sm:$0xff]  ;;  %v1950_v58 = vld [vmem:[%s5115_s22 + $0xf8] sm:$0xff] }
 0x322   : > { %v3342_v51 = vmul.f32 -1.442695, %v4054_v7  ;;  %v3343_v54 = vmul.f32 -1.442695, %v4070_v53  ;;  %v1685_v7 = vld [vmem:[%s5115_s22 + $0x58] sm:$0xff]  ;;  %v1682_v53 = vld [vmem:[%s5115_s22 + $0x40] sm:$0xff] }
 0x323   : > { %4253 = vpow2.f32 %v3341_v50  ;;  %v5504_v50 = vpack.c.bf16 %v1687_v4, %v1683_v0  ;;  %v1943_v0 = vld [vmem:[%s5115_s22 + $0xc0] sm:$0xff] }
 0x324   : > { %4255 = vpow2.f32 %v3342_v51  ;;  %v1689_v51 = vld [vmem:[%s5115_s22 + $0x78] sm:$0xff]  ;;  %v1947_v4 = vld [vmem:[%s5115_s22 + $0xe0] sm:$0xff] }
 0x325   : > { %4257 = vpow2.f32 %v3343_v54  ;;  %v1686_v54 = vld [vmem:[%s5115_s22 + $0x60] sm:$0xff] }
 0x326   : > { %4259 = vtanh.f32 %v4069_v57  ;;  %v5509_v57 = vpack.c.bf16 %v1689_v51, %v1685_v7  ;;  %v5593_v51 = vpack.c.bf16 %v1947_v4, %v1943_v0  ;;  %v1978_v4 = vld [vmem:[%s5115_s22 + $0x1d8] sm:$0xff] }
 0x32d   : > { %v4254_v59 = vpop.eup %4253 }
 0x32e   : > { %v4256_v46 = vpop.eup %4255  ;;  %v1397_v60 = vadd.f32 1.0, %v4254_v59  ;;  %v5511_v59 = vpack.c.bf16 %v1686_v54, %v1682_v53  ;;  %v1945_v53 = vld [vmem:[%s5115_s22 + $0xd0] sm:$0xff] }
 0x32f   : > { %v1403_v49 = vadd.f32 1.0, %v4256_v46  ;;  %v4258_v1 = vpop.eup %4257  ;;  %v1684_v46 = vld [vmem:[%s5115_s22 + $0x50] sm:$0xff] }
 0x330   : > { %4261 = vrcp.f32 %v1397_v60  ;;  %v4260_v3 = vpop.eup %4259  ;;  %v1410_v14 = vadd.f32 1.0, %v4258_v1  ;;  %v1688_v60 = vld [vmem:[%s5115_s22 + $0x70] sm:$0xff] }
 0x331   : > { %4263 = vrcp.f32 %v1403_v49  ;;  %v5516_v49 = vpack.c.bf16 %v1688_v60, %v1684_v46  ;;  %v1949_v54 = vld [vmem:[%s5115_s22 + $0xf0] sm:$0xff]  ;;  %v1952_v60 = vld [vmem:[%s5115_s22 + $0x108] sm:$0xff] }
 0x332   : > { %4265 = vrcp.f32 %v1410_v14  ;;  %v5598_v46 = vpack.c.bf16 %v1949_v54, %v1945_v53  ;;  %v1982_v53 = vld [vmem:[%s5115_s22 + $0x1f8] sm:$0xff]  ;;  %v1975_v54 = vld [vmem:[%s5115_s22 + $0x1c0] sm:$0xff] }
 0x33a   : > { %v4262_v8 = vpop.eup %4261 }
 0x33b   : > { %v4264_v9 = vpop.eup %4263  ;;  %v1415_v12 = vmul.f32 %v4262_v8, %v4260_v3  ;;  %v1936_v8 = vld [vmem:[%s5115_s22 + $0x88] sm:$0xff] }
 0x33c   : > { %v1414_v16 = vmul.f32 %v4264_v9, %v5436_v39  ;;  %v4266_v20 = vpop.eup %4265  ;;  %v1674_v39 = vld [vmem:[%s5115_s22] sm:$0xff]  ;;  %v1940_v9 = vld [vmem:[%s5115_s22 + $0xa8] sm:$0xff] }
 0x33d   : > { %v5491_v43 = vpack.c.bf16 %v1678_v41, %v1674_v39  ;;  %v5566_v14 = vpack.c.bf16 %v1940_v9, %v1936_v8  ;;  %v1948_v39 = vld [vmem:[%s5115_s22 + $0xe8] sm:$0xff]  ;;  %v1946_v41 = vld [vmem:[%s5115_s22 + $0xd8] sm:$0xff] }
 0x33e   : > { %v5476_v19 = vadd.f32 %v1415_v12, %v1414_v16  ;;  %v1938_v12 = vld [vmem:[%s5115_s22 + $0x98] sm:$0xff]  ;;  %v5586_v55 = vpack.c.bf16 %v1948_v39, %v1944_v38  ;;  %v5591_v7 = vpack.c.bf16 %v1950_v58, %v1946_v41  ;;  %v1973_v38 = vld [vmem:[%s5115_s22 + $0x1b0] sm:$0xff]  ;;  %v1976_v39 = vld [vmem:[%s5115_s22 + $0x1c8] sm:$0xff] }
 0x33f   : > { %v1942_v16 = vld [vmem:[%s5115_s22 + $0xb8] sm:$0xff]  ;;  %v1980_v41 = vld [vmem:[%s5115_s22 + $0x1e8] sm:$0xff]  ;;  %v5660_v58 = vpack.c.bf16 %v1973_v38, %v1969_v28 }
 0x340   : > { %4267 = vtanh.f32 %v5476_v19  ;;  %v1970_v8 = vld [vmem:[%s5115_s22 + $0x198] sm:$0xff]  ;;  %v5662_v0 = vpack.c.bf16 %v1980_v41, %v1976_v39 }
 0x341   : > { %v1974_v9 = vld [vmem:[%s5115_s22 + $0x1b8] sm:$0xff] }
 0x34a   : > { %v4268_v23 = vpop.eup %4267 }
 0x34b   : > { %v1418_v25 = vmul.f32 %v4268_v23, %v4266_v20  ;;  %v1939_v20 = vld [vmem:[%s5115_s22 + $0xa0] sm:$0xff]  ;;  %v5571_v23 = vpack.c.bf16 %v1942_v16, %v1938_v12  ;;  %v5647_v16 = vpack.c.bf16 %v1974_v9, %v1970_v8 }
 0x34d   : > { %1422 = vst [vmem:[#allocation2 + $0x8] sm:$0xff] %v1418_v25  ;;  %1558 = vmatmul.mubr.f32.vlgmr.msra.gmra.mrb[4].mxu0 %v1418_v25  ;;  %1629 = vmatmul.mubr.f32.vlgmr.msra.gmra.mrb[4].mxu1 %v1418_v25 }
 0x34e   : > { %1802 = vmatprep.mubr.f32.mxu0 %v4724_v15  ;;  %1873 = vmatprep.mubr.f32.mxu1 %v4724_v15 }
 0x34f   : > { %3702 = vmatpush1.bf16.msra.mxu0 %v5491_v43  ;;  %3734 = vmatpush1.bf16.msra.mxu1 %v5496_v61 }
 0x350   : > { %3704 = vmatprep.subr.bf16.mxu0 %v5504_v50  ;;  %3736 = vmatprep.subr.bf16.mxu1 %v5509_v57 }
 0x353   : > { %3706 = vmatpush1.bf16.msra.mxu0 %v5511_v59  ;;  %3738 = vmatpush1.bf16.msra.mxu1 %v5516_v49 }
 0x354   : > { %3708 = vmatprep.subr.bf16.mxu0 %v5252_v10  ;;  %3740 = vmatprep.subr.bf16.mxu1 %v5257_v13 }
 0x357   : > { %3710 = vmatpush1.bf16.msra.mxu0 %v5262_v18  ;;  %3742 = vmatpush1.bf16.msra.mxu1 %v5268_v21 }
 0x358   : > { %3712 = vmatprep.subr.bf16.mxu0 %v5274_v24  ;;  %3744 = vmatprep.subr.bf16.mxu1 %v5279_v27 }
 0x35b   : > { %3714 = vmatpush1.bf16.msra.mxu0 %v5284_v31  ;;  %3746 = vmatpush1.bf16.msra.mxu1 %v5290_v34 }
 0x35c   : > { %3716 = vmatprep.subr.bf16.mxu0 %v5296_v37  ;;  %3748 = vmatprep.subr.bf16.mxu1 %v5301_v40 }
 0x35f   : > { %3718 = vmatpush1.bf16.msra.mxu0 %v5306_v44  ;;  %3750 = vmatpush1.bf16.msra.mxu1 %v5312_v48 }
 0x360   : > { %3720 = vmatprep.subr.bf16.mxu0 %v5318_v52  ;;  %3752 = vmatprep.subr.bf16.mxu1 %v5323_v56 }
 0x363   : > { %3722 = vmatpush1.bf16.msra.mxu0 %v5328_v62  ;;  %3754 = vmatpush1.bf16.msra.mxu1 %v5334_v2 }
 0x364   : > { %3724 = vmatprep.subr.bf16.mxu0 %v5340_v6  ;;  %3756 = vmatprep.subr.bf16.mxu1 %v5345_v11 }
 0x367   : > { %3726 = vmatpush1.bf16.msra.mxu0 %v5350_v17  ;;  %3758 = vmatpush1.bf16.msra.mxu1 %v5356_v22 }
 0x368   : > { %3728 = vmatprep.subr.bf16.mxu0 %v5362_v26  ;;  %3760 = vmatprep.subr.bf16.mxu1 %v5367_v30 }
 0x36b   : > { %3730 = vmatpush1.bf16.msra.mxu0 %v5370_v33  ;;  %3762 = vmatpush1.bf16.msra.mxu1 %v5374_v35 }
 0x36c   : > { %3764 = vmatprep.subr.bf16.mxu0 %v5484_v36  ;;  %3796 = vmatprep.subr.bf16.mxu1 %v5489_v42 }
 0x420   : > { %v1559_v10 = vpop.f32.mrb[4].mxu0  ;;  %v1630_v13 = vpop.f32.mrb[4].mxu1 }
 0x421   : > { %v4055_v18 = vadd.f32 %v1559_v10, %v5422_v45  ;;  %v1561_v21 = vpop.f32.mrb[5].mxu0  ;;  %v1632_v24 = vpop.f32.mrb[5].mxu1  ;;  %v4071_v44 = vadd.f32 %v1630_v13, %v5431_v5  ;;  %v1956_v10 = vld [vmem:[%s5115_s22 + $0x128] sm:$0xff]  ;;  %v1954_v13 = vld [vmem:[%s5115_s22 + $0x118] sm:$0xff] }
 0x422   : > { %v4056_v27 = vadd.f32 %v1561_v21, %v5424_v47  ;;  %v4072_v37 = vadd.f32 %v1632_v24, %v5428_v63  ;;  %v1958_v21 = vld [vmem:[%s5115_s22 + $0x138] sm:$0xff]  ;;  %v1951_v24 = vld [vmem:[%s5115_s22 + $0x100] sm:$0xff] }
 0x423   : > { %v3344_v31 = vmul.f32 -1.442695, %v4055_v18  ;;  %v5606_v18 = vpack.c.bf16 %v1956_v10, %v1952_v60  ;;  %v5668_v60 = vpack.c.bf16 %v1982_v53, %v1978_v4  ;;  %v1979_v10 = vld [vmem:[%s5115_s22 + $0x1e0] sm:$0xff] }
 0x424   : > { %v3345_v34 = vmul.f32 -1.442695, %v4056_v27  ;;  %v3346_v40 = vmul.f32 -1.442695, %v4072_v37  ;;  %v1955_v27 = vld [vmem:[%s5115_s22 + $0x120] sm:$0xff]  ;;  %v1953_v37 = vld [vmem:[%s5115_s22 + $0x110] sm:$0xff] }
 0x425   : > { %4269 = vpow2.f32 %v3344_v31  ;;  %v5611_v31 = vpack.c.bf16 %v1958_v21, %v1954_v13  ;;  %v1977_v13 = vld [vmem:[%s5115_s22 + $0x1d0] sm:$0xff] }
 0x426   : > { %4271 = vpow2.f32 %v3345_v34  ;;  %v5613_v34 = vpack.c.bf16 %v1955_v27, %v1951_v24  ;;  %v1981_v21 = vld [vmem:[%s5115_s22 + $0x1f0] sm:$0xff]  ;;  %v5674_v24 = vpack.c.bf16 %v1979_v10, %v1975_v54 }
 0x427   : > { %4273 = vpow2.f32 %v3346_v40  ;;  %v1957_v40 = vld [vmem:[%s5115_s22 + $0x130] sm:$0xff]  ;;  %v5678_v27 = vpack.c.bf16 %v1981_v21, %v1977_v13 }
 0x428   : > { %4275 = vtanh.f32 %v4071_v44  ;;  %v5618_v44 = vpack.c.bf16 %v1957_v40, %v1953_v37 }
 0x42f   : > { %v4270_v48 = vpop.eup %4269 }
 0x430   : > { %v4272_v52 = vpop.eup %4271  ;;  %v1642_v56 = vadd.f32 1.0, %v4270_v48  ;;  %v1960_v48 = vld [vmem:[%s5115_s22 + $0x148] sm:$0xff] }
 0x431   : > { %v1648_v62 = vadd.f32 1.0, %v4272_v52  ;;  %v4274_v2 = vpop.eup %4273  ;;  %v1964_v52 = vld [vmem:[%s5115_s22 + $0x168] sm:$0xff] }
 0x432   : > { %4277 = vrcp.f32 %v1642_v56  ;;  %v4276_v6 = vpop.eup %4275  ;;  %v1655_v26 = vadd.f32 1.0, %v4274_v2  ;;  %v1962_v56 = vld [vmem:[%s5115_s22 + $0x158] sm:$0xff] }
 0x433   : > { %4279 = vrcp.f32 %v1648_v62  ;;  %v5625_v62 = vpack.c.bf16 %v1964_v52, %v1960_v48  ;;  %v1966_v2 = vld [vmem:[%s5115_s22 + $0x178] sm:$0xff] }
 0x434   : > { %4281 = vrcp.f32 %v1655_v26  ;;  %v1961_v26 = vld [vmem:[%s5115_s22 + $0x150] sm:$0xff] }
 0x43c   : > { %v4278_v11 = vpop.eup %4277 }
 0x43d   : > { %v4280_v17 = vpop.eup %4279  ;;  %v1660_v22 = vmul.f32 %v4278_v11, %v4276_v6  ;;  %v1959_v6 = vld [vmem:[%s5115_s22 + $0x140] sm:$0xff] }
 0x43e   : > { %v1659_v30 = vmul.f32 %v4280_v17, %v5476_v19  ;;  %v4282_v35 = vpop.eup %4281  ;;  %v1935_v19 = vld [vmem:[%s5115_s22 + $0x80] sm:$0xff]  ;;  %v5631_v17 = vpack.c.bf16 %v1966_v2, %v1962_v56 }
 0x43f   : > { %v5573_v25 = vpack.c.bf16 %v1939_v20, %v1935_v19  ;;  %v1963_v11 = vld [vmem:[%s5115_s22 + $0x160] sm:$0xff] }
 0x440   : > { %v5552_v33 = vadd.f32 %v1660_v22, %v1659_v30  ;;  %v5633_v22 = vpack.c.bf16 %v1963_v11, %v1959_v6  ;;  %v1965_v30 = vld [vmem:[%s5115_s22 + $0x170] sm:$0xff]  ;;  %v1967_v19 = vld [vmem:[%s5115_s22 + $0x180] sm:$0xff] }
 0x441   : > { %v1971_v20 = vld [vmem:[%s5115_s22 + $0x1a0] sm:$0xff] }
 0x442   : > { %4283 = vtanh.f32 %v5552_v33  ;;  %v5653_v29 = vpack.c.bf16 %v1971_v20, %v1967_v19 }
 0x44c   : > { %v4284_v1 = vpop.eup %4283 }
 0x44d   : > { %v1663_v3 = vmul.f32 %v4284_v1, %v4282_v35  ;;  %v1968_v35 = vld [vmem:[%s5115_s22 + $0x188] sm:$0xff]  ;;  %v5639_v1 = vpack.c.bf16 %v1965_v30, %v1961_v26 }
 0x44f   : > { %1667 = vst [vmem:[#allocation2 + $0x10] sm:$0xff] %v1663_v3  ;;  %1803 = vmatmul.mubr.f32.vlgmr.msra.gmra.mrb[6].mxu0 %v1663_v3  ;;  %1874 = vmatmul.mubr.f32.vlgmr.msra.gmra.mrb[6].mxu1 %v1663_v3  ;;  %v1972_v3 = vld [vmem:[%s5115_s22 + $0x1a8] sm:$0xff] }
 0x450   : > { %3766 = vmatpush1.bf16.msra.mxu0 %v5491_v43  ;;  %3798 = vmatpush1.bf16.msra.mxu1 %v5496_v61  ;;  %v5645_v12 = vpack.c.bf16 %v1972_v3, %v1968_v35 }
 0x451   : > { %3768 = vmatprep.subr.bf16.mxu0 %v5504_v50  ;;  %3800 = vmatprep.subr.bf16.mxu1 %v5509_v57 }
 0x452   : > { %2047 = vmatprep.mubr.f32.mxu0 %v4724_v15  ;;  %2118 = vmatprep.mubr.f32.mxu1 %v4724_v15 }
 0x454   : > { %3770 = vmatpush1.bf16.msra.mxu0 %v5511_v59  ;;  %3802 = vmatpush1.bf16.msra.mxu1 %v5516_v49 }
 0x455   : > { %3772 = vmatprep.subr.bf16.mxu0 %v5566_v14  ;;  %3804 = vmatprep.subr.bf16.mxu1 %v5571_v23 }
 0x458   : > { %3774 = vmatpush1.bf16.msra.mxu0 %v5573_v25  ;;  %3806 = vmatpush1.bf16.msra.mxu1 %v5578_v32 }
 0x459   : > { %3776 = vmatprep.subr.bf16.mxu0 %v5586_v55  ;;  %3808 = vmatprep.subr.bf16.mxu1 %v5591_v7 }
 0x45c   : > { %3778 = vmatpush1.bf16.msra.mxu0 %v5593_v51  ;;  %3810 = vmatpush1.bf16.msra.mxu1 %v5598_v46 }
 0x45d   : > { %3780 = vmatprep.subr.bf16.mxu0 %v5606_v18  ;;  %3812 = vmatprep.subr.bf16.mxu1 %v5611_v31 }
 0x460   : > { %3782 = vmatpush1.bf16.msra.mxu0 %v5613_v34  ;;  %3814 = vmatpush1.bf16.msra.mxu1 %v5618_v44 }
 0x461   : > { %3784 = vmatprep.subr.bf16.mxu0 %v5625_v62  ;;  %3816 = vmatprep.subr.bf16.mxu1 %v5631_v17 }
 0x464   : > { %3786 = vmatpush1.bf16.msra.mxu0 %v5633_v22  ;;  %3818 = vmatpush1.bf16.msra.mxu1 %v5639_v1 }
 0x465   : > { %3788 = vmatprep.subr.bf16.mxu0 %v5645_v12  ;;  %3820 = vmatprep.subr.bf16.mxu1 %v5647_v16 }
 0x468   : > { %3790 = vmatpush1.bf16.msra.mxu0 %v5653_v29  ;;  %3822 = vmatpush1.bf16.msra.mxu1 %v5660_v58 }
 0x469   : > { %3792 = vmatprep.subr.bf16.mxu0 %v5662_v0  ;;  %3824 = vmatprep.subr.bf16.mxu1 %v5668_v60 }
 0x46c   : > { %3794 = vmatpush1.bf16.msra.mxu0 %v5674_v24  ;;  %3826 = vmatpush1.bf16.msra.mxu1 %v5678_v27 }
 0x46d   : > { %3828 = vmatprep.subr.bf16.mxu0 %v5484_v36  ;;  %3860 = vmatprep.subr.bf16.mxu1 %v5489_v42 }
 0x522   : > { %v1804_v37 = vpop.f32.mrb[6].mxu0  ;;  %v1875_v40 = vpop.f32.mrb[6].mxu1 }
 0x523   : > { %v4057_v48 = vadd.f32 %v1804_v37, %v5422_v45  ;;  %v1806_v52 = vpop.f32.mrb[7].mxu0  ;;  %v1877_v56 = vpop.f32.mrb[7].mxu1  ;;  %v4073_v35 = vadd.f32 %v1875_v40, %v5431_v5 }
 0x524   : > { %v4058_v2 = vadd.f32 %v1806_v52, %v5424_v47  ;;  %v4074_v26 = vadd.f32 %v1877_v56, %v5428_v63 }
 0x525   : > { %v3347_v6 = vmul.f32 -1.442695, %v4057_v48 }
 0x526   : > { %v3348_v11 = vmul.f32 -1.442695, %v4058_v2  ;;  %v3349_v30 = vmul.f32 -1.442695, %v4074_v26 }
 0x527   : > { %4285 = vpow2.f32 %v3347_v6 }
 0x528   : > { %4287 = vpow2.f32 %v3348_v11 }
 0x529   : > { %4289 = vpow2.f32 %v3349_v30 }
 0x52a   : > { %4291 = vtanh.f32 %v4073_v35 }
 0x531   : > { %v4286_v3 = vpop.eup %4285 }
 0x532   : > { %v4288_v8 = vpop.eup %4287  ;;  %v1887_v9 = vadd.f32 1.0, %v4286_v3 }
 0x533   : > { %v1893_v19 = vadd.f32 1.0, %v4288_v8  ;;  %v4290_v20 = vpop.eup %4289 }
 0x534   : > { %4293 = vrcp.f32 %v1887_v9  ;;  %v4292_v28 = vpop.eup %4291  ;;  %v1900_v4 = vadd.f32 1.0, %v4290_v20 }
 0x535   : > { %4295 = vrcp.f32 %v1893_v19 }
 0x536   : > { %4297 = vrcp.f32 %v1900_v4 }
 0x53e   : > { %v4294_v38 = vpop.eup %4293 }
 0x53f   : > { %v4296_v39 = vpop.eup %4295  ;;  %v1905_v41 = vmul.f32 %v4294_v38, %v4292_v28 }
 0x540   : > { %v1904_v53 = vmul.f32 %v4296_v39, %v5552_v33  ;;  %v4298_v10 = vpop.eup %4297 }
 0x542   : > { %v5690_v54 = vadd.f32 %v1905_v41, %v1904_v53 }
 0x544   : > { %4299 = vtanh.f32 %v5690_v54 }
 0x54e   : > { %v4300_v13 = vpop.eup %4299 }
 0x54f   : > { %v1908_v21 = vmul.f32 %v4300_v13, %v4298_v10 }
 0x551   : > { %1912 = vst [vmem:[#allocation2 + $0x18] sm:$0xff] %v1908_v21  ;;  %2048 = vmatmul.mubr.f32.vlgmr.msra.gmra.mrb[8].mxu0 %v1908_v21  ;;  %2119 = vmatmul.mubr.f32.vlgmr.msra.gmra.mrb[8].mxu1 %v1908_v21 }
 0x552   : > { %3830 = vmatpush1.bf16.msra.mxu0 %v5491_v43  ;;  %3862 = vmatpush1.bf16.msra.mxu1 %v5496_v61 }
 0x553   : > { %3832 = vmatprep.subr.bf16.mxu0 %v5504_v50  ;;  %3864 = vmatprep.subr.bf16.mxu1 %v5509_v57 }
 0x554   : > { %2292 = vmatprep.mubr.f32.mxu0 %v4724_v15  ;;  %2363 = vmatprep.mubr.f32.mxu1 %v4724_v15 }
 0x556   : > { %3834 = vmatpush1.bf16.msra.mxu0 %v5511_v59  ;;  %3866 = vmatpush1.bf16.msra.mxu1 %v5516_v49 }
 0x557   : > { %3836 = vmatprep.subr.bf16.mxu0 %v5566_v14  ;;  %3868 = vmatprep.subr.bf16.mxu1 %v5571_v23 }
 0x55a   : > { %3838 = vmatpush1.bf16.msra.mxu0 %v5573_v25  ;;  %3870 = vmatpush1.bf16.msra.mxu1 %v5578_v32 }
 0x55b   : > { %3840 = vmatprep.subr.bf16.mxu0 %v5586_v55  ;;  %3872 = vmatprep.subr.bf16.mxu1 %v5591_v7 }
 0x55e   : > { %3842 = vmatpush1.bf16.msra.mxu0 %v5593_v51  ;;  %3874 = vmatpush1.bf16.msra.mxu1 %v5598_v46 }
 0x55f   : > { %3844 = vmatprep.subr.bf16.mxu0 %v5606_v18  ;;  %3876 = vmatprep.subr.bf16.mxu1 %v5611_v31 }
 0x562   : > { %3846 = vmatpush1.bf16.msra.mxu0 %v5613_v34  ;;  %3878 = vmatpush1.bf16.msra.mxu1 %v5618_v44 }
 0x563   : > { %3848 = vmatprep.subr.bf16.mxu0 %v5625_v62  ;;  %3880 = vmatprep.subr.bf16.mxu1 %v5631_v17 }
 0x566   : > { %3850 = vmatpush1.bf16.msra.mxu0 %v5633_v22  ;;  %3882 = vmatpush1.bf16.msra.mxu1 %v5639_v1 }
 0x567   : > { %3852 = vmatprep.subr.bf16.mxu0 %v5645_v12  ;;  %3884 = vmatprep.subr.bf16.mxu1 %v5647_v16 }
 0x56a   : > { %3854 = vmatpush1.bf16.msra.mxu0 %v5653_v29  ;;  %3886 = vmatpush1.bf16.msra.mxu1 %v5660_v58 }
 0x56b   : > { %3856 = vmatprep.subr.bf16.mxu0 %v5662_v0  ;;  %3888 = vmatprep.subr.bf16.mxu1 %v5668_v60 }
 0x56e   : > { %3858 = vmatpush1.bf16.msra.mxu0 %v5674_v24  ;;  %3890 = vmatpush1.bf16.msra.mxu1 %v5678_v27 }
 0x56f   : > { %3892 = vmatprep.subr.bf16.mxu0 %v5484_v36  ;;  %3924 = vmatprep.subr.bf16.mxu1 %v5489_v42 }
 0x624   : > { %v2049_v33 = vpop.f32.mrb[8].mxu0  ;;  %v2120_v37 = vpop.f32.mrb[8].mxu1 }
 0x625   : > { %v4059_v40 = vadd.f32 %v2049_v33, %v5422_v45  ;;  %v2051_v48 = vpop.f32.mrb[9].mxu0  ;;  %v2122_v52 = vpop.f32.mrb[9].mxu1  ;;  %v4075_v30 = vadd.f32 %v2120_v37, %v5431_v5 }
 0x626   : > { %v4060_v56 = vadd.f32 %v2051_v48, %v5424_v47  ;;  %v4076_v11 = vadd.f32 %v2122_v52, %v5428_v63 }
 0x627   : > { %v3350_v2 = vmul.f32 -1.442695, %v4059_v40 }
 0x628   : > { %v3351_v6 = vmul.f32 -1.442695, %v4060_v56  ;;  %v3352_v26 = vmul.f32 -1.442695, %v4076_v11 }
 0x629   : > { %4301 = vpow2.f32 %v3350_v2 }
 0x62a   : > { %4303 = vpow2.f32 %v3351_v6 }
 0x62b   : > { %4305 = vpow2.f32 %v3352_v26 }
 0x62c   : > { %4307 = vtanh.f32 %v4075_v30 }
 0x633   : > { %v4302_v36 = vpop.eup %4301 }
 0x634   : > { %v4304_v35 = vpop.eup %4303  ;;  %v2132_v42 = vadd.f32 1.0, %v4302_v36 }
 0x635   : > { %v2138_v3 = vadd.f32 1.0, %v4304_v35  ;;  %v4306_v8 = vpop.eup %4305 }
 0x636   : > { %4309 = vrcp.f32 %v2132_v42  ;;  %v4308_v9 = vpop.eup %4307  ;;  %v2145_v38 = vadd.f32 1.0, %v4306_v8 }
 0x637   : > { %4311 = vrcp.f32 %v2138_v3 }
 0x638   : > { %4313 = vrcp.f32 %v2145_v38 }
 0x640   : > { %v4310_v19 = vpop.eup %4309 }
 0x641   : > { %v4312_v20 = vpop.eup %4311  ;;  %v2150_v28 = vmul.f32 %v4310_v19, %v4308_v9  ;;  %v2655_v19 = vld [vmem:[%s5115_s22 + $0x8] sm:$0xff] }
 0x642   : > { %v2149_v39 = vmul.f32 %v4312_v20, %v5690_v54  ;;  %v4314_v4 = vpop.eup %4313  ;;  %v2659_v20 = vld [vmem:[%s5115_s22 + $0x28] sm:$0xff] }
 0x643   : > { %v3955_v38 = vpack.c.bf16 %v2659_v20, %v2655_v19 }
 0x644   : > { %v5732_v41 = vadd.f32 %v2150_v28, %v2149_v39  ;;  %v2657_v28 = vld [vmem:[%s5115_s22 + $0x18] sm:$0xff] }
 0x645   : > { %v2661_v39 = vld [vmem:[%s5115_s22 + $0x38] sm:$0xff] }
 0x646   : > { %4315 = vtanh.f32 %v5732_v41 }
 0x650   : > { %v4316_v53 = vpop.eup %4315 }
 0x651   : > { %v2153_v10 = vmul.f32 %v4316_v53, %v4314_v4  ;;  %v2658_v4 = vld [vmem:[%s5115_s22 + $0x20] sm:$0xff]  ;;  %v3987_v53 = vpack.c.bf16 %v2661_v39, %v2657_v28 }
 0x653   : > { %2157 = vst [vmem:[#allocation2 + $0x20] sm:$0xff] %v2153_v10  ;;  %2293 = vmatmul.mubr.f32.vlgmr.msra.gmra.mrb[10].mxu0 %v2153_v10  ;;  %2364 = vmatmul.mubr.f32.vlgmr.msra.gmra.mrb[10].mxu1 %v2153_v10 }
 0x654   : > { %3894 = vmatpush1.bf16.msra.mxu0 %v5491_v43  ;;  %3926 = vmatpush1.bf16.msra.mxu1 %v5496_v61 }
 0x655   : > { %3896 = vmatprep.subr.bf16.mxu0 %v5504_v50  ;;  %3928 = vmatprep.subr.bf16.mxu1 %v5509_v57 }
 0x656   : > { %2537 = vmatprep.mubr.f32.mxu0 %v4724_v15  ;;  %2608 = vmatprep.mubr.f32.mxu1 %v4724_v15 }
 0x658   : > { %3898 = vmatpush1.bf16.msra.mxu0 %v5511_v59  ;;  %3930 = vmatpush1.bf16.msra.mxu1 %v5516_v49 }
 0x659   : > { %3900 = vmatprep.subr.bf16.mxu0 %v5566_v14  ;;  %3932 = vmatprep.subr.bf16.mxu1 %v5571_v23 }
 0x65c   : > { %3902 = vmatpush1.bf16.msra.mxu0 %v5573_v25  ;;  %3934 = vmatpush1.bf16.msra.mxu1 %v5578_v32 }
 0x65d   : > { %3904 = vmatprep.subr.bf16.mxu0 %v5586_v55  ;;  %3936 = vmatprep.subr.bf16.mxu1 %v5591_v7 }
 0x660   : > { %3906 = vmatpush1.bf16.msra.mxu0 %v5593_v51  ;;  %3938 = vmatpush1.bf16.msra.mxu1 %v5598_v46 }
 0x661   : > { %3908 = vmatprep.subr.bf16.mxu0 %v5606_v18  ;;  %3940 = vmatprep.subr.bf16.mxu1 %v5611_v31 }
 0x664   : > { %3910 = vmatpush1.bf16.msra.mxu0 %v5613_v34  ;;  %3942 = vmatpush1.bf16.msra.mxu1 %v5618_v44 }
 0x665   : > { %3912 = vmatprep.subr.bf16.mxu0 %v5625_v62  ;;  %3944 = vmatprep.subr.bf16.mxu1 %v5631_v17 }
 0x668   : > { %3914 = vmatpush1.bf16.msra.mxu0 %v5633_v22  ;;  %3946 = vmatpush1.bf16.msra.mxu1 %v5639_v1 }
 0x669   : > { %3916 = vmatprep.subr.bf16.mxu0 %v5645_v12  ;;  %3948 = vmatprep.subr.bf16.mxu1 %v5647_v16 }
 0x66c   : > { %3918 = vmatpush1.bf16.msra.mxu0 %v5653_v29  ;;  %3950 = vmatpush1.bf16.msra.mxu1 %v5660_v58 }
 0x66d   : > { %3920 = vmatprep.subr.bf16.mxu0 %v5662_v0  ;;  %3952 = vmatprep.subr.bf16.mxu1 %v5668_v60 }
 0x670   : > { %3922 = vmatpush1.bf16.msra.mxu0 %v5674_v24  ;;  %3954 = vmatpush1.bf16.msra.mxu1 %v5678_v27 }
 0x671   : > { %3956 = vmatprep.subr.bf16.mxu0 %v3955_v38  ;;  %3988 = vmatprep.subr.bf16.mxu1 %v3987_v53 }
 0x726   : > { %v2294_v43 = vpop.f32.mrb[10].mxu0  ;;  %v2365_v61 = vpop.f32.mrb[10].mxu1 }
 0x727   : > { %v4061_v50 = vadd.f32 %v2294_v43, %v5422_v45  ;;  %v2296_v57 = vpop.f32.mrb[11].mxu0  ;;  %v2367_v59 = vpop.f32.mrb[11].mxu1  ;;  %v4077_v37 = vadd.f32 %v2365_v61, %v5431_v5  ;;  %v2656_v43 = vld [vmem:[%s5115_s22 + $0x10] sm:$0xff] }
 0x728   : > { %v4062_v49 = vadd.f32 %v2296_v57, %v5424_v47  ;;  %v4078_v21 = vadd.f32 %v2367_v59, %v5428_v63  ;;  %v2660_v61 = vld [vmem:[%s5115_s22 + $0x30] sm:$0xff]  ;;  %v2667_v57 = vld [vmem:[%s5115_s22 + $0x68] sm:$0xff]  ;;  %v2665_v59 = vld [vmem:[%s5115_s22 + $0x58] sm:$0xff] }
 0x729   : > { %v3353_v54 = vmul.f32 -1.442695, %v4061_v50  ;;  %v2663_v50 = vld [vmem:[%s5115_s22 + $0x48] sm:$0xff] }
 0x72a   : > { %v3354_v13 = vmul.f32 -1.442695, %v4062_v49  ;;  %v3355_v33 = vmul.f32 -1.442695, %v4078_v21  ;;  %v3959_v49 = vpack.c.bf16 %v2667_v57, %v2663_v50  ;;  %v2666_v21 = vld [vmem:[%s5115_s22 + $0x60] sm:$0xff]  ;;  %v2909_v50 = vld [vmem:[#allocation17] sm:$0xff] (!%p3362_p13) }
 0x72b   : > { %4317 = vpow2.f32 %v3353_v54  ;;  %v2669_v54 = vld [vmem:[%s5115_s22 + $0x78] sm:$0xff]  ;;  %v2910_v57 = vld [vmem:[#allocation17 + $0x8] sm:$0xff] (!%p3362_p13) }
 0x72c   : > { %4319 = vpow2.f32 %v3354_v13  ;;  %v2662_v13 = vld [vmem:[%s5115_s22 + $0x40] sm:$0xff] }
 0x72d   : > { %4321 = vpow2.f32 %v3355_v33  ;;  %v3991_v33 = vpack.c.bf16 %v2669_v54, %v2665_v59  ;;  %v2911_v59 = vld [vmem:[#allocation17 + $0x10] sm:$0xff] (!%p3362_p13)  ;;  %v2912_v54 = vld [vmem:[#allocation17 + $0x18] sm:$0xff] (!%p3362_p13) }
 0x72e   : > { %4323 = vtanh.f32 %v4077_v37  ;;  %v3961_v37 = vpack.c.bf16 %v2666_v21, %v2662_v13  ;;  %v4023_v13 = vpack.c.bf16 (!%p3362_p13), %v2912_v54, %v2911_v59  ;;  %v2913_v21 = vld [vmem:[#allocation17 + $0x20] sm:$0xff] (!%p3362_p13) }
 0x735   : > { %v4318_v40 = vpop.eup %4317 }
 0x736   : > { %v4320_v48 = vpop.eup %4319  ;;  %v2377_v52 = vadd.f32 1.0, %v4318_v40  ;;  %v2664_v40 = vld [vmem:[%s5115_s22 + $0x50] sm:$0xff] }
 0x737   : > { %v2383_v56 = vadd.f32 1.0, %v4320_v48  ;;  %v4322_v2 = vpop.eup %4321  ;;  %v2668_v48 = vld [vmem:[%s5115_s22 + $0x70] sm:$0xff] }
 0x738   : > { %4325 = vrcp.f32 %v2377_v52  ;;  %v4324_v6 = vpop.eup %4323  ;;  %v2390_v36 = vadd.f32 1.0, %v4322_v2  ;;  %v3993_v52 = vpack.c.bf16 %v2668_v48, %v2664_v40  ;;  %v2901_v40 = vld [vmem:[#allocation2] sm:$0xff] (!%p3362_p13) }
 0x739   : > { %4327 = vrcp.f32 %v2383_v56  ;;  %v2905_v48 = vld [vmem:[#allocation2 + $0x20] sm:$0xff] (!%p3362_p13) }
 0x73a   : > { %4329 = vrcp.f32 %v2390_v36 }
 0x742   : > { %v4326_v11 = vpop.eup %4325 }
 0x743   : > { %v4328_v26 = vpop.eup %4327  ;;  %v2395_v30 = vmul.f32 %v4326_v11, %v4324_v6 }
 0x744   : > { %v2394_v35 = vmul.f32 %v4328_v26, %v5732_v41  ;;  %v4330_v3 = vpop.eup %4329  ;;  %v2654_v41 = vld [vmem:[%s5115_s22] sm:$0xff] }
 0x745   : > { %v3957_v10 = vpack.c.bf16 %v2658_v4, %v2654_v41 }
 0x746   : > { %v5772_v42 = vadd.f32 %v2395_v30, %v2394_v35 }
 0x748   : > { %4331 = vtanh.f32 %v5772_v42 }
 0x752   : > { %v4332_v8 = vpop.eup %4331 }
 0x753   : > { %v2398_v9 = vmul.f32 %v4332_v8, %v4330_v3 }
 0x755   : > { %2402 = vst [vmem:[#allocation2 + $0x28] sm:$0xff] %v2398_v9  ;;  %2538 = vmatmul.mubr.f32.vlgmr.msra.gmra.mrb[12].mxu0 %v2398_v9  ;;  %2609 = vmatmul.mubr.f32.vlgmr.msra.gmra.mrb[12].mxu1 %v2398_v9 }
 0x756   : > { %2782 = vmatprep.mubr.f32.mxu0 %v4724_v15  ;;  %2853 = vmatprep.mubr.f32.mxu1 %v4724_v15  ;;  %v3989_v15 = vpack.c.bf16 %v2660_v61, %v2656_v43 }
 0x757   : > { %3958 = vmatpush1.bf16.msra.mxu0 %v3957_v10 }
 0x758   : > { %3990 = vmatpush1.bf16.msra.mxu1 %v3989_v15  ;;  %3960 = vmatprep.subr.bf16.mxu0 %v3959_v49  ;;  %v4019_v49 = vpack.c.bf16 (!%p3362_p13), %v2910_v57, %v2909_v50 }
 0x759   : > { %3992 = vmatprep.subr.bf16.mxu1 %v3991_v33  ;;  %v2914_v33 = vld [vmem:[#allocation17 + $0x28] sm:$0xff] (!%p3362_p13) }
 0x75b   : > { %3962 = vmatpush1.bf16.msra.mxu0 %v3961_v37  ;;  %v4027_v37 = vpack.c.bf16 (!%p3362_p13), %v2914_v33, %v2913_v21 }
 0x75c   : > { %3994 = vmatpush1.bf16.msra.mxu1 %v3993_v52  ;;  %3964 = vmatprep.subr.bf16.mxu0 %v5566_v14  ;;  %v2915_v52 = vld [vmem:[#allocation17 + $0x30] sm:$0xff] (!%p3362_p13) }
 0x75d   : > { %3996 = vmatprep.subr.bf16.mxu1 %v5571_v23 }
 0x75f   : > { %3966 = vmatpush1.bf16.msra.mxu0 %v5573_v25 }
 0x760   : > { %3998 = vmatpush1.bf16.msra.mxu1 %v5578_v32  ;;  %3968 = vmatprep.subr.bf16.mxu0 %v5586_v55 }
 0x761   : > { %4000 = vmatprep.subr.bf16.mxu1 %v5591_v7 }
 0x763   : > { %3970 = vmatpush1.bf16.msra.mxu0 %v5593_v51 }
 0x764   : > { %4002 = vmatpush1.bf16.msra.mxu1 %v5598_v46  ;;  %3972 = vmatprep.subr.bf16.mxu0 %v5606_v18 }
 0x765   : > { %4004 = vmatprep.subr.bf16.mxu1 %v5611_v31 }
 0x767   : > { %3974 = vmatpush1.bf16.msra.mxu0 %v5613_v34 }
 0x768   : > { %4006 = vmatpush1.bf16.msra.mxu1 %v5618_v44  ;;  %3976 = vmatprep.subr.bf16.mxu0 %v5625_v62 }
 0x769   : > { %4008 = vmatprep.subr.bf16.mxu1 %v5631_v17 }
 0x76b   : > { %3978 = vmatpush1.bf16.msra.mxu0 %v5633_v22 }
 0x76c   : > { %4010 = vmatpush1.bf16.msra.mxu1 %v5639_v1  ;;  %3980 = vmatprep.subr.bf16.mxu0 %v5645_v12 }
 0x76d   : > { %4012 = vmatprep.subr.bf16.mxu1 %v5647_v16 }
 0x76f   : > { %3982 = vmatpush1.bf16.msra.mxu0 %v5653_v29 }
 0x770   : > { %4014 = vmatpush1.bf16.msra.mxu1 %v5660_v58  ;;  %3984 = vmatprep.subr.bf16.mxu0 %v5662_v0 }
 0x771   : > { %4016 = vmatprep.subr.bf16.mxu1 %v5668_v60 }
 0x773   : > { %3986 = vmatpush1.bf16.msra.mxu0 %v5674_v24 }
 0x774   : > { %4018 = vmatpush1.bf16.msra.mxu1 %v5678_v27  ;;  %4020 = vmatprep.subr.bf16.mxu0 (!%p3362_p13), %v4019_v49 }
 0x775   : > { %4115 = vmatprep.subr.bf16.mxu1 (!%p3362_p13), %v4019_v49 }
 0x828   : > { %v2539_v14 = vpop.f32.mrb[12].mxu0  ;;  %v2610_v23 = vpop.f32.mrb[12].mxu1 }
 0x829   : > { %v4063_v25 = vadd.f32 %v2539_v14, %v5422_v45  ;;  %v2541_v32 = vpop.f32.mrb[13].mxu0  ;;  %v2612_v55 = vpop.f32.mrb[13].mxu1  ;;  %v4079_v34 = vadd.f32 %v2610_v23, %v5431_v5  ;;  %v2916_v14 = vld [vmem:[#allocation17 + $0x38] sm:$0xff] (!%p3362_p13) }
 0x82a   : > { %v4064_v7 = vadd.f32 %v2541_v32, %v5424_v47  ;;  %v4080_v18 = vadd.f32 %v2612_v55, %v5428_v63  ;;  %v4031_v23 = vpack.c.bf16 (!%p3362_p13), %v2916_v14, %v2915_v52  ;;  %v2918_v32 = vld [vmem:[#allocation17 + $0x48] sm:$0xff] (!%p3362_p13) }
 0x82b   : > { %v3356_v51 = vmul.f32 -1.442695, %v4063_v25  ;;  %v2917_v25 = vld [vmem:[#allocation17 + $0x40] sm:$0xff] (!%p3362_p13) }
 0x82c   : > { %v3357_v46 = vmul.f32 -1.442695, %v4064_v7  ;;  %v3358_v31 = vmul.f32 -1.442695, %v4080_v18  ;;  %v4035_v55 = vpack.c.bf16 (!%p3362_p13), %v2918_v32, %v2917_v25  ;;  %v2919_v7 = vld [vmem:[#allocation17 + $0x50] sm:$0xff] (!%p3362_p13)  ;;  %v2921_v18 = vld [vmem:[#allocation17 + $0x60] sm:$0xff] (!%p3362_p13) }
 0x82d   : > { %4333 = vpow2.f32 %v3356_v51  ;;  %v2920_v51 = vld [vmem:[#allocation17 + $0x58] sm:$0xff] (!%p3362_p13) }
 0x82e   : > { %4335 = vpow2.f32 %v3357_v46  ;;  %v4039_v46 = vpack.c.bf16 (!%p3362_p13), %v2920_v51, %v2919_v7 }
 0x82f   : > { %4337 = vpow2.f32 %v3358_v31  ;;  %v2922_v31 = vld [vmem:[#allocation17 + $0x68] sm:$0xff] (!%p3362_p13) }
 0x830   : > { %4339 = vtanh.f32 %v4079_v34  ;;  %v4043_v34 = vpack.c.bf16 (!%p3362_p13), %v2922_v31, %v2921_v18 }
 0x837   : > { %v4334_v44 = vpop.eup %4333 }
 0x838   : > { %v4336_v62 = vpop.eup %4335  ;;  %v2622_v17 = vadd.f32 1.0, %v4334_v44  ;;  %v2923_v44 = vld [vmem:[#allocation17 + $0x70] sm:$0xff] (!%p3362_p13) }
 0x839   : > { %v2628_v22 = vadd.f32 1.0, %v4336_v62  ;;  %v4338_v1 = vpop.eup %4337  ;;  %v2924_v62 = vld [vmem:[#allocation17 + $0x78] sm:$0xff] (!%p3362_p13) }
 0x83a   : > { %4341 = vrcp.f32 %v2622_v17  ;;  %v4340_v12 = vpop.eup %4339  ;;  %v2635_v0 = vadd.f32 1.0, %v4338_v1  ;;  %v4047_v17 = vpack.c.bf16 (!%p3362_p13), %v2924_v62, %v2923_v44  ;;  %v2906_v1 = vld [vmem:[#allocation2 + $0x28] sm:$0xff] (!%p3362_p13) }
 0x83b   : > { %4343 = vrcp.f32 %v2628_v22  ;;  %v2902_v22 = vld [vmem:[#allocation2 + $0x8] sm:$0xff] (!%p3362_p13) }
 0x83c   : > { %4345 = vrcp.f32 %v2635_v0  ;;  %v3363_v0 = vld [vmem:[%s6016_s21] ss:$0 sm:$0xff] (!%p3362_p13) }
 0x844   : > { %v4342_v16 = vpop.eup %4341 }
 0x845   : > { %v4344_v29 = vpop.eup %4343  ;;  %v2640_v58 = vmul.f32 %v4342_v16, %v4340_v12  ;;  %v2903_v12 = vld [vmem:[#allocation2 + $0x10] sm:$0xff] (!%p3362_p13) }
 0x846   : > { %v2639_v60 = vmul.f32 %v4344_v29, %v5772_v42  ;;  %v4346_v27 = vpop.eup %4345  ;;  %v2904_v29 = vld [vmem:[#allocation2 + $0x18] sm:$0xff] (!%p3362_p13) }
 0x848   : > { %v2641_v24 = vadd.f32 %v2640_v58, %v2639_v60 }
 0x84a   : > { %4347 = vtanh.f32 %v2641_v24 }
 0x854   : > { %v4348_v56 = vpop.eup %4347 }
 0x855   : > { %v2643_v2 = vmul.f32 %v4348_v56, %v4346_v27 }
 0x857   : > { %2647 = vst [vmem:[#allocation2 + $0x30] sm:$0xff] %v2643_v2  ;;  %2783 = vmatmul.mubr.f32.vlgmr.msra.gmra.mrb[14].mxu0 %v2643_v2  ;;  %2854 = vmatmul.mubr.f32.vlgmr.msra.gmra.mrb[14].mxu1 %v2643_v2 }
 0x858   : > { %4022 = vmatpush3.bf16.msra.mxu0 (!%p3362_p13), %v4019_v49  ;;  %4123 = vmatpush3.bf16.msra.mxu1 (!%p3362_p13), %v4019_v49 }
 0x859   : > { %4024 = vmatprep.subr.bf16.mxu0 (!%p3362_p13), %v4023_v13  ;;  %4116 = vmatprep.subr.bf16.mxu1 (!%p3362_p13), %v4023_v13 }
 0x85a   : > { %3431 = vmatprep.mubr.f32.mxu0 (!%p3362_p13), %v2901_v40  ;;  %3437 = vmatprep.mubr.f32.mxu1 (!%p3362_p13), %v2905_v48 }
 0x85c   : > { %4026 = vmatpush3.bf16.msra.mxu0 (!%p3362_p13), %v4023_v13  ;;  %4124 = vmatpush3.bf16.msra.mxu1 (!%p3362_p13), %v4023_v13 }
 0x85d   : > { %4028 = vmatprep.subr.bf16.mxu0 (!%p3362_p13), %v4027_v37  ;;  %4117 = vmatprep.subr.bf16.mxu1 (!%p3362_p13), %v4027_v37 }
 0x85e   : > { %v2907_v16 = vld [vmem:[#allocation2 + $0x30] sm:$0xff] (!%p3362_p13) }
 0x860   : > { %4030 = vmatpush3.bf16.msra.mxu0 (!%p3362_p13), %v4027_v37  ;;  %4125 = vmatpush3.bf16.msra.mxu1 (!%p3362_p13), %v4027_v37 }
 0x861   : > { %4032 = vmatprep.subr.bf16.mxu0 (!%p3362_p13), %v4031_v23  ;;  %4118 = vmatprep.subr.bf16.mxu1 (!%p3362_p13), %v4031_v23 }
 0x864   : > { %4034 = vmatpush3.bf16.msra.mxu0 (!%p3362_p13), %v4031_v23  ;;  %4126 = vmatpush3.bf16.msra.mxu1 (!%p3362_p13), %v4031_v23 }
 0x865   : > { %4036 = vmatprep.subr.bf16.mxu0 (!%p3362_p13), %v4035_v55  ;;  %4119 = vmatprep.subr.bf16.mxu1 (!%p3362_p13), %v4035_v55 }
 0x868   : > { %4038 = vmatpush3.bf16.msra.mxu0 (!%p3362_p13), %v4035_v55  ;;  %4127 = vmatpush3.bf16.msra.mxu1 (!%p3362_p13), %v4035_v55 }
 0x869   : > { %4040 = vmatprep.subr.bf16.mxu0 (!%p3362_p13), %v4039_v46  ;;  %4120 = vmatprep.subr.bf16.mxu1 (!%p3362_p13), %v4039_v46 }
 0x86c   : > { %4042 = vmatpush3.bf16.msra.mxu0 (!%p3362_p13), %v4039_v46  ;;  %4128 = vmatpush3.bf16.msra.mxu1 (!%p3362_p13), %v4039_v46 }
 0x86d   : > { %4044 = vmatprep.subr.bf16.mxu0 (!%p3362_p13), %v4043_v34  ;;  %4121 = vmatprep.subr.bf16.mxu1 (!%p3362_p13), %v4043_v34 }
 0x870   : > { %4046 = vmatpush3.bf16.msra.mxu0 (!%p3362_p13), %v4043_v34  ;;  %4129 = vmatpush3.bf16.msra.mxu1 (!%p3362_p13), %v4043_v34 }
 0x871   : > { %4048 = vmatprep.subr.bf16.mxu0 (!%p3362_p13), %v4047_v17  ;;  %4122 = vmatprep.subr.bf16.mxu1 (!%p3362_p13), %v4047_v17 }
 0x874   : > { %4050 = vmatpush3.bf16.msra.mxu0 (!%p3362_p13), %v4047_v17  ;;  %4130 = vmatpush3.bf16.msra.mxu1 (!%p3362_p13), %v4047_v17 }
 0x877   : > { %3432 = vmatmul.mubr.f32.vlgmr.msra.gmra.mrb[0].mxu0 (!%p3362_p13), %v2902_v22  ;;  %3438 = vmatmul.mubr.f32.vlgmr.msra.gmra.mrb[0].mxu1 (!%p3362_p13), %v2906_v1 }
 0x878   : > { %3434 = vmatprep.mubr.f32.mxu0 (!%p3362_p13), %v2903_v12  ;;  %3440 = vmatprep.mubr.f32.mxu1 (!%p3362_p13), %v2907_v16 }
 0x87b   : > { %3435 = vmatmul.mubr.f32.gmra.mrb[2].mxu0 (!%p3362_p13), %v2904_v29 }
 0x92a   : > { %v2784_v6 = vpop.f32.mrb[14].mxu0  ;;  %v2855_v11 = vpop.f32.mrb[14].mxu1 }
 0x92b   : > { %v4065_v26 = vadd.f32 %v2784_v6, %v5422_v45  ;;  %v2786_v30 = vpop.f32.mrb[15].mxu0  ;;  %v2857_v36 = vpop.f32.mrb[15].mxu1  ;;  %v4081_v19 = vadd.f32 %v2855_v11, %v5431_v5 }
 0x92c   : > { %v4066_v35 = vadd.f32 %v2786_v30, %v5424_v47  ;;  %v4082_v42 = vadd.f32 %v2857_v36, %v5428_v63 }
 0x92d   : > { %v3359_v3 = vmul.f32 -1.442695, %v4065_v26 }
 0x92e   : > { %v3360_v8 = vmul.f32 -1.442695, %v4066_v35  ;;  %v3361_v9 = vmul.f32 -1.442695, %v4082_v42 }
 0x92f   : > { %4349 = vpow2.f32 %v3359_v3 }
 0x930   : > { %4351 = vpow2.f32 %v3360_v8 }
 0x931   : > { %4353 = vpow2.f32 %v3361_v9 }
 0x932   : > { %4355 = vtanh.f32 %v4081_v19 }
 0x939   : > { %v4350_v20 = vpop.eup %4349 }
 0x93a   : > { %v4352_v28 = vpop.eup %4351  ;;  %v2867_v38 = vadd.f32 1.0, %v4350_v20 }
 0x93b   : > { %v2873_v45 = vadd.f32 1.0, %v4352_v28  ;;  %v4354_v47 = vpop.eup %4353 }
 0x93c   : > { %4357 = vrcp.f32 %v2867_v38  ;;  %v4356_v39 = vpop.eup %4355  ;;  %v2880_v10 = vadd.f32 1.0, %v4354_v47 }
 0x93d   : > { %4359 = vrcp.f32 %v2873_v45 }
 0x93e   : > { %4361 = vrcp.f32 %v2880_v10 }
 0x946   : > { %v4358_v41 = vpop.eup %4357 }
 0x947   : > { %v4360_v4 = vpop.eup %4359  ;;  %v2885_v53 = vmul.f32 %v4358_v41, %v4356_v39 }
 0x948   : > { %v2884_v63 = vmul.f32 %v4360_v4, %v2641_v24  ;;  %v4362_v5 = vpop.eup %4361 }
 0x94a   : > { %v2886_v43 = vadd.f32 %v2885_v53, %v2884_v63  ;;  %v3433_v60 = vpop.f32.mrb[0].mxu0 (!%p3362_p13)  ;;  %v3439_v24 = vpop.f32.mrb[0].mxu1 (!%p3362_p13) }
 0x94b   : > { %v3004_v27 = vadd.f32 (!%p3362_p13), %v3433_v60, %v3363_v0  ;;  %v3024_v56 = vadd.f32 (!%p3362_p13), %v3439_v24, %v3363_v0  ;;  %v2998_v2 = vpop.f32.mrb[1].mxu0 (!%p3362_p13)  ;;  %v3018_v6 = vpop.f32.mrb[1].mxu1 (!%p3362_p13) }
 0x94c   : > { %4363 = vtanh.f32 %v2886_v43  ;;  %2896 = vst [vmem:[%s558_s8] sm:$0xff] %v2886_v43  ;;  %v2999_v11 = vadd.f32 (!%p3362_p13), %v3363_v0, %v2998_v2  ;;  %v3019_v26 = vadd.f32 (!%p3362_p13), %v3363_v0, %v3018_v6 }
 0x94d   : > { %3038 = vst [vmem:[#allocation18 + $0x8] sm:$0xff] (!%p3362_p13), %v3004_v27  ;;  %3042 = vst [vmem:[#allocation18 + $0x28] sm:$0xff] (!%p3362_p13), %v3024_v56 }
 0x94e   : > { %3037 = vst [vmem:[#allocation18] sm:$0xff] (!%p3362_p13), %v2999_v11  ;;  %3041 = vst [vmem:[#allocation18 + $0x20] sm:$0xff] (!%p3362_p13), %v3019_v26  ;;  %v3436_v30 = vpop.f32.mrb[2].mxu0 (!%p3362_p13) }
 0x94f   : > { %v3014_v35 = vadd.f32 (!%p3362_p13), %v3436_v30, %v3363_v0  ;;  %v3008_v8 = vpop.f32.mrb[3].mxu0 (!%p3362_p13) }
 0x950   : > { %v3009_v9 = vadd.f32 (!%p3362_p13), %v3363_v0, %v3008_v8 }
 0x951   : > { %3040 = vst [vmem:[#allocation18 + $0x18] sm:$0xff] (!%p3362_p13), %v3014_v35 }
 0x952   : > { %3039 = vst [vmem:[#allocation18 + $0x10] sm:$0xff] (!%p3362_p13), %v3009_v9 }
 0x953   : > { %2900 = sbr.rel (%p3362_p13) target bundleno = 2617 (0xa39), region = 88 }
 0x956   : > { %v4364_v61 = vpop.eup %4363 }
 0x957   : > { %v2888_v15 = vmul.f32 %v4364_v61, %v4362_v5 }
 0x959   : > { %2892 = vst [vmem:[#allocation2 + $0x38] sm:$0xff] %v2888_v15  ;;  %2894 = vst [vmem:[%s551_s6] sm:$0xff] %v2888_v15 }
 0x960   : > { %v2908_v58 = vld [vmem:[#allocation2 + $0x38] sm:$0xff] }
 0x961   : > { %3441 = vmatmul.mubr.f32.gmra.mrb[2].mxu1 %v2908_v58 }
 0xa34   : > { %v3442_v36 = vpop.f32.mrb[2].mxu1 }
 0xa35   : > { %v3034_v3 = vadd.f32 %v3442_v36, %v3363_v0  ;;  %v3028_v42 = vpop.f32.mrb[3].mxu1 }
 0xa36   : > { %v3029_v19 = vadd.f32 %v3363_v0, %v3028_v42 }
 0xa37   : > { %3044 = vst [vmem:[#allocation18 + $0x38] sm:$0xff] %v3034_v3 }
 0xa38   : > { %3043 = vst [vmem:[#allocation18 + $0x30] sm:$0xff] %v3029_v19 }
 0xa39 PF: > { %s6017_s11 = sld [smem:[#allocation33_spill]]  ;;  %s3367_s19 = sshll.u32 %s4804_s17, 7 }
 0xa3a   : > { %s6018_s23 = sld [smem:[#allocation39_spill]]  ;;  %s3077_s7 = sshll.u32 %s551_s6, 4  ;;  %s3078_s7 = int_to_ptr.vmem [resolvable:$true] %s3077_s7 }
 0xa3b   : > { %s3046_s29 = scalar_lea.sflag [#allocation20], %s5105_s24  ;;  %s4571_s9 = scalar_lea.vmem %s3078_s7, 128 }
 0xa3c   : > { %p4572_p0 = scmp.ne.s32.totalorder %s3078_s7, %s4571_s9  ;;  %s4725_s27 = smov [#allocation19]  }
 0xa3d   : > { %s4575_s22 = sshll.u32 %s4725_s27, 4  ;;  %s4576_s22 = int_to_ptr.vmem [resolvable:$false] %s4575_s22 }
 0xa3e   : > { %s4577_s28 = scalar_lea.vmem %s4576_s22, 256  ;;  %p4578_p9 = scmp.lt.s32.totalorder %s3078_s7, %s4576_s22 }
 0xa3f   : > { %p6019_p6 = scmp.ne.s32.totalorder %s6017_s11, 0  ;;  %p4579_p10 = scmp.lt.s32.totalorder %s4577_s28, %s4571_s9 }
 0xa40   : > { %s5840_s13 = scalar_lea.hbm %s6018_s23, %s3367_s19 }
 0xa41   : > { %p4573_p12 = pnand %p4572_p0, %p6019_p6  ;;  %p4580_p2 = por %p4579_p10, %p4578_p9 }
 0xa43   : > { %p4574_p3 = pneg %p4573_p12 }
 0xa45   : > { %p4581_p1 = pnand %p4580_p2, %p4574_p3 }
 0xa47   : > { %4584 = shalt.err (!%p4581_p1)
}
 0xa48   : > { %s4585_s30 = scalar_lea.hbm %s5840_s13, 128  ;;  %s4589_s26 = scalar_lea.hbm %s6018_s23, 384 }
 0xa49   : > { %p4586_p5 = scmp.ne.s32.totalorder %s5840_s13, %s4585_s30  ;;  %p4590_p7 = scmp.lt.u32.totalorder %s5840_s13, %s6018_s23 }
 0xa4a   : > { %p4591_p11 = scmp.lt.u32.totalorder %s4589_s26, %s4585_s30  ;;  %p4593_p0 = scmp.lt.u32.totalorder %s4585_s30, %s5840_s13 }
 0xa4b   : > { %p4587_p8 = pnand %p4586_p5, %p6019_p6 }
 0xa4c   : > { %p4592_p13 = por %p4591_p11, %p4590_p7 }
 0xa4d   : > { %p4588_p4 = pneg %p4587_p8 }
 0xa4e   : > { %p4594_p12 = por %p4593_p0, %p4592_p13 }
 0xa50   : > { %p4595_p3 = pnand %p4594_p12, %p4588_p4 }
 0xa52   : > { %4598 = shalt.err (!%p4595_p3)
}
 0xa53   : > { %4151 = dma.vmem_to_hbm [thread:$0]  (%p6019_p6), %s3078_s7, 128, %s5840_s13, %s3046_s29  }
 0xa54   : > { %s4726_s25 = smov [#allocation18]   ;;  %p6020_p10 = scmp.eq.s32.totalorder %s4804_s17, 2 }
 0xa55   : > { %s3061_s21 = sshll.u32 %s4726_s25, 4  ;;  %s3062_s21 = int_to_ptr.vmem [resolvable:$true] %s3061_s21 }
 0xa56   : > { %s4599_s18 = scalar_lea.vmem %s3062_s21, 1024  ;;  %p4606_p5 = scmp.lt.s32.totalorder %s3062_s21, %s3062_s21 }
 0xa57   : > { %p4600_p9 = scmp.ne.s32.totalorder %s3062_s21, %s4599_s18  ;;  %p4607_p8 = scmp.lt.s32.totalorder %s4599_s18, %s4599_s18 }
 0xa59   : > { %p4601_p2 = pnand %p4600_p9, %p6020_p10  ;;  %p4608_p7 = por %p4607_p8, %p4606_p5 }
 0xa5b   : > { %p4602_p1 = pneg %p4601_p2 }
 0xa5d   : > { %p4609_p4 = pnand %p4608_p7, %p4602_p1 }
 0xa5f   : > { %4612 = shalt.err (!%p4609_p4)
}
 0xa60   : > { %s6021_s27 = sld [smem:[#allocation38_spill]]  ;;  %p6022_p13 = pmov %p6020_p10 }
 0xa66   : > { %s4613_s22 = scalar_lea.hbm %s6021_s27, 1024 }
 0xa67   : > { %p4614_p11 = scmp.ne.s32.totalorder %s6021_s27, %s4613_s22  ;;  %p4619_p3 = scmp.lt.u32.totalorder %s4613_s22, %s6021_s27 }
 0xa69   : > { %p4615_p0 = pnand %p4614_p11, %p6022_p13 }
 0xa6b   : > { %p4616_p12 = pneg %p4615_p0 }
 0xa6d   : > { %p4621_p9 = pnand %p4619_p3, %p4616_p12 }
 0xa6f   : > { %4624 = shalt.err (!%p4621_p9)
}
 0xa70   : > { %s4727_s15 = smov 128   ;;  %s4728_s20 = smov 8  }
 0xa71   : > { %4150 = dma.vmem_to_hbm [thread:$0]  (%p6020_p10), %s3062_s21, 1024, %s6021_s27, [#allocation8], %s4727_s15, %s4727_s15, %s4728_s20  }
 0xa72   : > { %s6023_s18 = sld [smem:[#allocation40_spill]]  ;;  %s3090_s9 = sshll.u32 %s558_s8, 4  ;;  %s3091_s9 = int_to_ptr.vmem [resolvable:$true] %s3090_s9 }
 0xa73   : > { %s4625_s22 = scalar_lea.vmem %s3091_s9, 128  ;;  %s4729_s28 = smov [#allocation21]  }
 0xa74   : > { %p4626_p2 = scmp.ne.s32.totalorder %s3091_s9, %s4625_s22  ;;  %s4629_s13 = sshll.u32 %s4729_s28, 4  ;;  %s4630_s13 = int_to_ptr.vmem [resolvable:$false] %s4629_s13 }
 0xa75   : > { %s4631_s7 = scalar_lea.vmem %s4630_s13, 256  ;;  %p4632_p8 = scmp.lt.s32.totalorder %s3091_s9, %s4630_s13 }
 0xa76   : > { %p4627_p1 = pnand %p4626_p2, %p6019_p6  ;;  %p4633_p7 = scmp.lt.s32.totalorder %s4631_s7, %s4625_s22 }
 0xa78   : > { %s5887_s1 = scalar_lea.hbm %s6023_s18, %s3367_s19  ;;  %p4628_p5 = pneg %p4627_p1 }
 0xa79   : > { %p4634_p4 = por %p4633_p7, %p4632_p8 }
 0xa7b   : > { %p4635_p11 = pnand %p4634_p4, %p4628_p5 }
 0xa7d   : > { %4638 = shalt.err (!%p4635_p11)
}
 0xa7e   : > { %s4639_s12 = scalar_lea.hbm %s5887_s1, 128  ;;  %s4643_s21 = scalar_lea.hbm %s6023_s18, 384 }
 0xa7f   : > { %p4640_p13 = scmp.ne.s32.totalorder %s5887_s1, %s4639_s12  ;;  %p4644_p3 = scmp.lt.u32.totalorder %s5887_s1, %s6023_s18 }
 0xa80   : > { %p4645_p9 = scmp.lt.u32.totalorder %s4643_s21, %s4639_s12  ;;  %p4647_p2 = scmp.lt.u32.totalorder %s4639_s12, %s5887_s1 }
 0xa81   : > { %p4641_p0 = pnand %p4640_p13, %p6019_p6 }
 0xa82   : > { %p4646_p10 = por %p4645_p9, %p4644_p3 }
 0xa83   : > { %p4642_p12 = pneg %p4641_p0 }
 0xa84   : > { %p4648_p1 = por %p4647_p2, %p4646_p10 }
 0xa86   : > { %p4649_p5 = pnand %p4648_p1, %p4642_p12 }
 0xa88   : > { %4652 = shalt.err (!%p4649_p5)
}
 0xa89   : > { %4152 = dma.vmem_to_hbm [thread:$0]  (%p6019_p6), %s3091_s9, 128, %s5887_s1, %s3046_s29  }
 0xa8a   : > { %p6024_p8 = scmp.eq.s32.totalorder %s4804_s17, 2 }
 0xa8c   : > { %4690 = dma.done.wait (%p6024_p8), [#allocation8], 1024   ;;  %p6025_p7 = pmov %p6024_p8 }
 0xa8e   : > { %4692 = vsyncadd (%p6025_p7), [#allocation8], 4294966272 }
 0xa8f PF: > { %s6026_s20 = sld [smem:[#allocation34_spill]]  ;;  %p4194_p4 = scmp.ge.s32.totalorder %s4711_s16, 2 }
 0xa90   : > { %s6027_s26 = sadd.s32 4294967294, %s4711_s16  }
 0xa91   : > { %s3106_s6 = sand.u32 1, %s6027_s26  }
 0xa92   : > { %s3107_s11 = scalar_lea.sflag [#allocation20], %s3106_s6 }
 0xa95   : > { %p6028_p11 = scmp.ne.s32.totalorder %s6026_s20, 0 }
 0xa97   : > { %p4181_p13 = pnand %p4194_p4, %p6028_p11 }
 0xa99   : > { %4694 = dma.done.wait (!%p4181_p13), %s3107_s11, 256  }
 0xa9a   : > { %4696 = vsyncadd (!%p4181_p13), %s3107_s11, 4294967040  ;;  %s6029_s16 = sld [smem:[#allocation30_spill]]  ;;  %s6030_s24 = sld [smem:[#allocation29_spill]] }
 0xa9b   : > { %s6031_s15 = sld [smem:[#allocation31_spill]]  ;;  %s6032_s13 = smov %s4703_s14 }
 0xaa0   : > { %p32_p6 = scmp.ge.s32.totalorder %s6029_s16, 5   ;;  %s6033_s14 = smov %s6030_s24 }
 0xaa2   :  { %34 = sbr.rel (!%p32_p6) target bundleno = 18 (0x12), region = 200 }
 0xaa9   :  { %3121 = vsyncpa [#allocation7], 1 }
 0xaaa   :  { %3123 = vsyncpa [#allocation7 + $0x1], 1 }
 0xaab   :  { %3124 = vsyncpa [#allocation10], 1 }
 0xaac   :  { %3126 = vsyncpa [#allocation10 + $0x1], 1 }
 0xaad   :  { %3127 = vsyncpa [#allocation13], 1 }
 0xaae   :  { %3129 = vsyncpa [#allocation13 + $0x1], 1 }
 0xaaf   :  { %3130 = vsyncpa [#allocation16], 1 }
 0xab0   :  { %3132 = vsyncpa [#allocation16 + $0x1], 1 }
 0xab1   :  { %3133 = vsyncpa [#allocation8], 1 }
 0xab2   :  { %3135 = vsyncpa [#allocation8 + $0x1], 1 }
 0xab3   :  { %3136 = vsyncpa [#allocation20], 1 }
 0xab4   :  { %3138 = vsyncpa [#allocation20 + $0x1], 1 }

</bundles_post_ra>
